<compile_context>
chip_gen: v7x
topology: tpu7x:2x2x1
jax: 0.10.0
libtpu: 0.0.40
codegen_flags: <defaults>
</compile_context>

<pallas_src>
import functools

import jax
import jax.numpy as jnp
import numpy as np
from jax import lax
from jax.experimental import pallas as pl
from jax.experimental.pallas import tpu as pltpu


def _round_up(x, m):
    return (x + m - 1) // m * m


def _vmem_limit_bytes():
    """Generation-aware VMEM limit with headroom for Mosaic internal scratch."""
    try:
        cap = int(pltpu.get_tpu_info().vmem_capacity_bytes)
    except Exception:  # query unavailable -> conservative (v7x-safe) default
        cap = 64 * 1024 * 1024
    return min(cap * 3 // 4, 96 * 1024 * 1024)


def _kernel_vmem_estimate(rb, wp, cpi, cpm, cpo):
    """Rough per-grid-step VMEM bytes for row block size `rb` (upper-bound-ish)."""
    r_in, r_mid, r_out = (rb + 4) * wp, (rb + 2) * wp, rb * wp
    bf, f32 = 2, 4
    b = 2 * r_in * cpi * bf                        # input block (double-buffered)
    b += 2 * r_out * cpo * bf                      # output block (double-buffered)
    b += 2 * r_mid * 128 * bf                      # mask (lane-padded, double-buffered)
    b += 9 * cpi * cpm * bf + 9 * cpm * cpo * bf   # weights (single-buffered)
    b += r_mid * 3 * cpi * bf                      # conv1 ky-fold concat
    b += 3 * r_mid * cpm * f32                     # conv1 f32 accum / rolled partials
    b += r_mid * cpm * bf                          # h1 (bf16)
    b += r_out * 3 * cpm * bf                      # conv2 ky-fold concat
    b += 3 * r_out * cpo * f32                     # conv2 f32 accum / epilogue temps
    return b


def _choose_row_block(h, wp, cpi, cpm, cpo, budget_bytes):
    for rb in (128, 96, 64, 48, 32, 24, 16, 8):
        if rb <= max(8, h) and _kernel_vmem_estimate(rb, wp, cpi, cpm, cpo) <= budget_bytes:
            return rb
    return 8


def make_basic_block_kernel(RB, WP, CPI, CPM, CPO):
    """Fused BasicBlock kernel body for one (batch, row_block) grid step."""
    R_IN = (RB + 4) * WP    # input rows per step (2 spatial-row halo each side)
    R_MID = (RB + 2) * WP   # conv1 output rows (1 spatial-row halo each side)
    R_OUT = RB * WP         # output rows per step

    def conv3x3(src, w_ref, n_out, col_offset):
        """3x3 / pad=1 conv on a flat (row, channel) slab.

        src:   (n_out + 2*WP, Cin_p) bf16.
        w_ref: (3, 3*Cin_p, Cout_p) bf16 ref, indexed [kx, ky*Cin_p + ci, co].
        col_offset=0 : src columns are padded-column indexed (left zero-pad in col 0).
        col_offset=1 : src columns are image-column indexed; the zero pad is
                       synthesized by the result rolls (requires cols >= W zeroed).
        Returns (n_out, Cout_p) f32; columns u >= W are garbage (masked later or
        stripped by the wrapper) and absorb all roll wrap-around.
        """
        # Fold the three ky taps into the contraction dim: three row-shifted,
        # sublane-aligned views of src lane-concatenated -> K = 3*Cin_p.
        a = jnp.concatenate(
            [src[0:n_out], src[WP:WP + n_out], src[2 * WP:2 * WP + n_out]], axis=1)
        acc = None
        for kx in range(3):
            part = jnp.dot(a, w_ref[kx], preferred_element_type=jnp.float32)
            shift = (col_offset - kx) % n_out   # out[r] += part[(r + kx - off) mod n]
            if shift:
                part = pltpu.roll(part, shift=shift, axis=0)   # XLU, ~free
            acc = part if acc is None else acc + part
        return acc

    def kernel(xf_ref, mask_ref, w1_ref, s1_ref, b1_ref, w2_ref, s2_ref, b2_ref,
               out_ref):
        xf = xf_ref[0, 0]      # (R_IN, CPI) bf16, zero border already in place
        mask = mask_ref[0]     # (R_MID, 1) bf16: 1 inside the image, 0 elsewhere

        # ---- conv1 -> bn1 -> relu on RB+2 rows (halo rows feed conv2's vertical pad)
        acc1 = conv3x3(xf, w1_ref, R_MID, col_offset=0)             # f32
        h1 = jnp.maximum(acc1 * s1_ref[...] + b1_ref[...], 0.0) * mask
        h1 = h1.astype(jnp.bfloat16)

        # ---- conv2 -> bn2 -> + identity -> relu.
        # h1 is image-column indexed with zeroed padding columns / out-of-image
        # rows, so col_offset=1 makes the result rolls build conv2's zero border.
        acc2 = conv3x3(h1, w2_ref, R_OUT, col_offset=1)             # f32
        # identity = centre tap of the resident padded input block (no extra DMA):
        # identity[q*WP + x] = xf[(q + 2)*WP + (x + 1)].
        ident = pltpu.roll(xf[2 * WP:2 * WP + R_OUT].astype(jnp.float32),
                           shift=R_OUT - 1, axis=0)
        out = acc2 * s2_ref[...] + b2_ref[...] + ident
        # lane-dense, unmasked bf16 store; padding columns stripped by the wrapper.
        out_ref[0, 0] = jnp.maximum(out, 0.0).astype(jnp.bfloat16)

    return kernel


def _inv_spec(shape):
    """Grid-invariant block: full array, constant index, single-buffered if supported."""
    idx = lambda b, rb: (0,) * len(shape)
    try:
        return pl.BlockSpec(shape, idx, pipeline_mode=pl.Buffered(1))
    except Exception:  # older API without pipeline_mode / Buffered
        return pl.BlockSpec(shape, idx)


@functools.partial(jax.jit, static_argnames=("eps", "row_block"))
def basic_block_pallas(x_nchw, w1_oihw, bn1, w2_oihw, bn2, eps=1e-5, row_block=None):
    """x_nchw: (B, Cin, H, W) f32.  Conv weights in PyTorch OIHW layout.
    bn1/bn2: dicts with gamma, beta, mean, var (per-channel, eval-mode fold)."""
    B, CIN, H, W = x_nchw.shape
    CMID = w1_oihw.shape[0]
    COUT = w2_oihw.shape[0]
    assert COUT == CIN, "identity residual requires planes == inplanes"

    CPI = _round_up(CIN, 128)    # lane-dense channel padding
    CPM = _round_up(CMID, 128)
    CPO = _round_up(COUT, 128)
    WP = _round_up(W + 2, 8)     # sublane-aligned padded width

    if row_block is None:
        RB = _choose_row_block(H, WP, CPI, CPM, CPO, int(0.9 * _vmem_limit_bytes()))
    else:
        RB = int(row_block)
    RB = max(1, min(RB, H))
    HP = _round_up(H, RB)        # padded image height (multiple of RB)
    NRB = HP // RB
    R_IN, R_MID, R_OUT = (RB + 4) * WP, (RB + 2) * WP, RB * WP

    # --- layout: NCHW -> zero-bordered NHWC bf16 slab -> overlapping row blocks ---
    x_nhwc = jnp.transpose(x_nchw, (0, 2, 3, 1)).astype(jnp.bfloat16)
    slab = jnp.pad(x_nhwc, ((0, 0), (2, HP - H + 2), (1, WP - W - 1), (0, CPI - CIN)))
    # TODO(synk): zero-copy halos via pl.Element row indexing instead of materializing.
    xfb = jnp.stack([slab[:, rb * RB:rb * RB + RB + 4] for rb in range(NRB)], axis=1)
    xfb = xfb.reshape(B, NRB, R_IN, CPI)

    # per-row-block validity mask: 1 where (image row, image column) is real.
    mask_np = np.zeros((NRB, RB + 2, WP), np.float32)
    for rb in range(NRB):
        for s in range(RB + 2):
            y = rb * RB + s - 1
            if 0 <= y < H:
                mask_np[rb, s, :W] = 1.0
    mask = jnp.asarray(mask_np.reshape(NRB, R_MID, 1), dtype=jnp.bfloat16)

    def prep_w(w_oihw, cin, cp_in, cp_out):
        cout = w_oihw.shape[0]
        w = jnp.transpose(w_oihw, (3, 2, 1, 0)).astype(jnp.float32)  # (kx,ky,ci,co)
        w = jnp.pad(w, ((0, 0), (0, 0), (0, cp_in - cin), (0, cp_out - cout)))
        # fold ky into the contraction dim: [kx, ky*cp_in + ci, co]
        return w.reshape(3, 3 * cp_in, cp_out).astype(jnp.bfloat16)

    w1k = prep_w(w1_oihw, CIN, CPI, CPM)
    w2k = prep_w(w2_oihw, CMID, CPM, CPO)

    def fold_bn(p, c, cp):
        scale = p["gamma"] / jnp.sqrt(p["var"] + eps)
        bias = p["beta"] - p["mean"] * scale
        scale = jnp.pad(scale.astype(jnp.float32), (0, cp - c)).reshape(1, cp)
        bias = jnp.pad(bias.astype(jnp.float32), (0, cp - c)).reshape(1, cp)
        return scale, bias

    s1, b1 = fold_bn(bn1, CMID, CPM)
    s2, b2 = fold_bn(bn2, COUT, CPO)

    kernel = make_basic_block_kernel(RB, WP, CPI, CPM, CPO)

    out_flat = pl.pallas_call(
        kernel,
        out_shape=jax.ShapeDtypeStruct((B, NRB, R_OUT, CPO), jnp.bfloat16),
        grid_spec=pltpu.PrefetchScalarGridSpec(
            num_scalar_prefetch=0,
            grid=(B, NRB),
            in_specs=[
                pl.BlockSpec((1, 1, R_IN, CPI), lambda b, rb: (b, rb, 0, 0)),  # input rows
                pl.BlockSpec((1, R_MID, 1), lambda b, rb: (rb, 0, 0)),         # validity mask
                _inv_spec((3, 3 * CPI, CPM)),                                  # conv1 weights
                _inv_spec((1, CPM)), _inv_spec((1, CPM)),                      # bn1 scale/bias
                _inv_spec((3, 3 * CPM, CPO)),                                  # conv2 weights
                _inv_spec((1, CPO)), _inv_spec((1, CPO)),                      # bn2 scale/bias
            ],
            out_specs=pl.BlockSpec((1, 1, R_OUT, CPO), lambda b, rb: (b, rb, 0, 0)),
        ),
        compiler_params=pltpu.CompilerParams(
            dimension_semantics=("parallel", "parallel"),
            vmem_limit_bytes=_vmem_limit_bytes(),
        ),
    )(xfb, mask, w1k, s1, b1, w2k, s2, b2)

    # strip width / channel / row padding, back to NCHW f32
    out = out_flat.reshape(B, HP, WP, CPO)[:, :H, :W, :COUT]
    return jnp.transpose(out, (0, 3, 1, 2)).astype(jnp.float32)


def basic_block_reference(x, w1, bn1, w2, bn2, eps=1e-5):
    """Pure-JAX f32 reference (NCHW, lax conv) mirroring the PyTorch forward."""
    def conv(x, w):
        return lax.conv_general_dilated(
            x, w, window_strides=(1, 1), padding=((1, 1), (1, 1)),
            dimension_numbers=("NCHW", "OIHW", "NCHW"))

    def bn(x, p):
        scale = (p["gamma"] / jnp.sqrt(p["var"] + eps)).reshape(1, -1, 1, 1)
        bias = (p["beta"] - p["mean"] * p["gamma"] / jnp.sqrt(p["var"] + eps)).reshape(1, -1, 1, 1)
        return x * scale + bias

    out = jax.nn.relu(bn(conv(x, w1), bn1))
    out = bn(conv(out, w2), bn2)
    return jax.nn.relu(out + x)


if __name__ == "__main__":
    B, C, H, W = 2, 4, 16, 16        # inplanes = planes = 4, stride = 1, no downsample
    key = jax.random.PRNGKey(0)
    kx, kw1, kw2, kb1, kb2 = jax.random.split(key, 5)

    x = jax.random.normal(kx, (B, C, H, W), jnp.float32)

    # conv weights in PyTorch OIHW layout, deterministic init
    w1 = jax.random.normal(kw1, (C, C, 3, 3), jnp.float32) * 0.1
    w2 = jax.random.normal(kw2, (C, C, 3, 3), jnp.float32) * 0.1

    def make_bn(k, c):
        kg, kb, km, kv = jax.random.split(k, 4)
        return {
            "gamma": 1.0 + 0.1 * jax.random.normal(kg, (c,), jnp.float32),
            "beta": 0.1 * jax.random.normal(kb, (c,), jnp.float32),
            "mean": 0.1 * jax.random.normal(km, (c,), jnp.float32),
            "var": jnp.abs(jax.random.normal(kv, (c,), jnp.float32)) + 0.5,
        }

    bn1 = make_bn(kb1, C)
    bn2 = make_bn(kb2, C)

    ref = basic_block_reference(x, w1, bn1, w2, bn2)

    # 1) exercise the row-blocked path (2 row blocks per image, 2-row halos)
    out_blocked = jax.block_until_ready(
        basic_block_pallas(x, w1, bn1, w2, bn2, row_block=8))
    # 2) automatic tile choice (whole image fits comfortably at this size)
    out_auto = jax.block_until_ready(basic_block_pallas(x, w1, bn1, w2, bn2))

    # f32 reference; tolerance accounts for bf16 weights/activations/output.
    np.testing.assert_allclose(np.asarray(out_blocked), np.asarray(ref),
                               rtol=3e-2, atol=3e-2)
    np.testing.assert_allclose(np.asarray(out_auto), np.asarray(ref),
                               rtol=3e-2, atol=3e-2)

    print("KERNEL_OK")
</pallas_src>

<mosaic_0001>
module attributes {stable_mosaic.version = 11 : i64} {
  func.func @kernel(%arg0: i32, %arg1: i32, %arg2: memref<1x1x288x128xbf16, #tpu.memory_space<vmem>>, %arg3: memref<1x240x1xbf16, #tpu.memory_space<vmem>>, %arg4: memref<3x384x128xbf16, #tpu.memory_space<vmem>>, %arg5: memref<1x128xf32, #tpu.memory_space<vmem>>, %arg6: memref<1x128xf32, #tpu.memory_space<vmem>>, %arg7: memref<3x384x128xbf16, #tpu.memory_space<vmem>>, %arg8: memref<1x128xf32, #tpu.memory_space<vmem>>, %arg9: memref<1x128xf32, #tpu.memory_space<vmem>>, %arg10: memref<1x1x192x128xbf16, #tpu.memory_space<vmem>>) attributes {dimension_semantics = [#tpu.dimension_semantics<parallel>, #tpu.dimension_semantics<parallel>], iteration_bounds = array<i64: 2, 2>, scalar_prefetch = 0 : i64, scratch_operands = 0 : i64, tpu.core_type = #tpu.core_type<tc>, window_params = [{transform_indices = @transform_0, window_bounds = array<i64: 1, 1, 288, 128>}, {transform_indices = @transform_1, window_bounds = array<i64: 1, 240, 1>}, {pipeline_mode = #tpu.pipeline_mode<synchronous>, transform_indices = @transform_2, window_bounds = array<i64: 3, 384, 128>}, {pipeline_mode = #tpu.pipeline_mode<synchronous>, transform_indices = @transform_3, window_bounds = array<i64: 1, 128>}, {pipeline_mode = #tpu.pipeline_mode<synchronous>, transform_indices = @transform_4, window_bounds = array<i64: 1, 128>}, {pipeline_mode = #tpu.pipeline_mode<synchronous>, transform_indices = @transform_5, window_bounds = array<i64: 3, 384, 128>}, {pipeline_mode = #tpu.pipeline_mode<synchronous>, transform_indices = @transform_6, window_bounds = array<i64: 1, 128>}, {pipeline_mode = #tpu.pipeline_mode<synchronous>, transform_indices = @transform_7, window_bounds = array<i64: 1, 128>}, {transform_indices = @transform_8, window_bounds = array<i64: 1, 1, 192, 128>}]} {
    %c0 = arith.constant 0 : index
    %c0_0 = arith.constant 0 : index
    %c0_1 = arith.constant 0 : index
    %c0_2 = arith.constant 0 : index
    %0 = vector.load %arg2[%c0, %c0_0, %c0_1, %c0_2] : memref<1x1x288x128xbf16, #tpu.memory_space<vmem>>, vector<1x1x288x128xbf16>
    %1 = vector.shape_cast %0 : vector<1x1x288x128xbf16> to vector<288x128xbf16>
    %c0_3 = arith.constant 0 : index
    %c0_4 = arith.constant 0 : index
    %c0_5 = arith.constant 0 : index
    %2 = vector.load %arg3[%c0_3, %c0_4, %c0_5] : memref<1x240x1xbf16, #tpu.memory_space<vmem>>, vector<1x240x1xbf16>
    %3 = vector.shape_cast %2 : vector<1x240x1xbf16> to vector<240x1xbf16>
    %4 = vector.extract_strided_slice %1 {offsets = [0, 0], sizes = [240, 128], strides = [1, 1]} : vector<288x128xbf16> to vector<240x128xbf16>
    %5 = vector.extract_strided_slice %1 {offsets = [24, 0], sizes = [240, 128], strides = [1, 1]} : vector<288x128xbf16> to vector<240x128xbf16>
    %6 = vector.extract_strided_slice %1 {offsets = [48, 0], sizes = [240, 128], strides = [1, 1]} : vector<288x128xbf16> to vector<240x128xbf16>
    %7 = tpu.concatenate %4, %5, %6 in 1 : vector<240x128xbf16>, vector<240x128xbf16>, vector<240x128xbf16> -> vector<240x384xbf16>
    %c0_6 = arith.constant 0 : index
    %c0_7 = arith.constant 0 : index
    %c0_8 = arith.constant 0 : index
    %8 = vector.load %arg4[%c0_6, %c0_7, %c0_8] : memref<3x384x128xbf16, #tpu.memory_space<vmem>>, vector<1x384x128xbf16>
    %9 = vector.shape_cast %8 : vector<1x384x128xbf16> to vector<384x128xbf16>
    %cst = arith.constant dense<0.000000e+00> : vector<240x128xf32>
    %10 = tpu.matmul %7, %9, %cst {dimension_numbers = #tpu.dot_dimension_numbers<[1], [0], [0], [1], [0, 0, 1, 1], [], []>} : vector<240x384xbf16>, vector<384x128xbf16>, vector<240x128xf32> -> vector<240x128xf32>
    %c1 = arith.constant 1 : index
    %c0_9 = arith.constant 0 : index
    %c0_10 = arith.constant 0 : index
    %11 = vector.load %arg4[%c1, %c0_9, %c0_10] : memref<3x384x128xbf16, #tpu.memory_space<vmem>>, vector<1x384x128xbf16>
    %12 = vector.shape_cast %11 : vector<1x384x128xbf16> to vector<384x128xbf16>
    %cst_11 = arith.constant dense<0.000000e+00> : vector<240x128xf32>
    %13 = tpu.matmul %7, %12, %cst_11 {dimension_numbers = #tpu.dot_dimension_numbers<[1], [0], [0], [1], [0, 0, 1, 1], [], []>} : vector<240x384xbf16>, vector<384x128xbf16>, vector<240x128xf32> -> vector<240x128xf32>
    %c239_i32 = arith.constant 239 : i32
    %14 = tpu.dynamic_rotate %13 by %c239_i32 dim 0 : vector<240x128xf32>, i32 -> vector<240x128xf32>
    %15 = arith.addf %10, %14 : vector<240x128xf32>
    %c2 = arith.constant 2 : index
    %c0_12 = arith.constant 0 : index
    %c0_13 = arith.constant 0 : index
    %16 = vector.load %arg4[%c2, %c0_12, %c0_13] : memref<3x384x128xbf16, #tpu.memory_space<vmem>>, vector<1x384x128xbf16>
    %17 = vector.shape_cast %16 : vector<1x384x128xbf16> to vector<384x128xbf16>
    %cst_14 = arith.constant dense<0.000000e+00> : vector<240x128xf32>
    %18 = tpu.matmul %7, %17, %cst_14 {dimension_numbers = #tpu.dot_dimension_numbers<[1], [0], [0], [1], [0, 0, 1, 1], [], []>} : vector<240x384xbf16>, vector<384x128xbf16>, vector<240x128xf32> -> vector<240x128xf32>
    %c238_i32 = arith.constant 238 : i32
    %19 = tpu.dynamic_rotate %18 by %c238_i32 dim 0 : vector<240x128xf32>, i32 -> vector<240x128xf32>
    %20 = arith.addf %15, %19 : vector<240x128xf32>
    %c0_15 = arith.constant 0 : index
    %c0_16 = arith.constant 0 : index
    %21 = vector.load %arg5[%c0_15, %c0_16] : memref<1x128xf32, #tpu.memory_space<vmem>>, vector<1x128xf32>
    %22 = vector.broadcast %21 : vector<1x128xf32> to vector<240x128xf32>
    %23 = arith.mulf %20, %22 : vector<240x128xf32>
    %c0_17 = arith.constant 0 : index
    %c0_18 = arith.constant 0 : index
    %24 = vector.load %arg6[%c0_17, %c0_18] : memref<1x128xf32, #tpu.memory_space<vmem>>, vector<1x128xf32>
    %25 = vector.broadcast %24 : vector<1x128xf32> to vector<240x128xf32>
    %26 = arith.addf %23, %25 : vector<240x128xf32>
    %cst_19 = arith.constant 0.000000e+00 : f32
    %27 = vector.broadcast %cst_19 : f32 to vector<240x128xf32>
    %28 = arith.maximumf %26, %27 : vector<240x128xf32>
    %29 = arith.extf %3 : vector<240x1xbf16> to vector<240x1xf32>
    %30 = vector.broadcast %29 : vector<240x1xf32> to vector<240x128xf32>
    %31 = arith.mulf %28, %30 : vector<240x128xf32>
    %32 = arith.truncf %31 : vector<240x128xf32> to vector<240x128xbf16>
    %33 = vector.extract_strided_slice %32 {offsets = [0, 0], sizes = [192, 128], strides = [1, 1]} : vector<240x128xbf16> to vector<192x128xbf16>
    %34 = vector.extract_strided_slice %32 {offsets = [24, 0], sizes = [192, 128], strides = [1, 1]} : vector<240x128xbf16> to vector<192x128xbf16>
    %35 = vector.extract_strided_slice %32 {offsets = [48, 0], sizes = [192, 128], strides = [1, 1]} : vector<240x128xbf16> to vector<192x128xbf16>
    %36 = tpu.concatenate %33, %34, %35 in 1 : vector<192x128xbf16>, vector<192x128xbf16>, vector<192x128xbf16> -> vector<192x384xbf16>
    %c0_20 = arith.constant 0 : index
    %c0_21 = arith.constant 0 : index
    %c0_22 = arith.constant 0 : index
    %37 = vector.load %arg7[%c0_20, %c0_21, %c0_22] : memref<3x384x128xbf16, #tpu.memory_space<vmem>>, vector<1x384x128xbf16>
    %38 = vector.shape_cast %37 : vector<1x384x128xbf16> to vector<384x128xbf16>
    %cst_23 = arith.constant dense<0.000000e+00> : vector<192x128xf32>
    %39 = tpu.matmul %36, %38, %cst_23 {dimension_numbers = #tpu.dot_dimension_numbers<[1], [0], [0], [1], [0, 0, 1, 1], [], []>} : vector<192x384xbf16>, vector<384x128xbf16>, vector<192x128xf32> -> vector<192x128xf32>
    %c1_i32 = arith.constant 1 : i32
    %40 = tpu.dynamic_rotate %39 by %c1_i32 dim 0 : vector<192x128xf32>, i32 -> vector<192x128xf32>
    %c1_24 = arith.constant 1 : index
    %c0_25 = arith.constant 0 : index
    %c0_26 = arith.constant 0 : index
    %41 = vector.load %arg7[%c1_24, %c0_25, %c0_26] : memref<3x384x128xbf16, #tpu.memory_space<vmem>>, vector<1x384x128xbf16>
    %42 = vector.shape_cast %41 : vector<1x384x128xbf16> to vector<384x128xbf16>
    %cst_27 = arith.constant dense<0.000000e+00> : vector<192x128xf32>
    %43 = tpu.matmul %36, %42, %cst_27 {dimension_numbers = #tpu.dot_dimension_numbers<[1], [0], [0], [1], [0, 0, 1, 1], [], []>} : vector<192x384xbf16>, vector<384x128xbf16>, vector<192x128xf32> -> vector<192x128xf32>
    %44 = arith.addf %40, %43 : vector<192x128xf32>
    %c2_28 = arith.constant 2 : index
    %c0_29 = arith.constant 0 : index
    %c0_30 = arith.constant 0 : index
    %45 = vector.load %arg7[%c2_28, %c0_29, %c0_30] : memref<3x384x128xbf16, #tpu.memory_space<vmem>>, vector<1x384x128xbf16>
    %46 = vector.shape_cast %45 : vector<1x384x128xbf16> to vector<384x128xbf16>
    %cst_31 = arith.constant dense<0.000000e+00> : vector<192x128xf32>
    %47 = tpu.matmul %36, %46, %cst_31 {dimension_numbers = #tpu.dot_dimension_numbers<[1], [0], [0], [1], [0, 0, 1, 1], [], []>} : vector<192x384xbf16>, vector<384x128xbf16>, vector<192x128xf32> -> vector<192x128xf32>
    %c191_i32 = arith.constant 191 : i32
    %48 = tpu.dynamic_rotate %47 by %c191_i32 dim 0 : vector<192x128xf32>, i32 -> vector<192x128xf32>
    %49 = arith.addf %44, %48 : vector<192x128xf32>
    %50 = vector.extract_strided_slice %1 {offsets = [48, 0], sizes = [192, 128], strides = [1, 1]} : vector<288x128xbf16> to vector<192x128xbf16>
    %51 = arith.extf %50 : vector<192x128xbf16> to vector<192x128xf32>
    %c191_i32_32 = arith.constant 191 : i32
    %52 = tpu.dynamic_rotate %51 by %c191_i32_32 dim 0 : vector<192x128xf32>, i32 -> vector<192x128xf32>
    %c0_33 = arith.constant 0 : index
    %c0_34 = arith.constant 0 : index
    %53 = vector.load %arg8[%c0_33, %c0_34] : memref<1x128xf32, #tpu.memory_space<vmem>>, vector<1x128xf32>
    %54 = vector.broadcast %53 : vector<1x128xf32> to vector<192x128xf32>
    %55 = arith.mulf %49, %54 : vector<192x128xf32>
    %c0_35 = arith.constant 0 : index
    %c0_36 = arith.constant 0 : index
    %56 = vector.load %arg9[%c0_35, %c0_36] : memref<1x128xf32, #tpu.memory_space<vmem>>, vector<1x128xf32>
    %57 = vector.broadcast %56 : vector<1x128xf32> to vector<192x128xf32>
    %58 = arith.addf %55, %57 : vector<192x128xf32>
    %59 = arith.addf %58, %52 : vector<192x128xf32>
    %cst_37 = arith.constant 0.000000e+00 : f32
    %60 = vector.broadcast %cst_37 : f32 to vector<192x128xf32>
    %61 = arith.maximumf %59, %60 : vector<192x128xf32>
    %62 = arith.truncf %61 : vector<192x128xf32> to vector<192x128xbf16>
    %c0_38 = arith.constant 0 : index
    %c0_39 = arith.constant 0 : index
    %c0_40 = arith.constant 0 : index
    %c0_41 = arith.constant 0 : index
    %63 = vector.load %arg10[%c0_38, %c0_39, %c0_40, %c0_41] : memref<1x1x192x128xbf16, #tpu.memory_space<vmem>>, vector<1x1x192x128xbf16>
    %64 = vector.shape_cast %63 : vector<1x1x192x128xbf16> to vector<192x128xbf16>
    %65 = vector.shape_cast %62 : vector<192x128xbf16> to vector<1x1x192x128xbf16>
    tpu.vector_store %arg10[%c0_38, %c0_39, %c0_40, %c0_41], %65 {strides = array<i32>} : memref<1x1x192x128xbf16, #tpu.memory_space<vmem>>, vector<1x1x192x128xbf16>,
    return
  }
  func.func @transform_0(%arg0: i32, %arg1: i32) -> (i32, i32, i32, i32) {
    %c0_i32 = arith.constant 0 : i32
    %c0_i32_0 = arith.constant 0 : i32
    %c0_i32_1 = arith.constant 0 : i32
    return %arg0, %arg1, %c0_i32, %c0_i32_0 : i32, i32, i32, i32
  }
  func.func @transform_1(%arg0: i32, %arg1: i32) -> (i32, i32, i32) {
    %c0_i32 = arith.constant 0 : i32
    %c0_i32_0 = arith.constant 0 : i32
    %c0_i32_1 = arith.constant 0 : i32
    return %arg1, %c0_i32, %c0_i32_0 : i32, i32, i32
  }
  func.func @transform_2(%arg0: i32, %arg1: i32) -> (i32, i32, i32) {
    %c0_i32 = arith.constant 0 : i32
    %c0_i32_0 = arith.constant 0 : i32
    %c0_i32_1 = arith.constant 0 : i32
    %c0_i32_2 = arith.constant 0 : i32
    return %c0_i32, %c0_i32_0, %c0_i32_1 : i32, i32, i32
  }
  func.func @transform_3(%arg0: i32, %arg1: i32) -> (i32, i32) {
    %c0_i32 = arith.constant 0 : i32
    %c0_i32_0 = arith.constant 0 : i32
    %c0_i32_1 = arith.constant 0 : i32
    return %c0_i32, %c0_i32_0 : i32, i32
  }
  func.func @transform_4(%arg0: i32, %arg1: i32) -> (i32, i32) {
    %c0_i32 = arith.constant 0 : i32
    %c0_i32_0 = arith.constant 0 : i32
    %c0_i32_1 = arith.constant 0 : i32
    return %c0_i32, %c0_i32_0 : i32, i32
  }
  func.func @transform_5(%arg0: i32, %arg1: i32) -> (i32, i32, i32) {
    %c0_i32 = arith.constant 0 : i32
    %c0_i32_0 = arith.constant 0 : i32
    %c0_i32_1 = arith.constant 0 : i32
    %c0_i32_2 = arith.constant 0 : i32
    return %c0_i32, %c0_i32_0, %c0_i32_1 : i32, i32, i32
  }
  func.func @transform_6(%arg0: i32, %arg1: i32) -> (i32, i32) {
    %c0_i32 = arith.constant 0 : i32
    %c0_i32_0 = arith.constant 0 : i32
    %c0_i32_1 = arith.constant 0 : i32
    return %c0_i32, %c0_i32_0 : i32, i32
  }
  func.func @transform_7(%arg0: i32, %arg1: i32) -> (i32, i32) {
    %c0_i32 = arith.constant 0 : i32
    %c0_i32_0 = arith.constant 0 : i32
    %c0_i32_1 = arith.constant 0 : i32
    return %c0_i32, %c0_i32_0 : i32, i32
  }
  func.func @transform_8(%arg0: i32, %arg1: i32) -> (i32, i32, i32, i32) {
    %c0_i32 = arith.constant 0 : i32
    %c0_i32_0 = arith.constant 0 : i32
    %c0_i32_1 = arith.constant 0 : i32
    return %arg0, %arg1, %c0_i32, %c0_i32_0 : i32, i32, i32, i32
  }
}

</mosaic_0001>

<bundles_post_ra>
// kernel: basic_block_pallas.1
= control target key start
LH: loop header
LB: loop body
LE: loop exit
PB: predicated region body
PF: predicated region fallthrough
CT: control target
= control target key end

     0   :  { %s6573_s27 = smov 0   ;;  %s6575_s28 = smov 0   ;;  %s8645_s0 = inlined_call_operand.vmem [shape: bf16[2,2,288,128], index: 0, kind: input, shape index: {}]   ;;  %s8646_s1 = inlined_call_operand.vmem [shape: bf16[2,240,1], index: 1, kind: input, shape index: {}]   ;;  %s8647_s2 = inlined_call_operand.vmem [shape: bf16[3,384,128], index: 2, kind: input, shape index: {}]   ;;  %s8648_s3 = inlined_call_operand.vmem [shape: f32[1,128], index: 3, kind: input, shape index: {}]   ;;  %s8649_s4 = inlined_call_operand.vmem [shape: f32[1,128], index: 4, kind: input, shape index: {}]   ;;  %s8650_s5 = inlined_call_operand.vmem [shape: bf16[3,384,128], index: 5, kind: input, shape index: {}]   ;;  %s8651_s6 = inlined_call_operand.vmem [shape: f32[1,128], index: 6, kind: input, shape index: {}]   ;;  %s8652_s7 = inlined_call_operand.vmem [shape: f32[1,128], index: 7, kind: input, shape index: {}]   ;;  %s8653_s8 = inlined_call_operand.vmem [shape: bf16[2,2,192,128], index: 8, kind: output, shape index: {}]  }
   0x1   :  { %s6577_s29 = smov 0   ;;  %s6579_s30 = smov 0  }
   0x2   :  { %s6581_s9 = smov 0  }
   0x3 LB: > { %s27_s10 = sadd.s32 1, %s6515_s29  ;;  %s30_s11 = sadd.s32 1, %s6519_s30  ;;  %s6523_s9 = sphi %s6581_s9, %s18_s9   ;;  %s6519_s30 = sphi %s6579_s30, %s8706_s30   ;;  %s6515_s29 = sphi %s6577_s29, %s8705_s29   ;;  %s6511_s28 = sphi %s6575_s28, %s8704_s28   ;;  %s6507_s27 = sphi %s6573_s27, %s8703_s27  }
   0x4   : > { %p28_p0 = scmp.ge.s32.totalorder %s27_s10, 2  ;;  %p4507_p1 = scmp.ge.s32.totalorder %s6523_s9, 1 }
   0x5   : > { %p292_p2 = scmp.lt.s32.totalorder %s6523_s9, 5 }
   0x6   : > { %s8708_s10 = smov (%p28_p0, %s27_s10), 0  ;;  %s8710_s11 = smov (!%p28_p0, %s30_s11), %s6519_s30 }
   0x7   : > { %p293_p3 = pnand %p4507_p1, %p292_p2  ;;  %p32_p4 = scmp.ge.s32.totalorder %s8710_s11, 2 }
   0x9   : > { %s8712_s11 = smov (%p32_p4, %s8710_s11), 0  ;;  %296 = sbr.rel (%p293_p3) target bundleno = 1049 (0x419), region = 52 }
  0x10   : > { %v6279_v0 = vld [vmem:[%s8647_s2 + $0x100] sm:$0xff]   ;;  %v6525_v2 = vmov 0.0   ;;  %p339_p5 = scmp.lt.s32.totalorder %s6511_s28, 1  ;;  %p341_p6 = scmp.lt.s32.totalorder %s6507_s27, 1  ;;  %v6282_v4 = vld [vmem:[%s8647_s2 + $0x108] sm:$0xff]   ;;  %v6285_v7 = vld [vmem:[%s8647_s2 + $0x110] sm:$0xff]  }
  0x11   : > { %v6280_v1 = vld [vmem:[%s8647_s2 + $0xc0] sm:$0xff]   ;;  %5790 = vmatprep.subr.bf16.mxu1 %v6525_v2  ;;  %5079 = vmatprep.subr.bf16.mxu0 %v6279_v0  ;;  %v6283_v5 = vld [vmem:[%s8647_s2 + $0xc8] sm:$0xff]   ;;  %v6286_v8 = vld [vmem:[%s8647_s2 + $0xd0] sm:$0xff]   ;;  %vm6526_vm0 = vmmov 0   ;;  %vm2559_vm3 = vcmask 1043456  }
  0x12   : > { %v6281_v3 = vld [vmem:[%s8647_s2 + $0x140] sm:$0xff]   ;;  %5080 = vmatpush3.bf16.msra.mxu0 %v6280_v1  ;;  %v6284_v6 = vld [vmem:[%s8647_s2 + $0x148] sm:$0xff]   ;;  %s8714_s28 = smov (!%p339_p5, %s6511_s28), 1  ;;  %s8716_s27 = smov (!%p341_p6, %s6507_s27), 1  ;;  %v6287_v9 = vld [vmem:[%s8647_s2 + $0x150] sm:$0xff]   ;;  %5806 = vmatprep.mubr.msk.bf16.mxu1 %vm6526_vm0, %v6525_v2 }
  0x13   : > { %5791 = vmatpush3.bf16.msra.mxu1 %v6281_v3  ;;  %5081 = vmatprep.subr.bf16.mxu0 %v6282_v4  ;;  %v6288_v10 = vld [vmem:[%s8647_s2 + $0x118] sm:$0xff]   ;;  %s6155_s19 = smul.u32 72, %s8714_s28  ;;  %v6291_v13 = vld [vmem:[%s8647_s2 + $0x120] sm:$0xff]   ;;  %v6294_v16 = vld [vmem:[%s8647_s2 + $0x128] sm:$0xff]  }
  0x14   : > { %5792 = vmatprep.subr.bf16.mxu1 %v6525_v2  ;;  %v6289_v11 = vld [vmem:[%s8647_s2 + $0xd8] sm:$0xff]   ;;  %s6154_s22 = smul.u32 36, %s8716_s27  ;;  %v6292_v14 = vld [vmem:[%s8647_s2 + $0xe0] sm:$0xff]   ;;  %v6295_v17 = vld [vmem:[%s8647_s2 + $0xe8] sm:$0xff]  }
  0x15   : > { %v6290_v12 = vld [vmem:[%s8647_s2 + $0x158] sm:$0xff]   ;;  %v6293_v15 = vld [vmem:[%s8647_s2 + $0x160] sm:$0xff]   ;;  %v6296_v18 = vld [vmem:[%s8647_s2 + $0x168] sm:$0xff]   ;;  %s6156_s21 = smul.u32 120, %s8716_s27 }
  0x16   : > { %5082 = vmatpush3.bf16.msra.mxu0 %v6283_v5  ;;  %s345_s14 = sadd.s32 %s6155_s19, %s6154_s22  ;;  %v6297_v19 = vld [vmem:[%s8647_s2 + $0x130] sm:$0xff]   ;;  %v6300_v22 = vld [vmem:[%s8647_s2 + $0x138] sm:$0xff]   ;;  %v6305_v28 = vld [vmem:[%s8647_s2 + $0x40] sm:$0xff]   ;;  %s6157_s26 = smul.u32 24, %s8716_s27 }
  0x17   : > { %5793 = vmatpush3.bf16.msra.mxu1 %v6284_v6  ;;  %5083 = vmatprep.subr.bf16.mxu0 %v6285_v7  ;;  %s4508_s20 = sshll.u32 %s345_s14, 2  ;;  %v6298_v20 = vld [vmem:[%s8647_s2 + $0xf0] sm:$0xff]   ;;  %v6301_v25 = vld [vmem:[%s8647_s2 + $0xf8] sm:$0xff]   ;;  %v6307_v34 = vld [vmem:[%s8647_s2] sm:$0xff]   ;;  %s7099_s22 = scalar_lea.vmem %s8646_s1, %s6156_s21 }
  0x18   : > { %5794 = vmatprep.subr.bf16.mxu1 %v6525_v2  ;;  %s6688_s13 = scalar_lea.vmem %s8645_s0, %s4508_s20  ;;  %v6299_v21 = vld [vmem:[%s8647_s2 + $0x170] sm:$0xff]   ;;  %v6302_v27 = vld [vmem:[%s8647_s2 + $0x178] sm:$0xff]   ;;  %v6308_v35 = vld [vmem:[%s8647_s2 + $0x80] sm:$0xff]   ;;  %s6158_s12 = smul.u32 48, %s8714_s28 }
  0x19   : > { %v366_v23 = vld [vmem:[%s6688_s13 + $0xc] sm:$0xf]  ;;  %v367_v24 = vld [vmem:[%s6688_s13 + $0x10] sm:$0xf]  ;;  %v369_v29 = vld [vmem:[%s6688_s13 + $0x18] sm:$0xf] }
  0x1a   : > { %5084 = vmatpush3.bf16.msra.mxu0 %v6286_v8  ;;  %v6702_v26 = vcombine.low %v366_v23, %v367_v24  ;;  %v370_v30 = vld [vmem:[%s6688_s13 + $0x1c] sm:$0xf]  ;;  %v368_v31 = vld [vmem:[%s6688_s13 + $0x14] sm:$0xf]  ;;  %v6716_v32 = vld [vmem:[%s6688_s13] sm:$0xff]   ;;  %s359_s28 = sadd.s32 %s6158_s12, %s6157_s26 }
  0x1b   : > { %5795 = vmatpush3.bf16.msra.mxu1 %v6287_v9  ;;  %5085 = vmatprep.subr.bf16.mxu0 %v6288_v10  ;;  %v6718_v33 = vcombine.low %v369_v29, %v370_v30  ;;  %v6726_v36 = vcombine.low %v368_v31, %v369_v29  ;;  %v365_v37 = vld [vmem:[%s6688_s13 + $0x8] sm:$0xf]  ;;  %v371_v39 = vld [vmem:[%s6688_s13 + $0x20] sm:$0xf]  ;;  %v372_v40 = vld [vmem:[%s6688_s13 + $0x24] sm:$0xf]  ;;  %v6782_v55 = vcombine.low %v367_v24, %v368_v31 }
  0x1c   : > { %5796 = vmatprep.subr.bf16.mxu1 %v6525_v2  ;;  %840 = vmatprep.mubr.bf16.mxu0 %v6702_v26  ;;  %v6313_v38 = vld [vmem:[%s8647_s2 + $0x48] sm:$0xff]   ;;  %v6320_v43 = vld [vmem:[%s8647_s2 + $0x50] sm:$0xff]   ;;  %v6749_v44 = vcombine.low %v365_v37, %v366_v23  ;;  %v6752_v45 = vcombine.low %v371_v39, %v372_v40  ;;  %v6754_v46 = vcombine.low %v370_v30, %v371_v39  ;;  %v6327_v49 = vld [vmem:[%s8647_s2 + $0x58] sm:$0xff]   ;;  %s4510_s27 = sshll.u32 %s359_s28, 2 }
  0x1d   : > { %v6315_v41 = vld [vmem:[%s8647_s2 + $0x8] sm:$0xff]   ;;  %v6322_v47 = vld [vmem:[%s8647_s2 + $0x10] sm:$0xff]   ;;  %v6328_v52 = vld [vmem:[%s8647_s2 + $0x18] sm:$0xff]   ;;  %s8456_s18 = scalar_lea.vmem %s8653_s8, %s4510_s27 }
  0x1e   : > { %5086 = vmatpush3.bf16.msra.mxu0 %v6289_v11  ;;  %v6317_v42 = vld [vmem:[%s8647_s2 + $0x88] sm:$0xff]   ;;  %v6324_v48 = vld [vmem:[%s8647_s2 + $0x90] sm:$0xff]   ;;  %v6331_v53 = vld [vmem:[%s8647_s2 + $0x98] sm:$0xff]  }
  0x1f   : > { %5797 = vmatpush3.bf16.msra.mxu1 %v6290_v12  ;;  %5087 = vmatprep.subr.bf16.mxu0 %v6291_v13  ;;  %v373_v50 = vld [vmem:[%s6688_s13 + $0x28] sm:$0xf]  ;;  %v374_v51 = vld [vmem:[%s6688_s13 + $0x2c] sm:$0xf]  ;;  %v6334_v54 = vld [vmem:[%s8647_s2 + $0x60] sm:$0xff]  }
  0x20   : > { %5798 = vmatprep.subr.bf16.mxu1 %v6525_v2  ;;  %v6785_v56 = vcombine.low %v373_v50, %v374_v51  ;;  %v6787_v57 = vcombine.low %v372_v40, %v373_v50  ;;  %v6335_v58 = vld [vmem:[%s8647_s2 + $0x20] sm:$0xff]   ;;  %v6341_v60 = vld [vmem:[%s8647_s2 + $0x68] sm:$0xff]   ;;  %v375_v61 = vld [vmem:[%s6688_s13 + $0x30] sm:$0xf] }
  0x21   : > { %v6337_v59 = vld [vmem:[%s8647_s2 + $0xa0] sm:$0xff]   ;;  %v376_v62 = vld [vmem:[%s6688_s13 + $0x34] sm:$0xf]  ;;  %v6342_v63 = vld [vmem:[%s8647_s2 + $0x28] sm:$0xff]   ;;  %v6818_v4 = vcombine.low %v374_v51, %v375_v61 }
  0x22   : > { %5088 = vmatpush3.bf16.msra.mxu0 %v6292_v14  ;;  %v6344_v0 = vld [vmem:[%s8647_s2 + $0xa8] sm:$0xff]   ;;  %v6348_v1 = vld [vmem:[%s8647_s2 + $0x70] sm:$0xff]   ;;  %v6816_v3 = vcombine.low %v375_v61, %v376_v62  ;;  %v6355_v7 = vld [vmem:[%s8647_s2 + $0x78] sm:$0xff]  }
  0x23   : > { %5799 = vmatpush3.bf16.msra.mxu1 %v6293_v15  ;;  %5089 = vmatprep.subr.bf16.mxu0 %v6294_v16  ;;  %v6349_v5 = vld [vmem:[%s8647_s2 + $0x30] sm:$0xff]   ;;  %v377_v8 = vld [vmem:[%s6688_s13 + $0x38] sm:$0xf]  ;;  %v378_v9 = vld [vmem:[%s6688_s13 + $0x3c] sm:$0xf] }
  0x24   : > { %5800 = vmatprep.subr.bf16.mxu1 %v6525_v2  ;;  %v6350_v6 = vld [vmem:[%s8647_s2 + $0xb0] sm:$0xff]   ;;  %v6356_v10 = vld [vmem:[%s8647_s2 + $0x38] sm:$0xff]   ;;  %v6360_v12 = vld [vmem:[%s8647_s2 + $0x1c0] sm:$0xff]   ;;  %v6847_v13 = vcombine.low %v377_v8, %v378_v9  ;;  %v6849_v14 = vcombine.low %v376_v62, %v377_v8 }
  0x25   : > { %v6357_v11 = vld [vmem:[%s8647_s2 + $0xb8] sm:$0xff]   ;;  %v379_v15 = vld [vmem:[%s6688_s13 + $0x40] sm:$0xf]  ;;  %v380_v16 = vld [vmem:[%s6688_s13 + $0x44] sm:$0xf] }
  0x26   : > { %5090 = vmatpush3.bf16.msra.mxu0 %v6295_v17  ;;  %v6859_v17 = vcombine.low %v379_v15, %v380_v16  ;;  %v383_v23 = vld [vmem:[%s6688_s13 + $0x50] sm:$0xf]  ;;  %v384_v24 = vld [vmem:[%s6688_s13 + $0x54] sm:$0xf]  ;;  %v386_v29 = vld [vmem:[%s6688_s13 + $0x5c] sm:$0xf] }
  0x27   : > { %5801 = vmatpush3.bf16.msra.mxu1 %v6296_v18  ;;  %5091 = vmatprep.subr.bf16.mxu0 %v6297_v19  ;;  %v6861_v18 = vcombine.low %v378_v9, %v379_v15  ;;  %v381_v19 = vld [vmem:[%s6688_s13 + $0x48] sm:$0xf]  ;;  %v390_v40 = vld [vmem:[%s6688_s13 + $0x6c] sm:$0xf]  ;;  %v393_v50 = vld [vmem:[%s6688_s13 + $0x78] sm:$0xf] }
  0x28   : > { %5802 = vmatprep.subr.bf16.mxu1 %v6525_v2  ;;  %v389_v39 = vld [vmem:[%s6688_s13 + $0x68] sm:$0xf]  ;;  %v394_v51 = vld [vmem:[%s6688_s13 + $0x7c] sm:$0xf]  ;;  %v6361_v62 = vld [vmem:[%s8647_s2 + $0x180] sm:$0xff]  }
  0x29   : > { %v6957_v61 = vld [vmem:[%s6688_s13 + $0x88] sm:$0xff]   ;;  %v6369_v8 = vld [vmem:[%s8647_s2 + $0x1d8] sm:$0xff]   ;;  %v6374_v15 = vld [vmem:[%s8647_s2 + $0x220] sm:$0xff]  }
  0x2a   : > { %5092 = vmatpush3.bf16.msra.mxu0 %v6298_v20  ;;  %v382_v20 = vld [vmem:[%s6688_s13 + $0x4c] sm:$0xf]  ;;  %v6370_v9 = vld [vmem:[%s8647_s2 + $0x198] sm:$0xff]  }
  0x2b   : > { %5803 = vmatpush3.bf16.msra.mxu1 %v6299_v21  ;;  %5093 = vmatprep.subr.bf16.mxu0 %v6300_v22  ;;  %v6870_v21 = vcombine.low %v381_v19, %v382_v20  ;;  %v6872_v22 = vcombine.low %v380_v16, %v381_v19  ;;  %v6375_v16 = vld [vmem:[%s8647_s2 + $0x1e8] sm:$0xff]  }
  0x2c   : > { %5804 = vmatprep.subr.bf16.mxu1 %v6525_v2  ;;  %v6376_v19 = vld [vmem:[%s8647_s2 + $0x1a8] sm:$0xff]  }
  0x2e   : > { %5094 = vmatpush3.bf16.msra.mxu0 %v6301_v25  ;;  %v6881_v25 = vcombine.low %v383_v23, %v384_v24 }
  0x2f   : > { %5805 = vmatpush3.bf16.msra.mxu1 %v6302_v27  ;;  %5208 = vmatprep.subr.bf16.mxu0 %v6305_v28  ;;  %v6883_v27 = vcombine.low %v382_v20, %v383_v23  ;;  %v385_v28 = vld [vmem:[%s6688_s13 + $0x58] sm:$0xf]  ;;  %v6377_v20 = vld [vmem:[%s8647_s2 + $0x228] sm:$0xff]   ;;  %v6378_v23 = vld [vmem:[%s8647_s2 + $0x1f0] sm:$0xff]  }
  0x30   : > { %5866 = vmatprep.subr.bf16.mxu1 %v6525_v2  ;;  %v6892_v30 = vcombine.low %v385_v28, %v386_v29  ;;  %v6894_v31 = vcombine.low %v384_v24, %v385_v28  ;;  %v6379_v24 = vld [vmem:[%s8647_s2 + $0x1b0] sm:$0xff]  }
  0x31   : > { %841 = vmatmul.mubr.bf16.vlgmr.msra.gmra.mrb[0].mxu0 %v6716_v32  ;;  %v6380_v28 = vld [vmem:[%s8647_s2 + $0x230] sm:$0xff]  }
  0x32   : > { %5807 = vmatmul.mubr.bf16.vlgmr.msra.gmra.mrb[0].mxu1 %v6718_v33  ;;  %5209 = vmatpush3.bf16.msra.mxu0 %v6307_v34  ;;  %v387_v34 = vld [vmem:[%s6688_s13 + $0x60] sm:$0xf] }
  0x33   : > { %5867 = vmatpush3.bf16.msra.mxu1 %v6308_v35  ;;  %848 = vmatprep.mubr.bf16.mxu0 %v6726_v36  ;;  %v388_v35 = vld [vmem:[%s6688_s13 + $0x64] sm:$0xf] }
  0x34   : > { %5810 = vmatprep.mubr.msk.bf16.mxu1 %vm6526_vm0, %v6525_v2  ;;  %5210 = vmatprep.subr.bf16.mxu0 %v6313_v38  ;;  %v6903_v37 = vcombine.low %v387_v34, %v388_v35  ;;  %v6905_v38 = vcombine.low %v386_v29, %v387_v34  ;;  %v6381_v29 = vld [vmem:[%s8647_s2 + $0x1f8] sm:$0xff]  }
  0x35   : > { %5868 = vmatprep.subr.bf16.mxu1 %v6525_v2  ;;  %v6382_v34 = vld [vmem:[%s8647_s2 + $0x1b8] sm:$0xff]  }
  0x36   : > { %5211 = vmatpush3.bf16.msra.mxu0 %v6315_v41  ;;  %v6914_v41 = vcombine.low %v389_v39, %v390_v40 }
  0x37   : > { %5869 = vmatpush3.bf16.msra.mxu1 %v6317_v42  ;;  %5212 = vmatprep.subr.bf16.mxu0 %v6320_v43  ;;  %v6916_v42 = vcombine.low %v388_v35, %v389_v39  ;;  %v391_v43 = vld [vmem:[%s6688_s13 + $0x70] sm:$0xf]  ;;  %v6383_v35 = vld [vmem:[%s8647_s2 + $0x238] sm:$0xff]   ;;  %v4935_v39 = vld [vmem:[%s7099_s22] sm:$0xff]  }
  0x38   : > { %5870 = vmatprep.subr.bf16.mxu1 %v6525_v2 }
  0x39   : > { %849 = vmatmul.mubr.bf16.gmra.mrb[4].mxu0 %v6749_v44 }
  0x3a   : > { %5811 = vmatmul.mubr.bf16.gmra.mrb[4].mxu1 %v6752_v45  ;;  %856 = vmatprep.mubr.bf16.mxu0 %v6754_v46 }
  0x3b   : > { %5814 = vmatprep.mubr.msk.bf16.mxu1 %vm6526_vm0, %v6525_v2  ;;  %5213 = vmatpush3.bf16.msra.mxu0 %v6322_v47  ;;  %v392_v47 = vld [vmem:[%s6688_s13 + $0x74] sm:$0xf] }
  0x3c   : > { %5871 = vmatpush3.bf16.msra.mxu1 %v6324_v48  ;;  %5214 = vmatprep.subr.bf16.mxu0 %v6327_v49  ;;  %v6925_v48 = vcombine.low %v391_v43, %v392_v47  ;;  %v6927_v49 = vcombine.low %v390_v40, %v391_v43  ;;  %v4936_v40 = vunpack.c.l.bf16 %v4935_v39  ;;  %v4937_v43 = vunpack.c.h.bf16 %v4935_v39 }
  0x3d   : > { %5872 = vmatprep.subr.bf16.mxu1 %v6525_v2 }
  0x3f   : > { %5215 = vmatpush3.bf16.msra.mxu0 %v6328_v52  ;;  %v6936_v52 = vcombine.low %v393_v50, %v394_v51 }
  0x40   : > { %5873 = vmatpush3.bf16.msra.mxu1 %v6331_v53  ;;  %5216 = vmatprep.subr.bf16.mxu0 %v6334_v54  ;;  %v6938_v53 = vcombine.low %v392_v47, %v393_v50  ;;  %v395_v54 = vld [vmem:[%s6688_s13 + $0x80] sm:$0xf]  ;;  %v6214_v50 = vpack.i.bf16 %v4937_v43, %v4936_v40 }
  0x41   : > { %857 = vmatmul.mubr.bf16.gmra.mrb[8].mxu0 %v6782_v55  ;;  %5874 = vmatprep.subr.bf16.mxu1 %v6525_v2 }
  0x42   : > { %5815 = vmatmul.mubr.bf16.gmra.mrb[8].mxu1 %v6785_v56  ;;  %864 = vmatprep.mubr.bf16.mxu0 %v6787_v57 }
  0x43   : > { %5818 = vmatprep.mubr.msk.bf16.mxu1 %vm6526_vm0, %v6525_v2  ;;  %5217 = vmatpush3.bf16.msra.mxu0 %v6335_v58  ;;  %v396_v58 = vld [vmem:[%s6688_s13 + $0x84] sm:$0xf] }
  0x44   : > { %5875 = vmatpush3.bf16.msra.mxu1 %v6337_v59  ;;  %5218 = vmatprep.subr.bf16.mxu0 %v6341_v60  ;;  %v6947_v59 = vcombine.low %v395_v54, %v396_v58  ;;  %v6949_v60 = vcombine.low %v394_v51, %v395_v54  ;;  %v6527_v58 = vmov 0  }
  0x45   : > { %5876 = vmatprep.subr.bf16.mxu1 %v6525_v2  ;;  %6213 = vset.pattern.permute.xlu1 %v6527_v58 }
  0x46   : > { %6202 = vset.pattern.permute.xlu0 %v6527_v58  ;;  %6215 = vperm.xlu1 %6213, %v6214_v50   ;;  %v5055_v50 = vld [vmem:[%s7099_s22 + $0x10] sm:$0xff]  }
  0x47   : > { %5219 = vmatpush3.bf16.msra.mxu0 %v6342_v63  ;;  %v6362_v63 = vld [vmem:[%s8647_s2 + $0x200] sm:$0xff]   ;;  %v4944_v58 = vunpack.c.l.bf16 %v5055_v50 }
  0x48   : > { %5877 = vmatpush3.bf16.msra.mxu1 %v6344_v0  ;;  %5220 = vmatprep.subr.bf16.mxu0 %v6348_v1  ;;  %v6363_v0 = vld [vmem:[%s8647_s2 + $0x1c8] sm:$0xff]  }
  0x49   : > { %865 = vmatmul.mubr.bf16.gmra.mrb[12].mxu0 %v6718_v33  ;;  %5878 = vmatprep.subr.bf16.mxu1 %v6525_v2  ;;  %v6364_v1 = vld [vmem:[%s8647_s2 + $0x188] sm:$0xff]  }
  0x4a   : > { %5819 = vmatmul.mubr.bf16.gmra.mrb[12].mxu1 %v6816_v3  ;;  %872 = vmatprep.mubr.bf16.mxu0 %v6818_v4 }
  0x4b   : > { %5822 = vmatprep.mubr.msk.bf16.mxu1 %vm6526_vm0, %v6525_v2  ;;  %5221 = vmatpush3.bf16.msra.mxu0 %v6349_v5  ;;  %v6365_v5 = vld [vmem:[%s8647_s2 + $0x208] sm:$0xff]  }
  0x4c   : > { %5879 = vmatpush3.bf16.msra.mxu1 %v6350_v6  ;;  %5222 = vmatprep.subr.bf16.mxu0 %v6355_v7  ;;  %v6366_v6 = vld [vmem:[%s8647_s2 + $0x1d0] sm:$0xff]  }
  0x4d   : > { %5880 = vmatprep.subr.bf16.mxu1 %v6525_v2  ;;  %v6368_v7 = vld [vmem:[%s8647_s2 + $0x210] sm:$0xff]  }
  0x4f   : > { %5223 = vmatpush3.bf16.msra.mxu0 %v6356_v10  ;;  %v6371_v10 = vld [vmem:[%s8647_s2 + $0x218] sm:$0xff]  }
  0x50   : > { %5881 = vmatpush3.bf16.msra.mxu1 %v6357_v11  ;;  %5337 = vmatprep.subr.bf16.mxu0 %v6360_v12  ;;  %v6372_v11 = vld [vmem:[%s8647_s2 + $0x1e0] sm:$0xff]  }
  0x51   : > { %873 = vmatmul.mubr.bf16.gmra.mrb[16].mxu0 %v6752_v45  ;;  %5942 = vmatprep.subr.bf16.mxu1 %v6525_v2  ;;  %v6373_v12 = vld [vmem:[%s8647_s2 + $0x1a0] sm:$0xff]  }
  0x52   : > { %5823 = vmatmul.mubr.bf16.gmra.mrb[16].mxu1 %v6847_v13  ;;  %880 = vmatprep.mubr.bf16.mxu0 %v6849_v14 }
  0x53   : > { %5826 = vmatprep.mubr.msk.bf16.mxu1 %vm6526_vm0, %v6525_v2 }
  0x59   : > { %881 = vmatmul.mubr.bf16.gmra.mrb[20].mxu0 %v6785_v56 }
  0x5a   : > { %5827 = vmatmul.mubr.bf16.gmra.mrb[20].mxu1 %v6859_v17  ;;  %888 = vmatprep.mubr.bf16.mxu0 %v6861_v18 }
  0x5b   : > { %5830 = vmatprep.mubr.msk.bf16.mxu1 %vm6526_vm0, %v6525_v2 }
  0x61   : > { %889 = vmatmul.mubr.bf16.gmra.mrb[24].mxu0 %v6816_v3 }
  0x62   : > { %5831 = vmatmul.mubr.bf16.gmra.mrb[24].mxu1 %v6870_v21  ;;  %896 = vmatprep.mubr.bf16.mxu0 %v6872_v22 }
  0x63   : > { %5834 = vmatprep.mubr.msk.bf16.mxu1 %vm6526_vm0, %v6525_v2 }
  0x69   : > { %897 = vmatmul.mubr.bf16.gmra.mrb[28].mxu0 %v6847_v13 }
  0x6a   : > { %5835 = vmatmul.mubr.bf16.gmra.mrb[28].mxu1 %v6881_v25  ;;  %904 = vmatprep.mubr.bf16.mxu0 %v6883_v27 }
  0x6b   : > { %5838 = vmatprep.mubr.msk.bf16.mxu1 %vm6526_vm0, %v6525_v2 }
  0x71   : > { %905 = vmatmul.mubr.bf16.gmra.mrb[32].mxu0 %v6859_v17 }
  0x72   : > { %5839 = vmatmul.mubr.bf16.gmra.mrb[32].mxu1 %v6892_v30  ;;  %912 = vmatprep.mubr.bf16.mxu0 %v6894_v31 }
  0x73   : > { %5842 = vmatprep.mubr.msk.bf16.mxu1 %vm6526_vm0, %v6525_v2 }
  0x79   : > { %913 = vmatmul.mubr.bf16.gmra.mrb[36].mxu0 %v6870_v21 }
  0x7a   : > { %5843 = vmatmul.mubr.bf16.gmra.mrb[36].mxu1 %v6903_v37  ;;  %920 = vmatprep.mubr.bf16.mxu0 %v6905_v38 }
  0x7b   : > { %5846 = vmatprep.mubr.msk.bf16.mxu1 %vm6526_vm0, %v6525_v2 }
  0x81   : > { %921 = vmatmul.mubr.bf16.gmra.mrb[40].mxu0 %v6881_v25 }
  0x82   : > { %5847 = vmatmul.mubr.bf16.gmra.mrb[40].mxu1 %v6914_v41  ;;  %928 = vmatprep.mubr.bf16.mxu0 %v6916_v42 }
  0x83   : > { %5850 = vmatprep.mubr.msk.bf16.mxu1 %vm6526_vm0, %v6525_v2 }
  0x89   : > { %929 = vmatmul.mubr.bf16.gmra.mrb[44].mxu0 %v6892_v30 }
  0x8a   : > { %5851 = vmatmul.mubr.bf16.gmra.mrb[44].mxu1 %v6925_v48  ;;  %936 = vmatprep.mubr.bf16.mxu0 %v6927_v49 }
  0x8b   : > { %5854 = vmatprep.mubr.msk.bf16.mxu1 %vm6526_vm0, %v6525_v2 }
  0x91   : > { %937 = vmatmul.mubr.bf16.gmra.mrb[48].mxu0 %v6903_v37 }
  0x92   : > { %5855 = vmatmul.mubr.bf16.gmra.mrb[48].mxu1 %v6936_v52  ;;  %944 = vmatprep.mubr.bf16.mxu0 %v6938_v53 }
  0x93   : > { %5858 = vmatprep.mubr.msk.bf16.mxu1 %vm6526_vm0, %v6525_v2 }
  0x99   : > { %945 = vmatmul.mubr.bf16.gmra.mrb[52].mxu0 %v6914_v41 }
  0x9a   : > { %5859 = vmatmul.mubr.bf16.gmra.mrb[52].mxu1 %v6947_v59  ;;  %952 = vmatprep.mubr.bf16.mxu0 %v6949_v60 }
  0x9b   : > { %5862 = vmatprep.mubr.msk.bf16.mxu1 %vm6526_vm0, %v6525_v2 }
  0xa1   : > { %953 = vmatmul.mubr.bf16.gmra.mrb[56].mxu0 %v6925_v48 }
  0xa2   : > { %5863 = vmatmul.mubr.bf16.gmra.mrb[56].mxu1 %v6957_v61  ;;  %1353 = vmatprep.mubr.bf16.mxu0 %v6702_v26 }
  0xa3   : > { %5882 = vmatprep.mubr.msk.bf16.mxu1 %vm6526_vm0, %v6525_v2 }
  0xa9   : > { %1354 = vmatmul.mubr.bf16.vlgmr.msra.gmra.mrb[60].mxu0 %v6716_v32  ;;  %v6367_v32 = vld [vmem:[%s8647_s2 + $0x190] sm:$0xff]  }
  0xaa   : > { %5883 = vmatmul.mubr.bf16.vlgmr.msra.gmra.mrb[60].mxu1 %v6718_v33  ;;  %5338 = vmatpush3.bf16.msra.mxu0 %v6361_v62 }
  0xab   : > { %5943 = vmatpush3.bf16.msra.mxu1 %v6362_v63  ;;  %1361 = vmatprep.mubr.bf16.mxu0 %v6726_v36 }
  0xac   : > { %5886 = vmatprep.mubr.msk.bf16.mxu1 %vm6526_vm0, %v6525_v2  ;;  %5339 = vmatprep.subr.bf16.mxu0 %v6363_v0 }
  0xad   : > { %5944 = vmatprep.subr.bf16.mxu1 %v6525_v2 }
  0xae   : > { %5340 = vmatpush3.bf16.msra.mxu0 %v6364_v1 }
  0xaf   : > { %5945 = vmatpush3.bf16.msra.mxu1 %v6365_v5  ;;  %5341 = vmatprep.subr.bf16.mxu0 %v6366_v6 }
  0xb0   : > { %5946 = vmatprep.subr.bf16.mxu1 %v6525_v2 }
  0xb1   : > { %1362 = vmatmul.mubr.bf16.gmra.mrb[64].mxu0 %v6749_v44 }
  0xb2   : > { %5887 = vmatmul.mubr.bf16.gmra.mrb[64].mxu1 %v6752_v45  ;;  %1369 = vmatprep.mubr.bf16.mxu0 %v6754_v46 }
  0xb3   : > { %5890 = vmatprep.mubr.msk.bf16.mxu1 %vm6526_vm0, %v6525_v2  ;;  %5342 = vmatpush3.bf16.msra.mxu0 %v6367_v32 }
  0xb4   : > { %5947 = vmatpush3.bf16.msra.mxu1 %v6368_v7  ;;  %5343 = vmatprep.subr.bf16.mxu0 %v6369_v8  ;;  %v5054_v8 = vld [vmem:[%s7099_s22 + $0x8] sm:$0xff]  }
  0xb5   : > { %5948 = vmatprep.subr.bf16.mxu1 %v6525_v2 }
  0xb7   : > { %5344 = vmatpush3.bf16.msra.mxu0 %v6370_v9 }
  0xb8   : > { %5949 = vmatpush3.bf16.msra.mxu1 %v6371_v10  ;;  %5345 = vmatprep.subr.bf16.mxu0 %v6372_v11  ;;  %v4940_v10 = vunpack.c.l.bf16 %v5054_v8  ;;  %v4941_v11 = vunpack.c.h.bf16 %v5054_v8 }
  0xb9   : > { %1370 = vmatmul.mubr.bf16.gmra.mrb[68].mxu0 %v6782_v55  ;;  %5950 = vmatprep.subr.bf16.mxu1 %v6525_v2 }
  0xba   : > { %5891 = vmatmul.mubr.bf16.gmra.mrb[68].mxu1 %v6785_v56  ;;  %1377 = vmatprep.mubr.bf16.mxu0 %v6787_v57 }
  0xbb   : > { %5894 = vmatprep.mubr.msk.bf16.mxu1 %vm6526_vm0, %v6525_v2  ;;  %5346 = vmatpush3.bf16.msra.mxu0 %v6373_v12  ;;  %v1144_v12 = vlaneseq }
  0xbc   : > { %5951 = vmatpush3.bf16.msra.mxu1 %v6374_v15  ;;  %5347 = vmatprep.subr.bf16.mxu0 %v6375_v16  ;;  %v6203_v16 = vpack.i.bf16 %v4941_v11, %v4940_v10 }
  0xbd   : > { %5952 = vmatprep.subr.bf16.mxu1 %v6525_v2 }
  0xbe   : > { %6204 = vperm.xlu0 %6202, %v6203_v16  }
  0xbf   : > { %5348 = vmatpush3.bf16.msra.mxu0 %v6376_v19 }
  0xc0   : > { %5953 = vmatpush3.bf16.msra.mxu1 %v6377_v20  ;;  %5349 = vmatprep.subr.bf16.mxu0 %v6378_v23 }
  0xc1   : > { %1378 = vmatmul.mubr.bf16.gmra.mrb[72].mxu0 %v6718_v33  ;;  %5954 = vmatprep.subr.bf16.mxu1 %v6525_v2 }
  0xc2   : > { %5895 = vmatmul.mubr.bf16.gmra.mrb[72].mxu1 %v6816_v3  ;;  %1385 = vmatprep.mubr.bf16.mxu0 %v6818_v4 }
  0xc3   : > { %5898 = vmatprep.mubr.msk.bf16.mxu1 %vm6526_vm0, %v6525_v2  ;;  %5350 = vmatpush3.bf16.msra.mxu0 %v6379_v24 }
  0xc4   : > { %5955 = vmatpush3.bf16.msra.mxu1 %v6380_v28  ;;  %5351 = vmatprep.subr.bf16.mxu0 %v6381_v29 }
  0xc5   : > { %5956 = vmatprep.subr.bf16.mxu1 %v6525_v2 }
  0xc7   : > { %5352 = vmatpush3.bf16.msra.mxu0 %v6382_v34 }
  0xc8   : > { %5957 = vmatpush3.bf16.msra.mxu1 %v6383_v35  ;;  %v7117_v35 = vshrl.u32 %v1144_v12, 7 }
  0xc9   : > { %1386 = vmatmul.mubr.bf16.gmra.mrb[76].mxu0 %v6752_v45 }
  0xca   : > { %5899 = vmatmul.mubr.bf16.gmra.mrb[76].mxu1 %v6847_v13  ;;  %1393 = vmatprep.mubr.bf16.mxu0 %v6849_v14  ;;  %vm1146_vm1 = vcmp.lt.s32.totalorder %v7117_v35, 7  ;;  %vm2156_vm2 = vcmp.lt.s32.totalorder %v7117_v35, 6  ;;  %vm3071_vm4 = vcmp.lt.s32.totalorder %v7117_v35, 1 }
  0xcb   : > { %5902 = vmatprep.mubr.msk.bf16.mxu1 %vm6526_vm0, %v6525_v2 }
  0xd1   : > { %1394 = vmatmul.mubr.bf16.gmra.mrb[80].mxu0 %v6785_v56 }
  0xd2   : > { %5903 = vmatmul.mubr.bf16.gmra.mrb[80].mxu1 %v6859_v17  ;;  %1401 = vmatprep.mubr.bf16.mxu0 %v6861_v18 }
  0xd3   : > { %5906 = vmatprep.mubr.msk.bf16.mxu1 %vm6526_vm0, %v6525_v2 }
  0xd9   : > { %1402 = vmatmul.mubr.bf16.gmra.mrb[84].mxu0 %v6816_v3 }
  0xda   : > { %5907 = vmatmul.mubr.bf16.gmra.mrb[84].mxu1 %v6870_v21  ;;  %1409 = vmatprep.mubr.bf16.mxu0 %v6872_v22 }
  0xdb   : > { %5910 = vmatprep.mubr.msk.bf16.mxu1 %vm6526_vm0, %v6525_v2 }
  0xe1   : > { %1410 = vmatmul.mubr.bf16.gmra.mrb[88].mxu0 %v6847_v13 }
  0xe2   : > { %5911 = vmatmul.mubr.bf16.gmra.mrb[88].mxu1 %v6881_v25  ;;  %1417 = vmatprep.mubr.bf16.mxu0 %v6883_v27 }
  0xe3   : > { %5914 = vmatprep.mubr.msk.bf16.mxu1 %vm6526_vm0, %v6525_v2 }
  0xe9   : > { %1418 = vmatmul.mubr.bf16.gmra.mrb[92].mxu0 %v6859_v17 }
  0xea   : > { %5915 = vmatmul.mubr.bf16.gmra.mrb[92].mxu1 %v6892_v30  ;;  %1425 = vmatprep.mubr.bf16.mxu0 %v6894_v31 }
  0xeb   : > { %5918 = vmatprep.mubr.msk.bf16.mxu1 %vm6526_vm0, %v6525_v2 }
  0xf1   : > { %1426 = vmatmul.mubr.bf16.gmra.mrb[96].mxu0 %v6870_v21 }
  0xf2   : > { %5919 = vmatmul.mubr.bf16.gmra.mrb[96].mxu1 %v6903_v37  ;;  %1433 = vmatprep.mubr.bf16.mxu0 %v6905_v38 }
  0xf3   : > { %5922 = vmatprep.mubr.msk.bf16.mxu1 %vm6526_vm0, %v6525_v2 }
  0xf9   : > { %1434 = vmatmul.mubr.bf16.gmra.mrb[100].mxu0 %v6881_v25 }
  0xfa   : > { %5923 = vmatmul.mubr.bf16.gmra.mrb[100].mxu1 %v6914_v41  ;;  %1441 = vmatprep.mubr.bf16.mxu0 %v6916_v42 }
  0xfb   : > { %5926 = vmatprep.mubr.msk.bf16.mxu1 %vm6526_vm0, %v6525_v2 }
 0x101   : > { %1442 = vmatmul.mubr.bf16.gmra.mrb[104].mxu0 %v6892_v30 }
 0x102   : > { %5927 = vmatmul.mubr.bf16.gmra.mrb[104].mxu1 %v6925_v48  ;;  %1449 = vmatprep.mubr.bf16.mxu0 %v6927_v49 }
 0x103   : > { %5930 = vmatprep.mubr.msk.bf16.mxu1 %vm6526_vm0, %v6525_v2 }
 0x104   : > { %v5095_v47 = vpop.f32.mrb[0].mxu0 }
 0x105   : > { %v5096_v51 = vpop.f32.mrb[1].mxu0  ;;  %v995_v54 = vpop.f32.mrb[0].mxu1 }
 0x106   : > { %v5097_v62 = vadd.f32 %v5096_v51, %v5095_v47  ;;  %v5098_v63 = vpop.f32.mrb[2].mxu0  ;;  %v5808_v0 = vpop.f32.mrb[1].mxu1 }
 0x107   : > { %v5099_v1 = vpop.f32.mrb[3].mxu0  ;;  %v998_v5 = vpop.f32.mrb[2].mxu1 }
 0x108   : > { %v7107_v6 = vadd.f32 %v5097_v62, %v995_v54  ;;  %v5100_v32 = vadd.f32 %v5099_v1, %v5098_v63  ;;  %v5809_v7 = vpop.f32.mrb[3].mxu1  ;;  %v4945_v62 = vunpack.c.h.bf16 %v5055_v50 }
 0x109   : > { %1450 = vmatmul.mubr.bf16.gmra.mrb[108].mxu0 %v6903_v37 }
 0x10a   : > { %v7111_v9 = vadd.f32 %v5100_v32, %v998_v5  ;;  %5931 = vmatmul.mubr.bf16.gmra.mrb[108].mxu1 %v6936_v52  ;;  %1457 = vmatprep.mubr.bf16.mxu0 %v6938_v53  ;;  %v6208_v5 = vpack.i.bf16 %v4945_v62, %v4944_v58 }
 0x10b   : > { %5934 = vmatprep.mubr.msk.bf16.mxu1 %vm6526_vm0, %v6525_v2 }
 0x10c   : > { %v5101_v15 = vpop.f32.mrb[4].mxu0  ;;  %v1115_v47 = vrot.slane %v7111_v9, 1  ;;  %6209 = vperm.xlu0 %6202, %v6208_v5  }
 0x10d   : > { %v5102_v19 = vpop.f32.mrb[5].mxu0  ;;  %v1003_v20 = vpop.f32.mrb[4].mxu1 }
 0x10e   : > { %v5103_v23 = vadd.f32 %v5102_v19, %v5101_v15  ;;  %v5104_v24 = vpop.f32.mrb[6].mxu0  ;;  %v5812_v28 = vpop.f32.mrb[5].mxu1 }
 0x10f   : > { %v5105_v29 = vpop.f32.mrb[7].mxu0  ;;  %v1006_v34 = vpop.f32.mrb[6].mxu1 }
 0x110   : > { %v1004_v39 = vadd.f32 %v5103_v23, %v1003_v20  ;;  %v5106_v40 = vadd.f32 %v5105_v29, %v5104_v24  ;;  %v5813_v43 = vpop.f32.mrb[7].mxu1  ;;  %v5056_v24 = vld [vmem:[%s7099_s22 + $0x18] sm:$0xff]  }
 0x111   : > { %1458 = vmatmul.mubr.bf16.gmra.mrb[112].mxu0 %v6914_v41 }
 0x112   : > { %v1116_v51 = vrot.slane %v1004_v39, 1  ;;  %v1007_v54 = vadd.f32 %v5106_v40, %v1006_v34  ;;  %5935 = vmatmul.mubr.bf16.gmra.mrb[112].mxu1 %v6947_v59  ;;  %1465 = vmatprep.mubr.bf16.mxu0 %v6949_v60  ;;  %v4948_v34 = vunpack.c.l.bf16 %v5056_v24  ;;  %v4949_v39 = vunpack.c.h.bf16 %v5056_v24 }
 0x113   : > { %5938 = vmatprep.mubr.msk.bf16.mxu1 %vm6526_vm0, %v6525_v2 }
 0x114   : > { %v1117_v63 = vrot.slane %v1007_v54, 1  ;;  %v5107_v0 = vpop.f32.mrb[8].mxu0  ;;  %v7131_v1 = vsel %vm1146_vm1, %v1115_v47, %v1116_v51 }
 0x115   : > { %v5108_v32 = vpop.f32.mrb[9].mxu0  ;;  %v1011_v7 = vpop.f32.mrb[8].mxu1 }
 0x116   : > { %v5109_v8 = vadd.f32 %v5108_v32, %v5107_v0  ;;  %v5110_v10 = vpop.f32.mrb[10].mxu0  ;;  %v5816_v11 = vpop.f32.mrb[9].mxu1  ;;  %v7135_v12 = vsel %vm1146_vm1, %v1116_v51, %v1117_v63  ;;  %v6219_v51 = vpack.i.bf16 %v4949_v39, %v4948_v34 }
 0x117   : > { %v5111_v15 = vpop.f32.mrb[11].mxu0  ;;  %v1014_v16 = vpop.f32.mrb[10].mxu1  ;;  %v6456_v11 = vld [vmem:[%s6688_s13] sm:$0xff]  }
 0x118   : > { %v1012_v19 = vadd.f32 %v5109_v8, %v1011_v7  ;;  %v5112_v20 = vadd.f32 %v5111_v15, %v5110_v10  ;;  %v5817_v23 = vpop.f32.mrb[11].mxu1  ;;  %6220 = vperm.xlu1 %6213, %v6219_v51  }
 0x119   : > { %1466 = vmatmul.mubr.bf16.gmra.mrb[116].mxu0 %v6925_v48 }
 0x11a   : > { %v1118_v28 = vrot.slane %v1012_v19, 1  ;;  %v1015_v29 = vadd.f32 %v5112_v20, %v1014_v16  ;;  %5939 = vmatmul.mubr.bf16.gmra.mrb[116].mxu1 %v6957_v61  ;;  %1852 = vmatprep.mubr.bf16.mxu0 %v6702_v26 }
 0x11b   : > { %5958 = vmatprep.mubr.msk.bf16.mxu1 %vm6526_vm0, %v6525_v2 }
 0x11c   : > { %v1119_v40 = vrot.slane %v1015_v29, 1  ;;  %v5113_v43 = vpop.f32.mrb[12].mxu0  ;;  %v7145_v50 = vsel %vm1146_vm1, %v1117_v63, %v1118_v28  ;;  %v5057_v63 = vld [vmem:[%s7099_s22 + $0x20] sm:$0xff]  }
 0x11d   : > { %v5114_v54 = vpop.f32.mrb[13].mxu0  ;;  %v1019_v58 = vpop.f32.mrb[12].mxu1  ;;  %v4952_v19 = vunpack.c.l.bf16 %v5057_v63  ;;  %v4953_v20 = vunpack.c.h.bf16 %v5057_v63 }
 0x11e   : > { %v5115_v62 = vadd.f32 %v5114_v54, %v5113_v43  ;;  %v5116_v61 = vpop.f32.mrb[14].mxu0  ;;  %v5820_v0 = vpop.f32.mrb[13].mxu1  ;;  %v7149_v26 = vsel %vm1146_vm1, %v1118_v28, %v1119_v40 }
 0x11f   : > { %v5117_v5 = vpop.f32.mrb[15].mxu0  ;;  %v1022_v32 = vpop.f32.mrb[14].mxu1  ;;  %v6224_v29 = vpack.i.bf16 %v4953_v20, %v4952_v19 }
 0x120   : > { %v1020_v7 = vadd.f32 %v5115_v62, %v1019_v58  ;;  %v5118_v8 = vadd.f32 %v5117_v5, %v5116_v61  ;;  %v5821_v10 = vpop.f32.mrb[15].mxu1 }
 0x121   : > { %1853 = vmatmul.mubr.bf16.vlgmr.msra.gmra.mrb[120].mxu0 %v6456_v11  ;;  %6225 = vperm.xlu0 %6202, %v6224_v29  }
 0x122   : > { %v1120_v15 = vrot.slane %v1020_v7, 1  ;;  %v1023_v16 = vadd.f32 %v5118_v8, %v1022_v32  ;;  %5959 = vmatmul.mubr.bf16.vlgmr.msra.gmra.mrb[120].mxu1 %v6718_v33  ;;  %1860 = vmatprep.mubr.bf16.mxu0 %v6726_v36 }
 0x123   : > { %5962 = vmatprep.mubr.msk.bf16.mxu1 %vm6526_vm0, %v6525_v2 }
 0x124   : > { %v1121_v23 = vrot.slane %v1023_v16, 1  ;;  %v5119_v24 = vpop.f32.mrb[16].mxu0  ;;  %v7159_v28 = vsel %vm1146_vm1, %v1119_v40, %v1120_v15  ;;  %v5058_v40 = vld [vmem:[%s7099_s22 + $0x28] sm:$0xff]  }
 0x125   : > { %v5120_v34 = vpop.f32.mrb[17].mxu0  ;;  %v1027_v39 = vpop.f32.mrb[16].mxu1  ;;  %v4956_v8 = vunpack.c.l.bf16 %v5058_v40  ;;  %v4957_v10 = vunpack.c.h.bf16 %v5058_v40  ;;  %v5061_v40 = vld [vmem:[%s7099_s22 + $0x40] sm:$0xff]  }
 0x126   : > { %v5121_v43 = vadd.f32 %v5120_v34, %v5119_v24  ;;  %v5122_v51 = vpop.f32.mrb[18].mxu0  ;;  %v5824_v54 = vpop.f32.mrb[17].mxu1  ;;  %v7163_v36 = vsel %vm1146_vm1, %v1120_v15, %v1121_v23  ;;  %v5059_v34 = vld [vmem:[%s7099_s22 + $0x30] sm:$0xff]  }
 0x127   : > { %v5123_v58 = vpop.f32.mrb[19].mxu0  ;;  %v1030_v62 = vpop.f32.mrb[18].mxu1  ;;  %v4961_v54 = vunpack.c.h.bf16 %v5059_v34 }
 0x128   : > { %v1028_v61 = vadd.f32 %v5121_v43, %v1027_v39  ;;  %v5124_v0 = vadd.f32 %v5123_v58, %v5122_v51  ;;  %v5825_v5 = vpop.f32.mrb[19].mxu1  ;;  %v4960_v51 = vunpack.c.l.bf16 %v5059_v34 }
 0x129   : > { %1861 = vmatmul.mubr.bf16.gmra.mrb[124].mxu0 %v6749_v44  ;;  %v6229_v44 = vpack.i.bf16 %v4957_v10, %v4956_v8 }
 0x12a   : > { %v1122_v32 = vrot.slane %v1028_v61, 1  ;;  %v1031_v7 = vadd.f32 %v5124_v0, %v1030_v62  ;;  %5963 = vmatmul.mubr.bf16.gmra.mrb[124].mxu1 %v6752_v45  ;;  %1868 = vmatprep.mubr.bf16.mxu0 %v6754_v46  ;;  %v6234_v61 = vpack.i.bf16 %v4961_v54, %v4960_v51 }
 0x12b   : > { %5966 = vmatprep.mubr.msk.bf16.mxu1 %vm6526_vm0, %v6525_v2  ;;  %6230 = vperm.xlu1 %6213, %v6229_v44  }
 0x12c   : > { %v1123_v11 = vrot.slane %v1031_v7, 1  ;;  %v5125_v63 = vpop.f32.mrb[20].mxu0  ;;  %v7173_v15 = vsel %vm1146_vm1, %v1121_v23, %v1122_v32  ;;  %6235 = vperm.xlu0 %6202, %v6234_v61   ;;  %v4969_v7 = vunpack.c.h.bf16 %v5061_v40 }
 0x12d   : > { %v5126_v16 = vpop.f32.mrb[21].mxu0  ;;  %v1035_v19 = vpop.f32.mrb[20].mxu1 }
 0x12e   : > { %v5127_v20 = vadd.f32 %v5126_v16, %v5125_v63  ;;  %v5128_v24 = vpop.f32.mrb[22].mxu0  ;;  %v5828_v29 = vpop.f32.mrb[21].mxu1  ;;  %v7177_v46 = vsel %vm1146_vm1, %v1122_v32, %v1123_v11  ;;  %v4968_v32 = vunpack.c.l.bf16 %v5061_v40 }
 0x12f   : > { %v5129_v39 = vpop.f32.mrb[23].mxu0  ;;  %v1038_v43 = vpop.f32.mrb[22].mxu1  ;;  %v5063_v29 = vld [vmem:[%s7099_s22 + $0x50] sm:$0xff]  }
 0x130   : > { %v1036_v58 = vadd.f32 %v5127_v20, %v1035_v19  ;;  %v5130_v23 = vadd.f32 %v5129_v39, %v5128_v24  ;;  %v5829_v62 = vpop.f32.mrb[23].mxu1  ;;  %v6244_v16 = vpack.i.bf16 %v4969_v7, %v4968_v32  ;;  %v4977_v51 = vunpack.c.h.bf16 %v5063_v29  ;;  %v5065_v32 = vld [vmem:[%s7099_s22 + $0x60] sm:$0xff]  }
 0x131   : > { %1869 = vmatmul.mubr.bf16.gmra.mrb[128].mxu0 %v6782_v55 }
 0x132   : > { %v1124_v0 = vrot.slane %v1036_v58, 1  ;;  %v1039_v5 = vadd.f32 %v5130_v23, %v1038_v43  ;;  %5967 = vmatmul.mubr.bf16.gmra.mrb[128].mxu1 %v6785_v56  ;;  %1876 = vmatprep.mubr.bf16.mxu0 %v6787_v57  ;;  %v4976_v43 = vunpack.c.l.bf16 %v5063_v29  ;;  %v5060_v23 = vld [vmem:[%s7099_s22 + $0x38] sm:$0xff]  }
 0x133   : > { %5970 = vmatprep.mubr.msk.bf16.mxu1 %vm6526_vm0, %v6525_v2  ;;  %6245 = vperm.xlu0 %6202, %v6244_v16   ;;  %v4964_v61 = vunpack.c.l.bf16 %v5060_v23 }
 0x134   : > { %v1125_v8 = vrot.slane %v1039_v5, 1  ;;  %v5131_v10 = vpop.f32.mrb[24].mxu0  ;;  %v7188_v55 = vsel %vm1146_vm1, %v1123_v11, %v1124_v0  ;;  %v6254_v62 = vpack.i.bf16 %v4977_v51, %v4976_v43  ;;  %v4965_v5 = vunpack.c.h.bf16 %v5060_v23 }
 0x135   : > { %v5132_v63 = vpop.f32.mrb[25].mxu0  ;;  %v1043_v44 = vpop.f32.mrb[24].mxu1 }
 0x136   : > { %v5133_v19 = vadd.f32 %v5132_v63, %v5131_v10  ;;  %v5134_v57 = vpop.f32.mrb[26].mxu0  ;;  %v5832_v20 = vpop.f32.mrb[25].mxu1  ;;  %v7192_v24 = vsel %vm1146_vm1, %v1124_v0, %v1125_v8  ;;  %v6239_v7 = vpack.i.bf16 %v4965_v5, %v4964_v61  ;;  %v4984_v10 = vunpack.c.l.bf16 %v5065_v32 }
 0x137   : > { %v5135_v34 = vpop.f32.mrb[27].mxu0  ;;  %v1046_v39 = vpop.f32.mrb[26].mxu1  ;;  %6255 = vperm.xlu0 %6202, %v6254_v62   ;;  %v4985_v63 = vunpack.c.h.bf16 %v5065_v32 }
 0x138   : > { %v1044_v11 = vadd.f32 %v5133_v19, %v1043_v44  ;;  %v5136_v54 = vadd.f32 %v5135_v34, %v5134_v57  ;;  %v5833_v58 = vpop.f32.mrb[27].mxu1  ;;  %v5062_v19 = vld [vmem:[%s7099_s22 + $0x48] sm:$0xff]   ;;  %6240 = vperm.xlu1 %6213, %v6239_v7   ;;  %v5064_v7 = vld [vmem:[%s7099_s22 + $0x58] sm:$0xff]  }
 0x139   : > { %1877 = vmatmul.mubr.bf16.gmra.mrb[132].mxu0 %v6718_v33  ;;  %v4972_v29 = vunpack.c.l.bf16 %v5062_v19  ;;  %v4973_v34 = vunpack.c.h.bf16 %v5062_v19 }
 0x13a   : > { %v1126_v40 = vrot.slane %v1044_v11, 1  ;;  %v1047_v0 = vadd.f32 %v5136_v54, %v1046_v39  ;;  %5971 = vmatmul.mubr.bf16.gmra.mrb[132].mxu1 %v6816_v3  ;;  %1884 = vmatprep.mubr.bf16.mxu0 %v6818_v4  ;;  %v6264_v4 = vpack.i.bf16 %v4985_v63, %v4984_v10  ;;  %v5067_v54 = vld [vmem:[%s7099_s22 + $0x70] sm:$0xff]   ;;  %v4980_v63 = vunpack.c.l.bf16 %v5064_v7 }
 0x13b   : > { %5974 = vmatprep.mubr.msk.bf16.mxu1 %vm6526_vm0, %v6525_v2  ;;  %v4992_v62 = vunpack.c.l.bf16 %v5067_v54  ;;  %v4993_v61 = vunpack.c.h.bf16 %v5067_v54 }
 0x13c   : > { %v1127_v33 = vrot.slane %v1047_v0, 1  ;;  %v5137_v44 = vpop.f32.mrb[28].mxu0  ;;  %v7204_v16 = vsel %vm1146_vm1, %v1125_v8, %v1126_v40  ;;  %6265 = vperm.xlu0 %6202, %v6264_v4   ;;  %v6249_v8 = vpack.i.bf16 %v4973_v34, %v4972_v29  ;;  %v5066_v29 = vld [vmem:[%s7099_s22 + $0x68] sm:$0xff]  }
 0x13d   : > { %v5138_v57 = vpop.f32.mrb[29].mxu0  ;;  %v1051_v20 = vpop.f32.mrb[28].mxu1  ;;  %v6274_v10 = vpack.i.bf16 %v4993_v61, %v4992_v62 }
 0x13e   : > { %v5139_v39 = vadd.f32 %v5138_v57, %v5137_v44  ;;  %v5140_v43 = vpop.f32.mrb[30].mxu0  ;;  %v5836_v51 = vpop.f32.mrb[29].mxu1  ;;  %v7209_v11 = vsel %vm1146_vm1, %v1126_v40, %v1127_v33  ;;  %6250 = vperm.xlu1 %6213, %v6249_v8   ;;  %v4981_v44 = vunpack.c.h.bf16 %v5064_v7 }
 0x13f   : > { %v5141_v58 = vpop.f32.mrb[31].mxu0  ;;  %v1054_v23 = vpop.f32.mrb[30].mxu1  ;;  %v4989_v51 = vunpack.c.h.bf16 %v5066_v29 }
 0x140   : > { %v1052_v5 = vadd.f32 %v5139_v39, %v1051_v20  ;;  %v5142_v0 = vadd.f32 %v5141_v58, %v5140_v43  ;;  %v5837_v32 = vpop.f32.mrb[31].mxu1  ;;  %6275 = vperm.xlu0 %6202, %v6274_v10   ;;  %v6259_v57 = vpack.i.bf16 %v4981_v44, %v4980_v63  ;;  %v4988_v43 = vunpack.c.l.bf16 %v5066_v29 }
 0x141   : > { %1885 = vmatmul.mubr.bf16.gmra.mrb[136].mxu0 %v6752_v45 }
 0x142   : > { %v1128_v40 = vrot.slane %v1052_v5, 1  ;;  %v1055_v19 = vadd.f32 %v5142_v0, %v1054_v23  ;;  %5975 = vmatmul.mubr.bf16.gmra.mrb[136].mxu1 %v6847_v13  ;;  %1892 = vmatprep.mubr.bf16.mxu0 %v6849_v14  ;;  %v6269_v61 = vpack.i.bf16 %v4989_v51, %v4988_v43 }
 0x143   : > { %5978 = vmatprep.mubr.msk.bf16.mxu1 %vm6526_vm0, %v6525_v2  ;;  %6260 = vperm.xlu1 %6213, %v6259_v57  }
 0x144   : > { %v1129_v20 = vrot.slane %v1055_v19, 1  ;;  %v5143_v4 = vpop.f32.mrb[32].mxu0  ;;  %v7220_v45 = vsel %vm1146_vm1, %v1127_v33, %v1128_v40 }
 0x145   : > { %v5144_v34 = vpop.f32.mrb[33].mxu0  ;;  %v1059_v39 = vpop.f32.mrb[32].mxu1 }
 0x146   : > { %v5145_v54 = vadd.f32 %v5144_v34, %v5143_v4  ;;  %v5146_v58 = vpop.f32.mrb[34].mxu0  ;;  %v5840_v14 = vpop.f32.mrb[33].mxu1  ;;  %v7225_v23 = vsel %vm1146_vm1, %v1128_v40, %v1129_v20 }
 0x147   : > { %v5147_v8 = vpop.f32.mrb[35].mxu0  ;;  %v1062_v62 = vpop.f32.mrb[34].mxu1  ;;  %6270 = vperm.xlu1 %6213, %v6269_v61  }
 0x148   : > { %v1060_v5 = vadd.f32 %v5145_v54, %v1059_v39  ;;  %v5148_v0 = vadd.f32 %v5147_v8, %v5146_v58  ;;  %v5841_v33 = vpop.f32.mrb[35].mxu1 }
 0x149   : > { %1893 = vmatmul.mubr.bf16.gmra.mrb[140].mxu0 %v6785_v56 }
 0x14a   : > { %v1130_v32 = vrot.slane %v1060_v5, 1  ;;  %v1063_v7 = vadd.f32 %v5148_v0, %v1062_v62  ;;  %5979 = vmatmul.mubr.bf16.gmra.mrb[140].mxu1 %v6859_v17  ;;  %1900 = vmatprep.mubr.bf16.mxu0 %v6861_v18 }
 0x14b   : > { %5982 = vmatprep.mubr.msk.bf16.mxu1 %vm6526_vm0, %v6525_v2 }
 0x14c   : > { %v1131_v10 = vrot.slane %v1063_v7, 1  ;;  %v5149_v63 = vpop.f32.mrb[36].mxu0  ;;  %v7234_v44 = vsel %vm1146_vm1, %v1129_v20, %v1130_v32 }
 0x14d   : > { %v5150_v40 = vpop.f32.mrb[37].mxu0  ;;  %v1067_v19 = vpop.f32.mrb[36].mxu1 }
 0x14e   : > { %v5151_v57 = vadd.f32 %v5150_v40, %v5149_v63  ;;  %v5152_v56 = vpop.f32.mrb[38].mxu0  ;;  %v5844_v4 = vpop.f32.mrb[37].mxu1  ;;  %v7238_v29 = vsel %vm1146_vm1, %v1130_v32, %v1131_v10 }
 0x14f   : > { %v5153_v34 = vpop.f32.mrb[39].mxu0  ;;  %v1070_v18 = vpop.f32.mrb[38].mxu1 }
 0x150   : > { %v1068_v39 = vadd.f32 %v5151_v57, %v1067_v19  ;;  %v5154_v43 = vadd.f32 %v5153_v34, %v5152_v56  ;;  %v5845_v51 = vpop.f32.mrb[39].mxu1  ;;  %v6384_v34 = vld [vmem:[%s8650_s5 + $0x40] sm:$0xff]  }
 0x151   : > { %1901 = vmatmul.mubr.bf16.gmra.mrb[144].mxu0 %v6816_v3  ;;  %5466 = vmatprep.subr.bf16.mxu0 %v6384_v34 }
 0x152   : > { %v1132_v54 = vrot.slane %v1068_v39, 1  ;;  %v1071_v58 = vadd.f32 %v5154_v43, %v1070_v18  ;;  %5983 = vmatmul.mubr.bf16.gmra.mrb[144].mxu1 %v6870_v21  ;;  %1908 = vmatprep.mubr.bf16.mxu0 %v6872_v22 }
 0x153   : > { %5986 = vmatprep.mubr.msk.bf16.mxu1 %vm6526_vm0, %v6525_v2 }
 0x154   : > { %v1133_v20 = vrot.slane %v1071_v58, 1  ;;  %v5155_v14 = vpop.f32.mrb[40].mxu0  ;;  %v7247_v8 = vsel %vm1146_vm1, %v1131_v10, %v1132_v54 }
 0x155   : > { %v5156_v62 = vpop.f32.mrb[41].mxu0  ;;  %v1075_v61 = vpop.f32.mrb[40].mxu1 }
 0x156   : > { %v5157_v5 = vadd.f32 %v5156_v62, %v5155_v14  ;;  %v5158_v0 = vpop.f32.mrb[42].mxu0  ;;  %v5848_v3 = vpop.f32.mrb[41].mxu1  ;;  %v7251_v33 = vsel %vm1146_vm1, %v1132_v54, %v1133_v20 }
 0x157   : > { %v5159_v32 = vpop.f32.mrb[43].mxu0  ;;  %v1078_v22 = vpop.f32.mrb[42].mxu1 }
 0x158   : > { %v1076_v7 = vadd.f32 %v5157_v5, %v1075_v61  ;;  %v5160_v63 = vadd.f32 %v5159_v32, %v5158_v0  ;;  %v5849_v40 = vpop.f32.mrb[43].mxu1 }
 0x159   : > { %1909 = vmatmul.mubr.bf16.gmra.mrb[148].mxu0 %v6847_v13  ;;  %v6385_v13 = vld [vmem:[%s8650_s5] sm:$0xff]  }
 0x15a   : > { %v1134_v19 = vrot.slane %v1076_v7, 1  ;;  %v1079_v57 = vadd.f32 %v5160_v63, %v1078_v22  ;;  %5987 = vmatmul.mubr.bf16.gmra.mrb[148].mxu1 %v6881_v25  ;;  %1916 = vmatprep.mubr.bf16.mxu0 %v6883_v27  ;;  %v6386_v27 = vld [vmem:[%s8650_s5 + $0x80] sm:$0xff]  }
 0x15b   : > { %5990 = vmatprep.mubr.msk.bf16.mxu1 %vm6526_vm0, %v6525_v2  ;;  %6018 = vmatprep.subr.bf16.mxu1 %v6386_v27 }
 0x15c   : > { %v1135_v10 = vrot.slane %v1079_v57, 1  ;;  %v5161_v56 = vpop.f32.mrb[44].mxu0  ;;  %v7260_v4 = vsel %vm1146_vm1, %v1133_v20, %v1134_v19  ;;  %5467 = vmatpush3.bf16.msra.mxu0 %v6385_v13  ;;  %6019 = vmatpush3.bf16.msra.mxu1 %v6386_v27 }
 0x15d   : > { %v5162_v18 = vpop.f32.mrb[45].mxu0  ;;  %v1083_v39 = vpop.f32.mrb[44].mxu1 }
 0x15e   : > { %v5163_v43 = vadd.f32 %v5162_v18, %v5161_v56  ;;  %v5164_v51 = vpop.f32.mrb[46].mxu0  ;;  %v5852_v54 = vpop.f32.mrb[45].mxu1  ;;  %v7273_v58 = vsel %vm1146_vm1, %v1134_v19, %v1135_v10 }
 0x15f   : > { %v5165_v20 = vpop.f32.mrb[47].mxu0  ;;  %v1086_v14 = vpop.f32.mrb[46].mxu1 }
 0x160   : > { %v1084_v62 = vadd.f32 %v5163_v43, %v1083_v39  ;;  %v5166_v61 = vadd.f32 %v5165_v20, %v5164_v51  ;;  %v5853_v5 = vpop.f32.mrb[47].mxu1  ;;  %v6387_v20 = vld [vmem:[%s8650_s5 + $0x48] sm:$0xff]  }
 0x161   : > { %1917 = vmatmul.mubr.bf16.gmra.mrb[152].mxu0 %v6859_v17  ;;  %5468 = vmatprep.subr.bf16.mxu0 %v6387_v20 }
 0x162   : > { %v1136_v0 = vrot.slane %v1084_v62, 1  ;;  %v1087_v3 = vadd.f32 %v5166_v61, %v1086_v14  ;;  %5991 = vmatmul.mubr.bf16.gmra.mrb[152].mxu1 %v6892_v30  ;;  %1924 = vmatprep.mubr.bf16.mxu0 %v6894_v31 }
 0x163   : > { %5994 = vmatprep.mubr.msk.bf16.mxu1 %vm6526_vm0, %v6525_v2 }
 0x164   : > { %v1137_v32 = vrot.slane %v1087_v3, 1  ;;  %v5167_v22 = vpop.f32.mrb[48].mxu0  ;;  %v7282_v7 = vsel %vm1146_vm1, %v1135_v10, %v1136_v0 }
 0x165   : > { %v5168_v63 = vpop.f32.mrb[49].mxu0  ;;  %v1091_v40 = vpop.f32.mrb[48].mxu1 }
 0x166   : > { %v5169_v19 = vadd.f32 %v5168_v63, %v5167_v22  ;;  %v5170_v57 = vpop.f32.mrb[50].mxu0  ;;  %v5856_v17 = vpop.f32.mrb[49].mxu1  ;;  %v7286_v56 = vsel %vm1146_vm1, %v1136_v0, %v1137_v32 }
 0x167   : > { %v5171_v34 = vpop.f32.mrb[51].mxu0  ;;  %v1094_v31 = vpop.f32.mrb[50].mxu1 }
 0x168   : > { %v1092_v13 = vadd.f32 %v5169_v19, %v1091_v40  ;;  %v5172_v27 = vadd.f32 %v5171_v34, %v5170_v57  ;;  %v5857_v18 = vpop.f32.mrb[51].mxu1 }
 0x169   : > { %1925 = vmatmul.mubr.bf16.gmra.mrb[156].mxu0 %v6870_v21  ;;  %v6388_v21 = vld [vmem:[%s8650_s5 + $0x8] sm:$0xff]  }
 0x16a   : > { %v1138_v39 = vrot.slane %v1092_v13, 1  ;;  %v1095_v43 = vadd.f32 %v5172_v27, %v1094_v31  ;;  %5995 = vmatmul.mubr.bf16.gmra.mrb[156].mxu1 %v6903_v37  ;;  %1932 = vmatprep.mubr.bf16.mxu0 %v6905_v38  ;;  %v6389_v38 = vld [vmem:[%s8650_s5 + $0x88] sm:$0xff]  }
 0x16b   : > { %5998 = vmatprep.mubr.msk.bf16.mxu1 %vm6526_vm0, %v6525_v2  ;;  %6020 = vmatprep.subr.bf16.mxu1 %v6389_v38 }
 0x16c   : > { %v1139_v10 = vrot.slane %v1095_v43, 1  ;;  %v5173_v51 = vpop.f32.mrb[52].mxu0  ;;  %v7295_v54 = vsel %vm1146_vm1, %v1137_v32, %v1138_v39  ;;  %5469 = vmatpush3.bf16.msra.mxu0 %v6388_v21  ;;  %6021 = vmatpush3.bf16.msra.mxu1 %v6389_v38 }
 0x16d   : > { %v5174_v14 = vpop.f32.mrb[53].mxu0  ;;  %v1099_v62 = vpop.f32.mrb[52].mxu1 }
 0x16e   : > { %v5175_v61 = vadd.f32 %v5174_v14, %v5173_v51  ;;  %v5176_v5 = vpop.f32.mrb[54].mxu0  ;;  %v5860_v0 = vpop.f32.mrb[53].mxu1  ;;  %v7308_v3 = vsel %vm1146_vm1, %v1138_v39, %v1139_v10 }
 0x16f   : > { %v5177_v32 = vpop.f32.mrb[55].mxu0  ;;  %v1102_v22 = vpop.f32.mrb[54].mxu1 }
 0x170   : > { %v1100_v63 = vadd.f32 %v5175_v61, %v1099_v62  ;;  %v5178_v40 = vadd.f32 %v5177_v32, %v5176_v5  ;;  %v5861_v19 = vpop.f32.mrb[55].mxu1  ;;  %v1114_v32 = vrot.slane %v7107_v6, 1 }
 0x171   : > { %1933 = vmatmul.mubr.bf16.gmra.mrb[160].mxu0 %v6881_v25 }
 0x172   : > { %v1140_v57 = vrot.slane %v1100_v63, 1  ;;  %v1103_v17 = vadd.f32 %v5178_v40, %v1102_v22  ;;  %5999 = vmatmul.mubr.bf16.gmra.mrb[160].mxu1 %v6914_v41  ;;  %1940 = vmatprep.mubr.bf16.mxu0 %v6916_v42 }
 0x173   : > { %6002 = vmatprep.mubr.msk.bf16.mxu1 %vm6526_vm0, %v6525_v2 }
 0x174   : > { %v1141_v34 = vrot.slane %v1103_v17, 1  ;;  %v5179_v31 = vpop.f32.mrb[56].mxu0  ;;  %v7317_v13 = vsel %vm1146_vm1, %v1139_v10, %v1140_v57  ;;  %v6390_v10 = vld [vmem:[%s8650_s5 + $0x50] sm:$0xff]   ;;  %v1175_v17 = vsel %vm1146_vm1, %v1114_v32, %v1115_v47 }
 0x175   : > { %v5180_v27 = vpop.f32.mrb[57].mxu0  ;;  %v1107_v18 = vpop.f32.mrb[56].mxu1  ;;  %5470 = vmatprep.subr.bf16.mxu0 %v6390_v10 }
 0x176   : > { %v5181_v39 = vadd.f32 %v5180_v27, %v5179_v31  ;;  %v5182_v43 = vpop.f32.mrb[58].mxu0  ;;  %v5864_v25 = vpop.f32.mrb[57].mxu1  ;;  %v7321_v51 = vsel %vm1146_vm1, %v1140_v57, %v1141_v34  ;;  %v6391_v27 = vld [vmem:[%s8650_s5 + $0x10] sm:$0xff]  }
 0x177   : > { %v5183_v20 = vpop.f32.mrb[59].mxu0  ;;  %v1110_v42 = vpop.f32.mrb[58].mxu1  ;;  %5471 = vmatpush3.bf16.msra.mxu0 %v6391_v27 }
 0x178   : > { %v1108_v21 = vadd.f32 %v5181_v39, %v1107_v18  ;;  %v5184_v38 = vadd.f32 %v5183_v20, %v5182_v43  ;;  %v5865_v14 = vpop.f32.mrb[59].mxu1  ;;  %v6392_v18 = vld [vmem:[%s8650_s5 + $0x90] sm:$0xff]  }
 0x179   : > { %1941 = vmatmul.mubr.bf16.gmra.mrb[164].mxu0 %v6892_v30  ;;  %6022 = vmatprep.subr.bf16.mxu1 %v6392_v18 }
 0x17a   : > { %v1142_v62 = vrot.slane %v1108_v21, 1  ;;  %v7324_v61 = vadd.f32 %v5184_v38, %v1110_v42  ;;  %6003 = vmatmul.mubr.bf16.gmra.mrb[164].mxu1 %v6925_v48  ;;  %1948 = vmatprep.mubr.bf16.mxu0 %v6927_v49 }
 0x17b   : > { %6006 = vmatprep.mubr.msk.bf16.mxu1 %vm6526_vm0, %v6525_v2  ;;  %6023 = vmatpush3.bf16.msra.mxu1 %v6392_v18 }
 0x17c   : > { %v1143_v5 = vrot.slane %v7324_v61, 1  ;;  %v5224_v0 = vpop.f32.mrb[60].mxu0  ;;  %v7336_v30 = vsel %vm1146_vm1, %v1141_v34, %v1142_v62 }
 0x17d   : > { %v5225_v22 = vpop.f32.mrb[61].mxu0  ;;  %v1508_v63 = vpop.f32.mrb[60].mxu1 }
 0x17e   : > { %v5226_v49 = vadd.f32 %v5225_v22, %v5224_v0  ;;  %v5227_v40 = vpop.f32.mrb[62].mxu0  ;;  %v5884_v19 = vpop.f32.mrb[61].mxu1  ;;  %v7343_v57 = vsel %vm1146_vm1, %v1142_v62, %v1143_v5 }
 0x17f   : > { %v5228_v34 = vpop.f32.mrb[63].mxu0  ;;  %v1511_v31 = vpop.f32.mrb[62].mxu1 }
 0x180   : > { %v1356_v39 = vadd.f32 %v5226_v49, %v1175_v17  ;;  %v5229_v43 = vadd.f32 %v5228_v34, %v5227_v40  ;;  %v5885_v25 = vpop.f32.mrb[63].mxu1 }
 0x181   : > { %1949 = vmatmul.mubr.bf16.gmra.mrb[168].mxu0 %v6903_v37 }
 0x182   : > { %v7358_v9 = vadd.f32 %v1508_v63, %v1356_v39  ;;  %v1359_v47 = vadd.f32 %v5229_v43, %v7131_v1  ;;  %6007 = vmatmul.mubr.bf16.gmra.mrb[168].mxu1 %v6936_v52  ;;  %1956 = vmatprep.mubr.bf16.mxu0 %v6938_v53 }
 0x183   : > { %6010 = vmatprep.mubr.msk.bf16.mxu1 %vm6526_vm0, %v6525_v2 }
 0x184   : > { %v7365_v20 = vadd.f32 %v1511_v31, %v1359_v47  ;;  %v5230_v42 = vpop.f32.mrb[64].mxu0  ;;  %v6457_v47 = vld [vmem:[%s6688_s13 + $0x88] sm:$0xff]  }
 0x185   : > { %v5231_v21 = vpop.f32.mrb[65].mxu0  ;;  %v1516_v38 = vpop.f32.mrb[64].mxu1 }
 0x186   : > { %v5232_v37 = vadd.f32 %v5231_v21, %v5230_v42  ;;  %v5233_v14 = vpop.f32.mrb[66].mxu0  ;;  %v5888_v62 = vpop.f32.mrb[65].mxu1 }
 0x187   : > { %v5234_v10 = vpop.f32.mrb[67].mxu0  ;;  %v1519_v0 = vpop.f32.mrb[66].mxu1 }
 0x188   : > { %v1364_v1 = vadd.f32 %v5232_v37, %v7135_v12  ;;  %v5235_v52 = vadd.f32 %v5234_v10, %v5233_v14  ;;  %v5889_v22 = vpop.f32.mrb[67].mxu1 }
 0x189   : > { %1957 = vmatmul.mubr.bf16.gmra.mrb[172].mxu0 %v6914_v41 }
 0x18a   : > { %v7369_v53 = vadd.f32 %v1516_v38, %v1364_v1  ;;  %v1367_v63 = vadd.f32 %v5235_v52, %v7145_v50  ;;  %6011 = vmatmul.mubr.bf16.gmra.mrb[172].mxu1 %v6947_v59  ;;  %1964 = vmatprep.mubr.bf16.mxu0 %v6949_v60  ;;  %v6393_v59 = vld [vmem:[%s8650_s5 + $0x58] sm:$0xff]  }
 0x18b   : > { %6014 = vmatprep.mubr.msk.bf16.mxu1 %vm6526_vm0, %v6525_v2  ;;  %v6394_v60 = vld [vmem:[%s8650_s5 + $0x18] sm:$0xff]   ;;  %5472 = vmatprep.subr.bf16.mxu0 %v6393_v59 }
 0x18c   : > { %v7376_v49 = vadd.f32 %v1519_v0, %v1367_v63  ;;  %v5236_v40 = vpop.f32.mrb[68].mxu0  ;;  %v6395_v2 = vld [vmem:[%s8650_s5 + $0x98] sm:$0xff]   ;;  %5473 = vmatpush3.bf16.msra.mxu0 %v6394_v60  ;;  %v6399_v63 = vld [vmem:[%s8650_s5 + $0x68] sm:$0xff]  }
 0x18d   : > { %v5237_v19 = vpop.f32.mrb[69].mxu0  ;;  %v1524_v12 = vpop.f32.mrb[68].mxu1  ;;  %6024 = vmatprep.subr.bf16.mxu1 %v6395_v2 }
 0x18e   : > { %v5238_v17 = vadd.f32 %v5237_v19, %v5236_v40  ;;  %v5239_v34 = vpop.f32.mrb[70].mxu0  ;;  %v5892_v41 = vpop.f32.mrb[69].mxu1  ;;  %6025 = vmatpush3.bf16.msra.mxu1 %v6395_v2  ;;  %v6400_v40 = vld [vmem:[%s8650_s5 + $0x28] sm:$0xff]  }
 0x18f   : > { %v5240_v31 = vpop.f32.mrb[71].mxu0  ;;  %v1527_v27 = vpop.f32.mrb[70].mxu1 }
 0x190   : > { %v1372_v50 = vadd.f32 %v5238_v17, %v7149_v26  ;;  %v5241_v18 = vadd.f32 %v5240_v31, %v5239_v34  ;;  %v5893_v39 = vpop.f32.mrb[71].mxu1  ;;  %v6396_v26 = vld [vmem:[%s8650_s5 + $0x60] sm:$0xff]  }
 0x191   : > { %1965 = vmatmul.mubr.bf16.gmra.mrb[176].mxu0 %v6925_v48  ;;  %v6397_v48 = vld [vmem:[%s8650_s5 + $0x20] sm:$0xff]   ;;  %5474 = vmatprep.subr.bf16.mxu0 %v6396_v26  ;;  %v6404_v26 = vld [vmem:[%s8650_s5 + $0x38] sm:$0xff]  }
 0x192   : > { %v7389_v43 = vadd.f32 %v1524_v12, %v1372_v50  ;;  %v1375_v25 = vadd.f32 %v5241_v18, %v7159_v28  ;;  %6015 = vmatmul.mubr.bf16.gmra.mrb[176].mxu1 %v6457_v47  ;;  %5475 = vmatpush3.bf16.msra.mxu0 %v6397_v48  ;;  %v6398_v18 = vld [vmem:[%s8650_s5 + $0xa0] sm:$0xff]  }
 0x193   : > { %5476 = vmatprep.subr.bf16.mxu0 %v6399_v63  ;;  %6026 = vmatprep.subr.bf16.mxu1 %v6398_v18 }
 0x194   : > { %v7393_v42 = vadd.f32 %v1527_v27, %v1375_v25  ;;  %v5242_v21 = vpop.f32.mrb[72].mxu0  ;;  %v6402_v27 = vld [vmem:[%s8650_s5 + $0x30] sm:$0xff]   ;;  %6027 = vmatpush3.bf16.msra.mxu1 %v6398_v18 }
 0x195   : > { %v5243_v38 = vpop.f32.mrb[73].mxu0  ;;  %v1532_v37 = vpop.f32.mrb[72].mxu1 }
 0x196   : > { %v5244_v14 = vadd.f32 %v5243_v38, %v5242_v21  ;;  %v5245_v28 = vpop.f32.mrb[74].mxu0  ;;  %v5896_v62 = vpop.f32.mrb[73].mxu1  ;;  %5477 = vmatpush3.bf16.msra.mxu0 %v6400_v40  ;;  %v6403_v21 = vld [vmem:[%s8650_s5 + $0x78] sm:$0xff]  }
 0x197   : > { %v5246_v10 = vpop.f32.mrb[75].mxu0  ;;  %v1535_v0 = vpop.f32.mrb[74].mxu1 }
 0x198   : > { %v1380_v1 = vadd.f32 %v5244_v14, %v7163_v36  ;;  %v5247_v52 = vadd.f32 %v5246_v10, %v5245_v28  ;;  %v5897_v22 = vpop.f32.mrb[75].mxu1  ;;  %v6401_v36 = vld [vmem:[%s8650_s5 + $0x70] sm:$0xff]   ;;  %v6405_v14 = vld [vmem:[%s8650_s5 + $0xa8] sm:$0xff]  }
 0x199   : > { %5478 = vmatprep.subr.bf16.mxu0 %v6401_v36  ;;  %6028 = vmatprep.subr.bf16.mxu1 %v6405_v14 }
 0x19a   : > { %v7408_v19 = vadd.f32 %v1532_v37, %v1380_v1  ;;  %v1383_v12 = vadd.f32 %v5247_v52, %v7173_v15  ;;  %5479 = vmatpush3.bf16.msra.mxu0 %v6402_v27  ;;  %6029 = vmatpush3.bf16.msra.mxu1 %v6405_v14  ;;  %v6407_v27 = vld [vmem:[%s8650_s5 + $0xb8] sm:$0xff]  }
 0x19b   : > { %5480 = vmatprep.subr.bf16.mxu0 %v6403_v21 }
 0x19c   : > { %v7411_v17 = vadd.f32 %v1535_v0, %v1383_v12  ;;  %v5248_v34 = vpop.f32.mrb[76].mxu0  ;;  %v6406_v12 = vld [vmem:[%s8650_s5 + $0xb0] sm:$0xff]  }
 0x19d   : > { %v5249_v41 = vpop.f32.mrb[77].mxu0  ;;  %v1540_v31 = vpop.f32.mrb[76].mxu1  ;;  %6030 = vmatprep.subr.bf16.mxu1 %v6406_v12 }
 0x19e   : > { %v5250_v59 = vadd.f32 %v5249_v41, %v5248_v34  ;;  %v5251_v60 = vpop.f32.mrb[78].mxu0  ;;  %v5900_v2 = vpop.f32.mrb[77].mxu1  ;;  %5481 = vmatpush3.bf16.msra.mxu0 %v6404_v26  ;;  %6031 = vmatpush3.bf16.msra.mxu1 %v6406_v12 }
 0x19f   : > { %v5252_v15 = vpop.f32.mrb[79].mxu0  ;;  %v1543_v50 = vpop.f32.mrb[78].mxu1  ;;  %6032 = vmatprep.subr.bf16.mxu1 %v6407_v27 }
 0x1a0   : > { %v1388_v39 = vadd.f32 %v5250_v59, %v7177_v46  ;;  %v5253_v25 = vadd.f32 %v5252_v15, %v5251_v60  ;;  %v5901_v47 = vpop.f32.mrb[79].mxu1 }
 0x1a2   : > { %v7429_v38 = vadd.f32 %v1540_v31, %v1388_v39  ;;  %v1391_v37 = vadd.f32 %v5253_v25, %v7188_v55  ;;  %6033 = vmatpush3.bf16.msra.mxu1 %v6407_v27 }
 0x1a4   : > { %v7432_v48 = vadd.f32 %v1543_v50, %v1391_v37  ;;  %v5254_v46 = vpop.f32.mrb[80].mxu0 }
 0x1a5   : > { %v5255_v28 = vpop.f32.mrb[81].mxu0  ;;  %v1548_v62 = vpop.f32.mrb[80].mxu1 }
 0x1a6   : > { %v5256_v10 = vadd.f32 %v5255_v28, %v5254_v46  ;;  %v5257_v0 = vpop.f32.mrb[82].mxu0  ;;  %v5904_v1 = vpop.f32.mrb[81].mxu1 }
 0x1a7   : > { %v5258_v52 = vpop.f32.mrb[83].mxu0  ;;  %v1551_v22 = vpop.f32.mrb[82].mxu1 }
 0x1a8   : > { %v1396_v55 = vadd.f32 %v5256_v10, %v7192_v24  ;;  %v5259_v63 = vadd.f32 %v5258_v52, %v5257_v0  ;;  %v5905_v40 = vpop.f32.mrb[83].mxu1 }
 0x1aa   : > { %v7441_v34 = vadd.f32 %v1548_v62, %v1396_v55  ;;  %v1399_v36 = vadd.f32 %v5259_v63, %v7204_v16 }
 0x1ac   : > { %v7444_v41 = vadd.f32 %v1551_v22, %v1399_v36  ;;  %v5260_v31 = vpop.f32.mrb[84].mxu0 }
 0x1ad   : > { %v5261_v24 = vpop.f32.mrb[85].mxu0  ;;  %v1556_v59 = vpop.f32.mrb[84].mxu1 }
 0x1ae   : > { %v5262_v60 = vadd.f32 %v5261_v24, %v5260_v31  ;;  %v5263_v2 = vpop.f32.mrb[86].mxu0  ;;  %v5908_v15 = vpop.f32.mrb[85].mxu1 }
 0x1af   : > { %v5264_v50 = vpop.f32.mrb[87].mxu0  ;;  %v1559_v18 = vpop.f32.mrb[86].mxu1 }
 0x1b0   : > { %v1404_v16 = vadd.f32 %v5262_v60, %v7209_v11  ;;  %v5265_v39 = vadd.f32 %v5264_v50, %v5263_v2  ;;  %v5909_v25 = vpop.f32.mrb[87].mxu1 }
 0x1b2   : > { %v7450_v47 = vadd.f32 %v1556_v59, %v1404_v16  ;;  %v1407_v21 = vadd.f32 %v5265_v39, %v7220_v45 }
 0x1b4   : > { %v7453_v26 = vadd.f32 %v1559_v18, %v1407_v21  ;;  %v5266_v37 = vpop.f32.mrb[88].mxu0 }
 0x1b5   : > { %v5267_v46 = vpop.f32.mrb[89].mxu0  ;;  %v1564_v14 = vpop.f32.mrb[88].mxu1 }
 0x1b6   : > { %v5268_v28 = vadd.f32 %v5267_v46, %v5266_v37  ;;  %v5269_v62 = vpop.f32.mrb[90].mxu0  ;;  %v5912_v10 = vpop.f32.mrb[89].mxu1 }
 0x1b7   : > { %v5270_v0 = vpop.f32.mrb[91].mxu0  ;;  %v1567_v1 = vpop.f32.mrb[90].mxu1 }
 0x1b8   : > { %v1412_v52 = vadd.f32 %v5268_v28, %v7225_v23  ;;  %v5271_v22 = vadd.f32 %v5270_v0, %v5269_v62  ;;  %v5913_v11 = vpop.f32.mrb[91].mxu1 }
 0x1ba   : > { %v7456_v55 = vadd.f32 %v1564_v14, %v1412_v52  ;;  %v1415_v63 = vadd.f32 %v5271_v22, %v7234_v44 }
 0x1bc   : > { %v7459_v40 = vadd.f32 %v1567_v1, %v1415_v63  ;;  %v5272_v45 = vpop.f32.mrb[92].mxu0 }
 0x1bd   : > { %v5273_v12 = vpop.f32.mrb[93].mxu0  ;;  %v1572_v36 = vpop.f32.mrb[92].mxu1 }
 0x1be   : > { %v5274_v31 = vadd.f32 %v5273_v12, %v5272_v45  ;;  %v5275_v27 = vpop.f32.mrb[94].mxu0  ;;  %v5916_v24 = vpop.f32.mrb[93].mxu1 }
 0x1bf   : > { %v5276_v59 = vpop.f32.mrb[95].mxu0  ;;  %v1575_v60 = vpop.f32.mrb[94].mxu1 }
 0x1c0   : > { %v1420_v2 = vadd.f32 %v5274_v31, %v7238_v29  ;;  %v5277_v15 = vadd.f32 %v5276_v59, %v5275_v27  ;;  %v5917_v23 = vpop.f32.mrb[95].mxu1 }
 0x1c2   : > { %v7462_v50 = vadd.f32 %v1572_v36, %v1420_v2  ;;  %v1423_v18 = vadd.f32 %v5277_v15, %v7247_v8 }
 0x1c4   : > { %v7465_v16 = vadd.f32 %v1575_v60, %v1423_v18  ;;  %v5278_v44 = vpop.f32.mrb[96].mxu0 }
 0x1c5   : > { %v5279_v39 = vpop.f32.mrb[97].mxu0  ;;  %v1580_v25 = vpop.f32.mrb[96].mxu1 }
 0x1c6   : > { %v5280_v21 = vadd.f32 %v5279_v39, %v5278_v44  ;;  %v5281_v37 = vpop.f32.mrb[98].mxu0  ;;  %v5920_v46 = vpop.f32.mrb[97].mxu1 }
 0x1c7   : > { %v5282_v14 = vpop.f32.mrb[99].mxu0  ;;  %v1583_v28 = vpop.f32.mrb[98].mxu1 }
 0x1c8   : > { %v1428_v62 = vadd.f32 %v5280_v21, %v7251_v33  ;;  %v5283_v10 = vadd.f32 %v5282_v14, %v5281_v37  ;;  %v5921_v29 = vpop.f32.mrb[99].mxu1 }
 0x1ca   : > { %v7468_v0 = vadd.f32 %v1580_v25, %v1428_v62  ;;  %v1431_v1 = vadd.f32 %v5283_v10, %v7260_v4 }
 0x1cc   : > { %v7471_v52 = vadd.f32 %v1583_v28, %v1431_v1  ;;  %v5284_v8 = vpop.f32.mrb[100].mxu0 }
 0x1cd   : > { %v5285_v22 = vpop.f32.mrb[101].mxu0  ;;  %v1588_v11 = vpop.f32.mrb[100].mxu1 }
 0x1ce   : > { %v5286_v63 = vadd.f32 %v5285_v22, %v5284_v8  ;;  %v5287_v45 = vpop.f32.mrb[102].mxu0  ;;  %v5924_v12 = vpop.f32.mrb[101].mxu1 }
 0x1cf   : > { %v5288_v36 = vpop.f32.mrb[103].mxu0  ;;  %v1591_v31 = vpop.f32.mrb[102].mxu1 }
 0x1d0   : > { %v1436_v27 = vadd.f32 %v5286_v63, %v7273_v58  ;;  %v5289_v24 = vadd.f32 %v5288_v36, %v5287_v45  ;;  %v5925_v33 = vpop.f32.mrb[103].mxu1  ;;  %v6409_v45 = vld [vmem:[%s8650_s5 + $0x100] sm:$0xff]  }
 0x1d1   : > { %5574 = vmatprep.subr.bf16.mxu1 %v6409_v45 }
 0x1d2   : > { %v7474_v59 = vadd.f32 %v1588_v11, %v1436_v27  ;;  %v1439_v60 = vadd.f32 %v5289_v24, %v7282_v7 }
 0x1d4   : > { %v7477_v2 = vadd.f32 %v1591_v31, %v1439_v60  ;;  %v5290_v4 = vpop.f32.mrb[104].mxu0 }
 0x1d5   : > { %v5291_v15 = vpop.f32.mrb[105].mxu0  ;;  %v1596_v23 = vpop.f32.mrb[104].mxu1 }
 0x1d6   : > { %v5292_v18 = vadd.f32 %v5291_v15, %v5290_v4  ;;  %v5293_v44 = vpop.f32.mrb[106].mxu0  ;;  %v5928_v39 = vpop.f32.mrb[105].mxu1 }
 0x1d7   : > { %v5294_v25 = vpop.f32.mrb[107].mxu0  ;;  %v1599_v21 = vpop.f32.mrb[106].mxu1 }
 0x1d8   : > { %v1444_v37 = vadd.f32 %v5292_v18, %v7286_v56  ;;  %v5295_v46 = vadd.f32 %v5294_v25, %v5293_v44  ;;  %v5929_v58 = vpop.f32.mrb[107].mxu1  ;;  %v7488_v56 = vld [vmem:[%s8650_s5 + $0x140] sm:$0xff]  }
 0x1d9   : > { %6058 = vmatprep.subr.bf16.mxu0 %v7488_v56 }
 0x1da   : > { %v7480_v14 = vadd.f32 %v1596_v23, %v1444_v37  ;;  %v1447_v28 = vadd.f32 %v5295_v46, %v7295_v54 }
 0x1dc   : > { %v7483_v62 = vadd.f32 %v1599_v21, %v1447_v28  ;;  %v5296_v7 = vpop.f32.mrb[108].mxu0 }
 0x1dd   : > { %v5297_v10 = vpop.f32.mrb[109].mxu0  ;;  %v1604_v29 = vpop.f32.mrb[108].mxu1 }
 0x1de   : > { %v5298_v1 = vadd.f32 %v5297_v10, %v5296_v7  ;;  %v5299_v8 = vpop.f32.mrb[110].mxu0  ;;  %v5932_v22 = vpop.f32.mrb[109].mxu1 }
 0x1df   : > { %v5300_v11 = vpop.f32.mrb[111].mxu0  ;;  %v1607_v63 = vpop.f32.mrb[110].mxu1 }
 0x1e0   : > { %v1452_v54 = vadd.f32 %v5298_v1, %v7308_v3  ;;  %v5301_v12 = vadd.f32 %v5300_v11, %v5299_v8  ;;  %v5933_v36 = vpop.f32.mrb[111].mxu1 }
 0x1e2   : > { %v7495_v31 = vadd.f32 %v1604_v29, %v1452_v54  ;;  %v1455_v27 = vadd.f32 %v5301_v12, %v7317_v13 }
 0x1e4   : > { %v7498_v24 = vadd.f32 %v1607_v63, %v1455_v27  ;;  %v5302_v33 = vpop.f32.mrb[112].mxu0 }
 0x1e5   : > { %v5303_v60 = vpop.f32.mrb[113].mxu0  ;;  %v1612_v4 = vpop.f32.mrb[112].mxu1 }
 0x1e6   : > { %v5304_v15 = vadd.f32 %v5303_v60, %v5302_v33  ;;  %v5305_v23 = vpop.f32.mrb[114].mxu0  ;;  %v5936_v18 = vpop.f32.mrb[113].mxu1 }
 0x1e7   : > { %v5306_v44 = vpop.f32.mrb[115].mxu0  ;;  %v1615_v39 = vpop.f32.mrb[114].mxu1 }
 0x1e8   : > { %v1460_v3 = vadd.f32 %v5304_v15, %v7321_v51  ;;  %v5307_v25 = vadd.f32 %v5306_v44, %v5305_v23  ;;  %v5937_v21 = vpop.f32.mrb[115].mxu1 }
 0x1ea   : > { %v7501_v37 = vadd.f32 %v1612_v4, %v1460_v3  ;;  %v1463_v46 = vadd.f32 %v5307_v25, %v7336_v30  ;;  %v1176_v30 = vsel %vm1146_vm1, %v1143_v5, %v1114_v32 }
 0x1ec   : > { %v7504_v58 = vadd.f32 %v1615_v39, %v1463_v46  ;;  %v5308_v13 = vpop.f32.mrb[116].mxu0 }
 0x1ed   : > { %v5309_v28 = vpop.f32.mrb[117].mxu0  ;;  %v1620_v7 = vpop.f32.mrb[116].mxu1 }
 0x1ee   : > { %v5310_v10 = vadd.f32 %v5309_v28, %v5308_v13  ;;  %v5311_v29 = vpop.f32.mrb[118].mxu0  ;;  %v5940_v1 = vpop.f32.mrb[117].mxu1 }
 0x1ef   : > { %v5312_v8 = vpop.f32.mrb[119].mxu0  ;;  %v1623_v22 = vpop.f32.mrb[118].mxu1 }
 0x1f0   : > { %v1468_v11 = vadd.f32 %v5310_v10, %v7343_v57  ;;  %v5313_v63 = vadd.f32 %v5312_v8, %v5311_v29  ;;  %v5941_v51 = vpop.f32.mrb[119].mxu1 }
 0x1f2   : > { %v7513_v45 = vadd.f32 %v1620_v7, %v1468_v11  ;;  %v1471_v54 = vadd.f32 %v5313_v63, %v1176_v30  ;;  %v7528_v7 = vld [vmem:[%s8648_s3] ss:$0 sm:$0xff] }
 0x1f4   : > { %v7515_v12 = vadd.f32 %v1623_v22, %v1471_v54  ;;  %v5353_v36 = vpop.f32.mrb[120].mxu0  ;;  %v7535_v54 = vld [vmem:[%s8649_s4] ss:$0 sm:$0xff] }
 0x1f5   : > { %v5354_v27 = vpop.f32.mrb[121].mxu0  ;;  %v2007_v33 = vpop.f32.mrb[120].mxu1 }
 0x1f6   : > { %v5355_v60 = vadd.f32 %v5354_v27, %v5353_v36  ;;  %v5356_v4 = vpop.f32.mrb[122].mxu0  ;;  %v5960_v57 = vpop.f32.mrb[121].mxu1 }
 0x1f7   : > { %v5357_v15 = vpop.f32.mrb[123].mxu0  ;;  %v2010_v23 = vpop.f32.mrb[122].mxu1 }
 0x1f8   : > { %v7517_v18 = vadd.f32 %v5355_v60, %v2007_v33  ;;  %v5358_v6 = vadd.f32 %v5357_v15, %v5356_v4  ;;  %v5961_v61 = vpop.f32.mrb[123].mxu1  ;;  %v6216_v33 = vpop.permute.xlu1 %6215 }
 0x1fa   : > { %v2011_v44 = vadd.f32 %v5358_v6, %v2010_v23  ;;  %v2126_v5 = vrot.slane %v7517_v18, 2 }
 0x1fc   : > { %v2127_v32 = vrot.slane %v2011_v44, 2  ;;  %v5359_v39 = vpop.f32.mrb[124].mxu0 }
 0x1fd   : > { %v5360_v3 = vpop.f32.mrb[125].mxu0  ;;  %v2015_v25 = vpop.f32.mrb[124].mxu1 }
 0x1fe   : > { %v2185_v21 = vsel %vm2156_vm2, %v2126_v5, %v2127_v32  ;;  %v5361_v46 = vadd.f32 %v5360_v3, %v5359_v39  ;;  %v5362_v13 = vpop.f32.mrb[126].mxu0  ;;  %v5964_v28 = vpop.f32.mrb[125].mxu1 }
 0x1ff   : > { %v2187_v10 = vadd.f32 %v2185_v21, %v7358_v9  ;;  %v5363_v29 = vpop.f32.mrb[127].mxu0  ;;  %v2018_v1 = vpop.f32.mrb[126].mxu1  ;;  %v6218_v21 = vunpack.i.h.bf16 %v6216_v33  ;;  %v6217_v28 = vunpack.i.l.bf16 %v6216_v33 }
 0x200   : > { %v2016_v8 = vadd.f32 %v5361_v46, %v2015_v25  ;;  %v5364_v22 = vadd.f32 %v5363_v29, %v5362_v13  ;;  %v5965_v11 = vpop.f32.mrb[127].mxu1 }
 0x201   : > { %v2224_v63 = vmul.f32 %v7528_v7, %v2187_v10 }
 0x202   : > { %v2128_v51 = vrot.slane %v2016_v8, 2  ;;  %v2019_v30 = vadd.f32 %v5364_v22, %v2018_v1 }
 0x203   : > { %v2261_v4 = vadd.f32 %v7535_v54, %v2224_v63 }
 0x204   : > { %v2184_v36 = vsel %vm2156_vm2, %v2127_v32, %v2128_v51  ;;  %v2129_v27 = vrot.slane %v2019_v30, 2  ;;  %v5365_v9 = vpop.f32.mrb[128].mxu0 }
 0x205   : > { %v2188_v60 = vadd.f32 %v2184_v36, %v7365_v20  ;;  %v5366_v57 = vpop.f32.mrb[129].mxu0  ;;  %v2023_v15 = vpop.f32.mrb[128].mxu1  ;;  %v2291_v29 = vmax.f32 %v2261_v4, 0.0 }
 0x206   : > { %v2183_v23 = vsel %vm2156_vm2, %v2128_v51, %v2129_v27  ;;  %v5367_v6 = vadd.f32 %v5366_v57, %v5365_v9  ;;  %v5368_v61 = vpop.f32.mrb[130].mxu0  ;;  %v5968_v44 = vpop.f32.mrb[129].mxu1 }
 0x207   : > { %v2189_v39 = vadd.f32 %v2183_v23, %v7369_v53  ;;  %v2225_v3 = vmul.f32 %v7528_v7, %v2188_v60  ;;  %v5369_v32 = vpop.f32.mrb[131].mxu0  ;;  %v2026_v25 = vpop.f32.mrb[130].mxu1  ;;  %v2501_v36 = vmul.f32 %v6217_v28, %v2291_v29 }
 0x208   : > { %v2024_v46 = vadd.f32 %v5367_v6, %v2023_v15  ;;  %v5370_v13 = vadd.f32 %v5369_v32, %v5368_v61  ;;  %v5969_v20 = vpop.f32.mrb[131].mxu1  ;;  %v6205_v51 = vpop.permute.xlu0 %6204 }
 0x209   : > { %v2262_v10 = vadd.f32 %v7535_v54, %v2225_v3  ;;  %v2226_v1 = vmul.f32 %v7528_v7, %v2189_v39 }
 0x20a   : > { %v2130_v8 = vrot.slane %v2024_v46, 2  ;;  %v2027_v22 = vadd.f32 %v5370_v13, %v2026_v25  ;;  %v6207_v25 = vunpack.i.h.bf16 %v6205_v51  ;;  %v6206_v13 = vunpack.i.l.bf16 %v6205_v51 }
 0x20b   : > { %v2292_v11 = vmax.f32 %v2262_v10, 0.0  ;;  %v2263_v33 = vadd.f32 %v7535_v54, %v2226_v1 }
 0x20c   : > { %v2182_v53 = vsel %vm2156_vm2, %v2129_v27, %v2130_v8  ;;  %v2131_v63 = vrot.slane %v2027_v22, 2  ;;  %v5371_v30 = vpop.f32.mrb[132].mxu0 }
 0x20d   : > { %v2502_v9 = vmul.f32 %v6218_v21, %v2292_v11  ;;  %v2190_v60 = vadd.f32 %v2182_v53, %v7376_v49  ;;  %v5372_v57 = vpop.f32.mrb[133].mxu0  ;;  %v2031_v15 = vpop.f32.mrb[132].mxu1  ;;  %v2293_v28 = vmax.f32 %v2263_v33, 0.0 }
 0x20e   : > { %v2181_v4 = vsel %vm2156_vm2, %v2130_v8, %v2131_v63  ;;  %v5373_v23 = vadd.f32 %v5372_v57, %v5371_v30  ;;  %v5374_v6 = vpop.f32.mrb[134].mxu0  ;;  %v5972_v61 = vpop.f32.mrb[133].mxu1 }
 0x20f   : > { %v7553_v44 = vpack.c.bf16 %v2502_v9, %v2501_v36  ;;  %v2191_v27 = vadd.f32 %v2181_v4, %v7389_v43  ;;  %v2227_v39 = vmul.f32 %v7528_v7, %v2190_v60  ;;  %v5375_v3 = vpop.f32.mrb[135].mxu0  ;;  %v2034_v32 = vpop.f32.mrb[134].mxu1  ;;  %v2503_v30 = vmul.f32 %v6206_v13, %v2293_v28 }
 0x210   : > { %v2032_v49 = vadd.f32 %v5373_v23, %v2031_v15  ;;  %v5376_v21 = vadd.f32 %v5375_v3, %v5374_v6  ;;  %v5973_v46 = vpop.f32.mrb[135].mxu1  ;;  %v6210_v11 = vpop.permute.xlu0 %6209 }
 0x211   : > { %v2264_v20 = vadd.f32 %v7535_v54, %v2227_v39  ;;  %v2228_v10 = vmul.f32 %v7528_v7, %v2191_v27  ;;  %v6212_v3 = vunpack.i.h.bf16 %v6210_v11 }
 0x212   : > { %v2132_v29 = vrot.slane %v2032_v49, 2  ;;  %v2035_v1 = vadd.f32 %v5376_v21, %v2034_v32  ;;  %v6211_v49 = vunpack.i.l.bf16 %v6210_v11 }
 0x213   : > { %v2294_v8 = vmax.f32 %v2264_v20, 0.0  ;;  %v2265_v51 = vadd.f32 %v7535_v54, %v2228_v10 }
 0x214   : > { %v2180_v43 = vsel %vm2156_vm2, %v2131_v63, %v2132_v29  ;;  %v2133_v22 = vrot.slane %v2035_v1, 2  ;;  %v5377_v53 = vpop.f32.mrb[136].mxu0  ;;  %v6221_v1 = vpop.permute.xlu1 %6220 }
 0x215   : > { %v2504_v36 = vmul.f32 %v6207_v25, %v2294_v8  ;;  %v2192_v9 = vadd.f32 %v2180_v43, %v7393_v42  ;;  %v5378_v60 = vpop.f32.mrb[137].mxu0  ;;  %v2039_v57 = vpop.f32.mrb[136].mxu1  ;;  %v2295_v46 = vmax.f32 %v2265_v51, 0.0 }
 0x216   : > { %v2179_v33 = vsel %vm2156_vm2, %v2132_v29, %v2133_v22  ;;  %v5379_v15 = vadd.f32 %v5378_v60, %v5377_v53  ;;  %v5380_v4 = vpop.f32.mrb[138].mxu0  ;;  %v5976_v23 = vpop.f32.mrb[137].mxu1  ;;  %v6223_v60 = vunpack.i.h.bf16 %v6221_v1 }
 0x217   : > { %v7565_v6 = vpack.c.bf16 %v2504_v36, %v2503_v30  ;;  %v2193_v63 = vadd.f32 %v2179_v33, %v7408_v19  ;;  %v2229_v61 = vmul.f32 %v7528_v7, %v2192_v9  ;;  %v5381_v27 = vpop.f32.mrb[139].mxu0  ;;  %v2042_v39 = vpop.f32.mrb[138].mxu1  ;;  %v2505_v43 = vmul.f32 %v6211_v49, %v2295_v46 }
 0x218   : > { %v2040_v42 = vadd.f32 %v5379_v15, %v2039_v57  ;;  %v5382_v32 = vadd.f32 %v5381_v27, %v5380_v4  ;;  %v5977_v25 = vpop.f32.mrb[139].mxu1  ;;  %v6222_v23 = vunpack.i.l.bf16 %v6221_v1  ;;  %v6226_v1 = vpop.permute.xlu0 %6225 }
 0x219   : > { %v2266_v21 = vadd.f32 %v7535_v54, %v2229_v61  ;;  %v2230_v13 = vmul.f32 %v7528_v7, %v2193_v63 }
 0x21a   : > { %v2134_v20 = vrot.slane %v2040_v42, 2  ;;  %v2043_v28 = vadd.f32 %v5382_v32, %v2042_v39  ;;  %v2560_v42 = vrot.slane %v7565_v6, 4 }
 0x21b   : > { %v2296_v10 = vmax.f32 %v2266_v21, 0.0  ;;  %v2267_v11 = vadd.f32 %v7535_v54, %v2230_v13 }
 0x21c   : > { %v2178_v19 = vsel %vm2156_vm2, %v2133_v22, %v2134_v20  ;;  %v2135_v29 = vrot.slane %v2043_v28, 2  ;;  %v5383_v8 = vpop.f32.mrb[140].mxu0  ;;  %v7591_v28 = vld [vmem:[%s8650_s5 + $0x148] sm:$0xff]  }
 0x21d   : > { %v2506_v53 = vmul.f32 %v6212_v3, %v2296_v10  ;;  %v2194_v30 = vadd.f32 %v2178_v19, %v7411_v17  ;;  %v5384_v36 = vpop.f32.mrb[141].mxu0  ;;  %v2047_v9 = vpop.f32.mrb[140].mxu1  ;;  %v2297_v25 = vmax.f32 %v2267_v11, 0.0 }
 0x21e   : > { %v2177_v51 = vsel %vm2156_vm2, %v2134_v20, %v2135_v29  ;;  %v5385_v57 = vadd.f32 %v5384_v36, %v5383_v8  ;;  %v5386_v33 = vpop.f32.mrb[142].mxu0  ;;  %v5980_v15 = vpop.f32.mrb[141].mxu1 }
 0x21f   : > { %v7577_v4 = vpack.c.bf16 %v2506_v53, %v2505_v43  ;;  %v2195_v22 = vadd.f32 %v2177_v51, %v7429_v38  ;;  %v2231_v63 = vmul.f32 %v7528_v7, %v2194_v30  ;;  %v5387_v61 = vpop.f32.mrb[143].mxu0  ;;  %v2050_v17 = vpop.f32.mrb[142].mxu1  ;;  %v2507_v43 = vmul.f32 %v6222_v23, %v2297_v25 }
 0x220   : > { %v2048_v27 = vadd.f32 %v5385_v57, %v2047_v9  ;;  %v5388_v39 = vadd.f32 %v5387_v61, %v5386_v33  ;;  %v5981_v3 = vpop.f32.mrb[143].mxu1  ;;  %v6228_v61 = vunpack.i.h.bf16 %v6226_v1 }
 0x221   : > { %v2268_v32 = vadd.f32 %v7535_v54, %v2231_v63  ;;  %v2232_v49 = vmul.f32 %v7528_v7, %v2195_v22  ;;  %v2561_v21 = vrot.slane %v7577_v4, 4  ;;  %v7610_v63 = vld [vmem:[%s8650_s5 + $0x150] sm:$0xff]  }
 0x222   : > { %v2136_v46 = vrot.slane %v2048_v27, 2  ;;  %v2051_v38 = vadd.f32 %v5388_v39, %v2050_v17  ;;  %v6227_v17 = vunpack.i.l.bf16 %v6226_v1 }
 0x223   : > { %v2298_v13 = vmax.f32 %v2268_v32, 0.0  ;;  %v7586_v20 = vsel %vm2559_vm3, %v2560_v42, %v2561_v21  ;;  %v2269_v11 = vadd.f32 %v7535_v54, %v2232_v49 }
 0x224   : > { %v2176_v10 = vsel %vm2156_vm2, %v2135_v29, %v2136_v46  ;;  %v2137_v19 = vrot.slane %v2051_v38, 2  ;;  %v5389_v8 = vpop.f32.mrb[144].mxu0  ;;  %2821 = vmatprep.mubr.bf16.mxu0 %v7586_v20 }
 0x225   : > { %v2508_v53 = vmul.f32 %v6223_v60, %v2298_v13  ;;  %v2196_v30 = vadd.f32 %v2176_v10, %v7432_v48  ;;  %v5390_v36 = vpop.f32.mrb[145].mxu0  ;;  %v2055_v9 = vpop.f32.mrb[144].mxu1  ;;  %2822 = vmatmul.mubr.bf16.vlgmr.msra.gmra.mrb[180].mxu0 %v7553_v44  ;;  %v2299_v32 = vmax.f32 %v2269_v11, 0.0  ;;  %v7624_v10 = vld [vmem:[%s8650_s5 + $0x158] sm:$0xff]  }
 0x226   : > { %v2175_v51 = vsel %vm2156_vm2, %v2136_v46, %v2137_v19  ;;  %v5391_v57 = vadd.f32 %v5390_v36, %v5389_v8  ;;  %v5392_v29 = vpop.f32.mrb[146].mxu0  ;;  %v5984_v33 = vpop.f32.mrb[145].mxu1  ;;  %6059 = vmatpush3.bf16.msra.mxu0 %v7488_v56 }
 0x227   : > { %v7602_v15 = vpack.c.bf16 %v2508_v53, %v2507_v43  ;;  %v2197_v60 = vadd.f32 %v2175_v51, %v7441_v34  ;;  %v2233_v48 = vmul.f32 %v7528_v7, %v2196_v30  ;;  %v5393_v22 = vpop.f32.mrb[147].mxu0  ;;  %v2058_v23 = vpop.f32.mrb[146].mxu1  ;;  %6060 = vmatprep.subr.bf16.mxu0 %v7591_v28  ;;  %v2509_v30 = vmul.f32 %v6227_v17, %v2299_v32  ;;  %v6411_v17 = vld [vmem:[%s8650_s5 + $0x108] sm:$0xff]  }
 0x228   : > { %v2056_v27 = vadd.f32 %v5391_v57, %v2055_v9  ;;  %v5394_v39 = vadd.f32 %v5393_v22, %v5392_v29  ;;  %v5985_v3 = vpop.f32.mrb[147].mxu1  ;;  %v6231_v43 = vpop.permute.xlu1 %6230 }
 0x229   : > { %v2270_v42 = vadd.f32 %v7535_v54, %v2233_v48  ;;  %6034 = vmatprep.mubr.bf16.mxu1 %v7602_v15  ;;  %v2234_v34 = vmul.f32 %v7528_v7, %v2197_v60  ;;  %v2563_v25 = vrot.slane %v7602_v15, 4  ;;  %v6410_v60 = vld [vmem:[%s8650_s5 + $0xc0] sm:$0xff]   ;;  %v6232_v3 = vunpack.i.l.bf16 %v6231_v43 }
 0x22a   : > { %v2138_v49 = vrot.slane %v2056_v27, 2  ;;  %v2059_v46 = vadd.f32 %v5394_v39, %v2058_v23  ;;  %6061 = vmatpush3.bf16.msra.mxu0 %v7591_v28  ;;  %v7649_v27 = vld [vmem:[%s8650_s5 + $0x160] sm:$0xff]   ;;  %v6233_v39 = vunpack.i.h.bf16 %v6231_v43 }
 0x22b   : > { %v2300_v38 = vmax.f32 %v2270_v42, 0.0  ;;  %v7618_v13 = vsel %vm2559_vm3, %v2561_v21, %v2563_v25  ;;  %6062 = vmatprep.subr.bf16.mxu0 %v7610_v63  ;;  %v2271_v36 = vadd.f32 %v7535_v54, %v2234_v34 }
 0x22c   : > { %v2174_v1 = vsel %vm2156_vm2, %v2137_v19, %v2138_v49  ;;  %v2139_v8 = vrot.slane %v2059_v46, 2  ;;  %v5395_v53 = vpop.f32.mrb[148].mxu0  ;;  %2829 = vmatprep.mubr.bf16.mxu0 %v7618_v13 }
 0x22d   : > { %v2510_v11 = vmul.f32 %v6228_v61, %v2300_v38  ;;  %v2198_v21 = vadd.f32 %v2174_v1, %v7444_v41  ;;  %v5396_v9 = vpop.f32.mrb[149].mxu0  ;;  %v2063_v51 = vpop.f32.mrb[148].mxu1  ;;  %2830 = vmatmul.mubr.bf16.gmra.mrb[184].mxu0 %v7565_v6 }
 0x22e   : > { %v2173_v57 = vsel %vm2156_vm2, %v2138_v49, %v2139_v8  ;;  %v5397_v29 = vadd.f32 %v5396_v9, %v5395_v53  ;;  %v5398_v19 = vpop.f32.mrb[150].mxu0  ;;  %v5988_v33 = vpop.f32.mrb[149].mxu1  ;;  %6063 = vmatpush3.bf16.msra.mxu0 %v7610_v63  ;;  %v2301_v49 = vmax.f32 %v2271_v36, 0.0 }
 0x22f   : > { %v7638_v48 = vpack.c.bf16 %v2510_v11, %v2509_v30  ;;  %v2199_v41 = vadd.f32 %v2173_v57, %v7450_v47  ;;  %v2235_v22 = vmul.f32 %v7528_v7, %v2198_v21  ;;  %v5399_v23 = vpop.f32.mrb[151].mxu0  ;;  %v2066_v61 = vpop.f32.mrb[150].mxu1  ;;  %6064 = vmatprep.subr.bf16.mxu0 %v7624_v10  ;;  %v6412_v30 = vld [vmem:[%s8650_s5 + $0xc8] sm:$0xff]   ;;  %v6414_v21 = vld [vmem:[%s8650_s5 + $0x110] sm:$0xff]  }
 0x230   : > { %v2064_v42 = vadd.f32 %v5397_v29, %v2063_v51  ;;  %v5400_v32 = vadd.f32 %v5399_v23, %v5398_v19  ;;  %v5989_v47 = vpop.f32.mrb[151].mxu1  ;;  %v6236_v51 = vpop.permute.xlu0 %6235  ;;  %v2511_v29 = vmul.f32 %v6232_v3, %v2301_v49  ;;  %v6415_v3 = vld [vmem:[%s8650_s5 + $0xd0] sm:$0xff]  }
 0x231   : > { %v2272_v34 = vadd.f32 %v7535_v54, %v2235_v22  ;;  %6035 = vmatmul.mubr.bf16.vlgmr.msra.gmra.mrb[180].mxu1 %v7638_v48  ;;  %v2236_v46 = vmul.f32 %v7528_v7, %v2199_v41  ;;  %v2565_v38 = vrot.slane %v7638_v48, 4  ;;  %v7693_v49 = vld [vmem:[%s8650_s5 + $0x170] sm:$0xff]  }
 0x232   : > { %v2140_v1 = vrot.slane %v2064_v42, 2  ;;  %v2067_v53 = vadd.f32 %v5400_v32, %v2066_v61  ;;  %5575 = vmatpush3.bf16.msra.mxu1 %v6410_v60  ;;  %6065 = vmatpush3.bf16.msra.mxu0 %v7624_v10 }
 0x233   : > { %v2302_v43 = vmax.f32 %v2272_v34, 0.0  ;;  %v7660_v11 = vsel %vm2559_vm3, %v2563_v25, %v2565_v38  ;;  %5576 = vmatprep.subr.bf16.mxu1 %v6411_v17  ;;  %6066 = vmatprep.subr.bf16.mxu0 %v7649_v27  ;;  %v7672_v25 = vld [vmem:[%s8650_s5 + $0x168] sm:$0xff]   ;;  %v2273_v60 = vadd.f32 %v7535_v54, %v2236_v46  ;;  %v6416_v34 = vld [vmem:[%s8650_s5 + $0x118] sm:$0xff]   ;;  %v6238_v46 = vunpack.i.h.bf16 %v6236_v51 }
 0x234   : > { %v2172_v36 = vsel %vm2156_vm2, %v2139_v8, %v2140_v1  ;;  %v2141_v9 = vrot.slane %v2067_v53, 2  ;;  %v5401_v57 = vpop.f32.mrb[152].mxu0  ;;  %2837 = vmatprep.mubr.bf16.mxu0 %v7660_v11 }
 0x235   : > { %v2512_v19 = vmul.f32 %v6233_v39, %v2302_v43  ;;  %v2200_v33 = vadd.f32 %v2172_v36, %v7453_v26  ;;  %v5402_v41 = vpop.f32.mrb[153].mxu0  ;;  %v2071_v22 = vpop.f32.mrb[152].mxu1  ;;  %2838 = vmatmul.mubr.bf16.gmra.mrb[188].mxu0 %v7577_v4  ;;  %v2303_v36 = vmax.f32 %v2273_v60, 0.0  ;;  %v6419_v60 = vld [vmem:[%s8650_s5 + $0x120] sm:$0xff]  }
 0x236   : > { %v2171_v8 = vsel %vm2156_vm2, %v2140_v1, %v2141_v9  ;;  %v5403_v23 = vadd.f32 %v5402_v41, %v5401_v57  ;;  %v5404_v61 = vpop.f32.mrb[154].mxu0  ;;  %v5992_v17 = vpop.f32.mrb[153].mxu1  ;;  %5577 = vmatpush3.bf16.msra.mxu1 %v6412_v30  ;;  %6067 = vmatpush3.bf16.msra.mxu0 %v7649_v27  ;;  %v6237_v1 = vunpack.i.l.bf16 %v6236_v51  ;;  %v6417_v51 = vld [vmem:[%s8650_s5 + $0xd8] sm:$0xff]  }
 0x237   : > { %v7683_v26 = vpack.c.bf16 %v2512_v19, %v2511_v29  ;;  %v2201_v39 = vadd.f32 %v2171_v8, %v7456_v55  ;;  %v2237_v42 = vmul.f32 %v7528_v7, %v2200_v33  ;;  %v5405_v32 = vpop.f32.mrb[155].mxu0  ;;  %v2074_v47 = vpop.f32.mrb[154].mxu1  ;;  %5578 = vmatprep.subr.bf16.mxu1 %v6414_v21  ;;  %6068 = vmatprep.subr.bf16.mxu0 %v7672_v25 }
 0x238   : > { %v2072_v53 = vadd.f32 %v5403_v23, %v2071_v22  ;;  %v5406_v30 = vadd.f32 %v5405_v32, %v5404_v61  ;;  %v5993_v43 = vpop.f32.mrb[155].mxu1  ;;  %v6241_v23 = vpop.permute.xlu1 %6240  ;;  %v2513_v17 = vmul.f32 %v6237_v1, %v2303_v36  ;;  %v6420_v1 = vld [vmem:[%s8650_s5 + $0xe0] sm:$0xff]  }
 0x239   : > { %v2274_v55 = vadd.f32 %v7535_v54, %v2237_v42  ;;  %6038 = vmatprep.mubr.bf16.mxu1 %v7683_v26  ;;  %v2238_v21 = vmul.f32 %v7528_v7, %v2201_v39  ;;  %v2567_v57 = vrot.slane %v7683_v26, 4 }
 0x23a   : > { %v2142_v29 = vrot.slane %v2072_v53, 2  ;;  %v2075_v19 = vadd.f32 %v5406_v30, %v2074_v47  ;;  %5579 = vmatpush3.bf16.msra.mxu1 %v6415_v3  ;;  %6069 = vmatpush3.bf16.msra.mxu0 %v7672_v25 }
 0x23b   : > { %v2304_v33 = vmax.f32 %v2274_v55, 0.0  ;;  %v7705_v41 = vsel %vm2559_vm3, %v2565_v38, %v2567_v57  ;;  %5580 = vmatprep.subr.bf16.mxu1 %v6416_v34  ;;  %6070 = vmatprep.subr.bf16.mxu0 %v7693_v49  ;;  %v7717_v38 = vld [vmem:[%s8650_s5 + $0x178] sm:$0xff]   ;;  %v2275_v42 = vadd.f32 %v7535_v54, %v2238_v21  ;;  %v6421_v21 = vld [vmem:[%s8650_s5 + $0x128] sm:$0xff]  }
 0x23c   : > { %v2170_v22 = vsel %vm2156_vm2, %v2141_v9, %v2142_v29  ;;  %v2143_v8 = vrot.slane %v2075_v19, 2  ;;  %v5407_v61 = vpop.f32.mrb[156].mxu0  ;;  %2845 = vmatprep.mubr.bf16.mxu0 %v7705_v41  ;;  %v6243_v19 = vunpack.i.h.bf16 %v6241_v23 }
 0x23d   : > { %v2514_v3 = vmul.f32 %v6238_v46, %v2304_v33  ;;  %v2202_v39 = vadd.f32 %v2170_v22, %v7459_v40  ;;  %v5408_v32 = vpop.f32.mrb[157].mxu0  ;;  %v2079_v47 = vpop.f32.mrb[156].mxu1  ;;  %2846 = vmatmul.mubr.bf16.gmra.mrb[192].mxu0 %v7602_v15 }
 0x23e   : > { %v2169_v9 = vsel %vm2156_vm2, %v2142_v29, %v2143_v8  ;;  %v5409_v34 = vadd.f32 %v5408_v32, %v5407_v61  ;;  %v5410_v53 = vpop.f32.mrb[158].mxu0  ;;  %v5996_v30 = vpop.f32.mrb[157].mxu1  ;;  %5581 = vmatpush3.bf16.msra.mxu1 %v6417_v51  ;;  %6071 = vmatpush3.bf16.msra.mxu0 %v7693_v49  ;;  %v6432_v29 = vld [vmem:[%s8650_s5 + $0x1c0] sm:$0xff]   ;;  %v6242_v51 = vunpack.i.l.bf16 %v6241_v23  ;;  %v6423_v23 = vld [vmem:[%s8650_s5 + $0xe8] sm:$0xff]  }
 0x23f   : > { %v7728_v40 = vpack.c.bf16 %v2514_v3, %v2513_v17  ;;  %v2203_v46 = vadd.f32 %v2169_v9, %v7462_v50  ;;  %v2239_v43 = vmul.f32 %v7528_v7, %v2202_v39  ;;  %v5411_v55 = vpop.f32.mrb[159].mxu0  ;;  %v2082_v36 = vpop.f32.mrb[158].mxu1  ;;  %5582 = vmatprep.subr.bf16.mxu1 %v6419_v60  ;;  %6072 = vmatprep.subr.bf16.mxu0 %v7717_v38  ;;  %v2305_v60 = vmax.f32 %v2275_v42, 0.0  ;;  %v6425_v42 = vld [vmem:[%s8650_s5 + $0x130] sm:$0xff]  }
 0x240   : > { %v2080_v33 = vadd.f32 %v5409_v34, %v2079_v47  ;;  %v5412_v22 = vadd.f32 %v5411_v55, %v5410_v53  ;;  %v5997_v61 = vpop.f32.mrb[159].mxu1 }
 0x241   : > { %v2240_v50 = vmul.f32 %v7528_v7, %v2203_v46  ;;  %v2276_v17 = vadd.f32 %v7535_v54, %v2239_v43  ;;  %6039 = vmatmul.mubr.bf16.gmra.mrb[184].mxu1 %v7728_v40  ;;  %v2569_v3 = vrot.slane %v7728_v40, 4  ;;  %v2515_v46 = vmul.f32 %v6242_v51, %v2305_v60 }
 0x242   : > { %v2144_v39 = vrot.slane %v2080_v33, 2  ;;  %v2083_v32 = vadd.f32 %v5412_v22, %v2082_v36  ;;  %5583 = vmatpush3.bf16.msra.mxu1 %v6420_v1  ;;  %6073 = vmatpush3.bf16.msra.mxu0 %v7717_v38  ;;  %v6426_v22 = vld [vmem:[%s8650_s5 + $0xf0] sm:$0xff]  }
 0x243   : > { %v2306_v47 = vmax.f32 %v2276_v17, 0.0  ;;  %v7748_v9 = vsel %vm2559_vm3, %v2567_v57, %v2569_v3  ;;  %5584 = vmatprep.subr.bf16.mxu1 %v6421_v21  ;;  %5682 = vmatprep.subr.bf16.mxu0 %v6432_v29  ;;  %v2277_v1 = vadd.f32 %v7535_v54, %v2240_v50  ;;  %v6428_v17 = vld [vmem:[%s8650_s5 + $0x138] sm:$0xff]  }
 0x244   : > { %v2168_v34 = vsel %vm2156_vm2, %v2143_v8, %v2144_v39  ;;  %v2145_v53 = vrot.slane %v2083_v32, 2  ;;  %v5413_v30 = vpop.f32.mrb[160].mxu0  ;;  %2853 = vmatprep.mubr.bf16.mxu0 %v7748_v9 }
 0x245   : > { %v2516_v43 = vmul.f32 %v6243_v19, %v2306_v47  ;;  %v2204_v57 = vadd.f32 %v2168_v34, %v7465_v16  ;;  %v5414_v55 = vpop.f32.mrb[161].mxu0  ;;  %v2087_v36 = vpop.f32.mrb[160].mxu1  ;;  %2854 = vmatmul.mubr.bf16.gmra.mrb[196].mxu0 %v7638_v48 }
 0x246   : > { %v2167_v21 = vsel %vm2156_vm2, %v2144_v39, %v2145_v53  ;;  %v5415_v29 = vadd.f32 %v5414_v55, %v5413_v30  ;;  %v5416_v33 = vpop.f32.mrb[162].mxu0  ;;  %v6000_v8 = vpop.f32.mrb[161].mxu1  ;;  %5585 = vmatpush3.bf16.msra.mxu1 %v6423_v23  ;;  %v2307_v23 = vmax.f32 %v2277_v1, 0.0 }
 0x247   : > { %v7764_v61 = vpack.c.bf16 %v2516_v43, %v2515_v46  ;;  %v2241_v19 = vmul.f32 %v7528_v7, %v2204_v57  ;;  %v2205_v16 = vadd.f32 %v2167_v21, %v7468_v0  ;;  %v5417_v51 = vpop.f32.mrb[163].mxu0  ;;  %v2090_v50 = vpop.f32.mrb[162].mxu1  ;;  %5586 = vmatprep.subr.bf16.mxu1 %v6425_v42  ;;  %v6430_v42 = vld [vmem:[%s8650_s5 + $0xf8] sm:$0xff]  }
 0x248   : > { %v2088_v60 = vadd.f32 %v5415_v29, %v2087_v36  ;;  %v5418_v39 = vadd.f32 %v5417_v51, %v5416_v33  ;;  %v6001_v32 = vpop.f32.mrb[163].mxu1  ;;  %v6246_v0 = vpop.permute.xlu0 %6245 }
 0x249   : > { %v2278_v47 = vadd.f32 %v7535_v54, %v2241_v19  ;;  %v2242_v34 = vmul.f32 %v7528_v7, %v2205_v16  ;;  %6042 = vmatprep.mubr.bf16.mxu1 %v7764_v61  ;;  %v2571_v30 = vrot.slane %v7764_v61, 4  ;;  %v6248_v57 = vunpack.i.h.bf16 %v6246_v0 }
 0x24a   : > { %v2146_v46 = vrot.slane %v2088_v60, 2  ;;  %v2091_v43 = vadd.f32 %v5418_v39, %v2090_v50  ;;  %5587 = vmatpush3.bf16.msra.mxu1 %v6426_v22  ;;  %v6247_v55 = vunpack.i.l.bf16 %v6246_v0 }
 0x24b   : > { %v2308_v36 = vmax.f32 %v2278_v47, 0.0  ;;  %v7779_v1 = vsel %vm2559_vm3, %v2569_v3, %v2571_v30  ;;  %5588 = vmatprep.subr.bf16.mxu1 %v6428_v17  ;;  %v2279_v19 = vadd.f32 %v7535_v54, %v2242_v34 }
 0x24c   : > { %v2166_v21 = vsel %vm2156_vm2, %v2145_v53, %v2146_v46  ;;  %v2147_v29 = vrot.slane %v2091_v43, 2  ;;  %v5419_v33 = vpop.f32.mrb[164].mxu0  ;;  %2861 = vmatprep.mubr.bf16.mxu0 %v7779_v1  ;;  %v2517_v8 = vmul.f32 %v6247_v55, %v2307_v23 }
 0x24d   : > { %v2518_v22 = vmul.f32 %v6248_v57, %v2308_v36  ;;  %v2206_v16 = vadd.f32 %v2166_v21, %v7471_v52  ;;  %v5420_v51 = vpop.f32.mrb[165].mxu0  ;;  %v2095_v50 = vpop.f32.mrb[164].mxu1  ;;  %2862 = vmatmul.mubr.bf16.gmra.mrb[200].mxu0 %v7683_v26  ;;  %v2309_v57 = vmax.f32 %v2279_v19, 0.0 }
 0x24e   : > { %v2165_v3 = vsel %vm2156_vm2, %v2146_v46, %v2147_v29  ;;  %v5421_v17 = vadd.f32 %v5420_v51, %v5419_v33  ;;  %v5422_v60 = vpop.f32.mrb[166].mxu0  ;;  %v6004_v53 = vpop.f32.mrb[165].mxu1  ;;  %5589 = vmatpush3.bf16.msra.mxu1 %v6430_v42 }
 0x24f   : > { %v7789_v39 = vpack.c.bf16 %v2518_v22, %v2517_v8  ;;  %v2243_v32 = vmul.f32 %v7528_v7, %v2206_v16  ;;  %v2207_v23 = vadd.f32 %v2165_v3, %v7474_v59  ;;  %v5423_v47 = vpop.f32.mrb[167].mxu0  ;;  %v2098_v34 = vpop.f32.mrb[166].mxu1  ;;  %6138 = vmatprep.subr.bf16.mxu1 %v7488_v56 }
 0x250   : > { %v2096_v52 = vadd.f32 %v5421_v17, %v2095_v50  ;;  %v5424_v0 = vadd.f32 %v5423_v47, %v5422_v60  ;;  %v6005_v43 = vpop.f32.mrb[167].mxu1  ;;  %v6251_v36 = vpop.permute.xlu1 %6250 }
 0x251   : > { %v2280_v46 = vadd.f32 %v7535_v54, %v2243_v32  ;;  %v2244_v55 = vmul.f32 %v7528_v7, %v2207_v23  ;;  %6043 = vmatmul.mubr.bf16.gmra.mrb[188].mxu1 %v7789_v39  ;;  %v2573_v42 = vrot.slane %v7789_v39, 4  ;;  %v6253_v59 = vunpack.i.h.bf16 %v6251_v36 }
 0x252   : > { %v2148_v21 = vrot.slane %v2096_v52, 2  ;;  %v2099_v33 = vadd.f32 %v5424_v0, %v2098_v34  ;;  %v6252_v8 = vunpack.i.l.bf16 %v6251_v36 }
 0x253   : > { %v2310_v22 = vmax.f32 %v2280_v46, 0.0  ;;  %v7799_v56 = vsel %vm2559_vm3, %v2571_v30, %v2573_v42  ;;  %v2281_v17 = vadd.f32 %v7535_v54, %v2244_v55 }
 0x254   : > { %v2164_v19 = vsel %vm2156_vm2, %v2147_v29, %v2148_v21  ;;  %v2149_v16 = vrot.slane %v2099_v33, 2  ;;  %v5425_v51 = vpop.f32.mrb[168].mxu0  ;;  %2869 = vmatprep.mubr.bf16.mxu0 %v7799_v56  ;;  %v2519_v50 = vmul.f32 %v6252_v8, %v2309_v57  ;;  %v6256_v8 = vpop.permute.xlu0 %6255 }
 0x255   : > { %v2520_v3 = vmul.f32 %v6253_v59, %v2310_v22  ;;  %v2208_v60 = vadd.f32 %v2164_v19, %v7477_v2  ;;  %v5426_v53 = vpop.f32.mrb[169].mxu0  ;;  %v2103_v32 = vpop.f32.mrb[168].mxu1  ;;  %2870 = vmatmul.mubr.bf16.gmra.mrb[204].mxu0 %v7728_v40  ;;  %v2311_v36 = vmax.f32 %v2281_v17, 0.0 }
 0x256   : > { %v2163_v30 = vsel %vm2156_vm2, %v2148_v21, %v2149_v16  ;;  %v5427_v23 = vadd.f32 %v5426_v53, %v5425_v51  ;;  %v5428_v47 = vpop.f32.mrb[170].mxu0  ;;  %v6008_v29 = vpop.f32.mrb[169].mxu1  ;;  %v6258_v51 = vunpack.i.h.bf16 %v6256_v8 }
 0x257   : > { %v7809_v34 = vpack.c.bf16 %v2520_v3, %v2519_v50  ;;  %v2245_v52 = vmul.f32 %v7528_v7, %v2208_v60  ;;  %v2209_v0 = vadd.f32 %v2163_v30, %v7480_v14  ;;  %v5429_v43 = vpop.f32.mrb[171].mxu0  ;;  %v2106_v57 = vpop.f32.mrb[170].mxu1  ;;  %v6257_v50 = vunpack.i.l.bf16 %v6256_v8 }
 0x258   : > { %v2104_v46 = vadd.f32 %v5427_v23, %v2103_v32  ;;  %v5430_v2 = vadd.f32 %v5429_v43, %v5428_v47  ;;  %v6009_v55 = vpop.f32.mrb[171].mxu1 }
 0x259   : > { %v2282_v33 = vadd.f32 %v7535_v54, %v2245_v52  ;;  %v2246_v59 = vmul.f32 %v7528_v7, %v2209_v0  ;;  %6046 = vmatprep.mubr.bf16.mxu1 %v7809_v34  ;;  %v2575_v21 = vrot.slane %v7809_v34, 4  ;;  %v2521_v32 = vmul.f32 %v6257_v50, %v2311_v36  ;;  %v6261_v50 = vpop.permute.xlu1 %6260 }
 0x25a   : > { %v2150_v22 = vrot.slane %v2104_v46, 2  ;;  %v2107_v19 = vadd.f32 %v5430_v2, %v2106_v57 }
 0x25b   : > { %v2312_v14 = vmax.f32 %v2282_v33, 0.0  ;;  %v7818_v3 = vsel %vm2559_vm3, %v2573_v42, %v2575_v21  ;;  %v2283_v23 = vadd.f32 %v7535_v54, %v2246_v59 }
 0x25c   : > { %v2162_v17 = vsel %vm2156_vm2, %v2149_v16, %v2150_v22  ;;  %v2151_v60 = vrot.slane %v2107_v19, 2  ;;  %v5431_v53 = vpop.f32.mrb[172].mxu0  ;;  %2877 = vmatprep.mubr.bf16.mxu0 %v7818_v3 }
 0x25d   : > { %v2522_v30 = vmul.f32 %v6258_v51, %v2312_v14  ;;  %v2210_v47 = vadd.f32 %v2162_v17, %v7483_v62  ;;  %v5432_v29 = vpop.f32.mrb[173].mxu0  ;;  %v2111_v52 = vpop.f32.mrb[172].mxu1  ;;  %2878 = vmatmul.mubr.bf16.gmra.mrb[208].mxu0 %v7764_v61  ;;  %v2313_v8 = vmax.f32 %v2283_v23, 0.0 }
 0x25e   : > { %v2161_v42 = vsel %vm2156_vm2, %v2150_v22, %v2151_v60  ;;  %v5433_v0 = vadd.f32 %v5432_v29, %v5431_v53  ;;  %v5434_v43 = vpop.f32.mrb[174].mxu0  ;;  %v6012_v16 = vpop.f32.mrb[173].mxu1  ;;  %v6263_v53 = vunpack.i.h.bf16 %v6261_v50 }
 0x25f   : > { %v7828_v57 = vpack.c.bf16 %v2522_v30, %v2521_v32  ;;  %v2247_v46 = vmul.f32 %v7528_v7, %v2210_v47  ;;  %v2211_v2 = vadd.f32 %v2161_v42, %v7495_v31  ;;  %v5435_v55 = vpop.f32.mrb[175].mxu0  ;;  %v2114_v36 = vpop.f32.mrb[174].mxu1  ;;  %v6262_v32 = vunpack.i.l.bf16 %v6261_v50 }
 0x260   : > { %v2112_v33 = vadd.f32 %v5433_v0, %v2111_v52  ;;  %v5436_v62 = vadd.f32 %v5435_v55, %v5434_v43  ;;  %v6013_v59 = vpop.f32.mrb[175].mxu1 }
 0x261   : > { %v2284_v19 = vadd.f32 %v7535_v54, %v2247_v46  ;;  %v2248_v51 = vmul.f32 %v7528_v7, %v2211_v2  ;;  %6047 = vmatmul.mubr.bf16.gmra.mrb[192].mxu1 %v7828_v57  ;;  %v2577_v22 = vrot.slane %v7828_v57, 4  ;;  %v2523_v52 = vmul.f32 %v6262_v32, %v2313_v8  ;;  %v6266_v32 = vpop.permute.xlu0 %6265 }
 0x262   : > { %v2152_v14 = vrot.slane %v2112_v33, 2  ;;  %v2115_v17 = vadd.f32 %v5436_v62, %v2114_v36 }
 0x263   : > { %v2314_v31 = vmax.f32 %v2284_v19, 0.0  ;;  %v7837_v30 = vsel %vm2559_vm3, %v2575_v21, %v2577_v22  ;;  %v2285_v0 = vadd.f32 %v7535_v54, %v2248_v51 }
 0x264   : > { %v2160_v23 = vsel %vm2156_vm2, %v2151_v60, %v2152_v14  ;;  %v2153_v47 = vrot.slane %v2115_v17, 2  ;;  %v5437_v29 = vpop.f32.mrb[176].mxu0  ;;  %2885 = vmatprep.mubr.bf16.mxu0 %v7837_v30 }
 0x265   : > { %v2524_v42 = vmul.f32 %v6263_v53, %v2314_v31  ;;  %v2212_v43 = vadd.f32 %v2160_v23, %v7498_v24  ;;  %v5438_v16 = vpop.f32.mrb[177].mxu0  ;;  %v2119_v46 = vpop.f32.mrb[176].mxu1  ;;  %2886 = vmatmul.mubr.bf16.gmra.mrb[212].mxu0 %v7789_v39  ;;  %v2315_v50 = vmax.f32 %v2285_v0, 0.0 }
 0x266   : > { %v2159_v21 = vsel %vm2156_vm2, %v2152_v14, %v2153_v47  ;;  %v5439_v2 = vadd.f32 %v5438_v16, %v5437_v29  ;;  %v5440_v55 = vpop.f32.mrb[178].mxu0  ;;  %v6016_v60 = vpop.f32.mrb[177].mxu1  ;;  %v6268_v29 = vunpack.i.h.bf16 %v6266_v32 }
 0x267   : > { %v7847_v36 = vpack.c.bf16 %v2524_v42, %v2523_v52  ;;  %v2249_v33 = vmul.f32 %v7528_v7, %v2212_v43  ;;  %v2213_v62 = vadd.f32 %v2159_v21, %v7501_v37  ;;  %v5441_v59 = vpop.f32.mrb[179].mxu0  ;;  %v2122_v8 = vpop.f32.mrb[178].mxu1  ;;  %v6267_v52 = vunpack.i.l.bf16 %v6266_v32 }
 0x268   : > { %v2120_v19 = vadd.f32 %v5439_v2, %v2119_v46  ;;  %v5442_v24 = vadd.f32 %v5441_v59, %v5440_v55  ;;  %v6017_v51 = vpop.f32.mrb[179].mxu1  ;;  %v6271_v55 = vpop.permute.xlu1 %6270 }
 0x269   : > { %v2286_v17 = vadd.f32 %v7535_v54, %v2249_v33  ;;  %v2250_v53 = vmul.f32 %v7528_v7, %v2213_v62  ;;  %6050 = vmatprep.mubr.bf16.mxu1 %v7847_v36  ;;  %v2579_v14 = vrot.slane %v7847_v36, 4  ;;  %v2525_v46 = vmul.f32 %v6267_v52, %v2315_v50 }
 0x26a   : > { %v2154_v31 = vrot.slane %v2120_v19, 2  ;;  %v2123_v23 = vadd.f32 %v5442_v24, %v2122_v8  ;;  %v6276_v8 = vpop.permute.xlu0 %6275  ;;  %v6273_v51 = vunpack.i.h.bf16 %v6271_v55  ;;  %v6272_v50 = vunpack.i.l.bf16 %v6271_v55  ;;  %v6435_v55 = vld [vmem:[%s8650_s5 + $0x188] sm:$0xff]  }
 0x26b   : > { %v2316_v37 = vmax.f32 %v2286_v17, 0.0  ;;  %v7856_v42 = vsel %vm2559_vm3, %v2577_v22, %v2579_v14  ;;  %v2287_v43 = vadd.f32 %v7535_v54, %v2250_v53 }
 0x26c   : > { %v2158_v0 = vsel %vm2156_vm2, %v2153_v47, %v2154_v31  ;;  %v2155_v16 = vrot.slane %v2123_v23, 2  ;;  %2893 = vmatprep.mubr.bf16.mxu0 %v7856_v42  ;;  %v6458_v47 = vld [vmem:[%s8648_s3] ss:$0 sm:$0xff] }
 0x26d   : > { %v2214_v7 = vadd.f32 %v2158_v0, %v7504_v58  ;;  %2894 = vmatmul.mubr.bf16.gmra.mrb[216].mxu0 %v7809_v34  ;;  %v2526_v21 = vmul.f32 %v6268_v29, %v2316_v37  ;;  %v2317_v59 = vmax.f32 %v2287_v43, 0.0 }
 0x26e   : > { %v2157_v2 = vsel %vm2156_vm2, %v2154_v31, %v2155_v16  ;;  %v2186_v22 = vsel %vm2156_vm2, %v2155_v16, %v2126_v5  ;;  %v6278_v31 = vunpack.i.h.bf16 %v6276_v8 }
 0x26f   : > { %v2251_v60 = vmul.f32 %v6458_v47, %v2214_v7  ;;  %v2215_v58 = vadd.f32 %v2157_v2, %v7513_v45  ;;  %v2216_v33 = vadd.f32 %v2186_v22, %v7515_v12  ;;  %v7875_v62 = vpack.c.bf16 %v2526_v21, %v2525_v46  ;;  %v6459_v45 = vld [vmem:[%s8649_s4] ss:$0 sm:$0xff]  ;;  %v6434_v2 = vld [vmem:[%s8650_s5 + $0x1c8] sm:$0xff]  }
 0x270   : > { %v2527_v23 = vmul.f32 %v6272_v50, %v2317_v59  ;;  %v6433_v21 = vld [vmem:[%s8650_s5 + $0x180] sm:$0xff]   ;;  %v6442_v59 = vld [vmem:[%s8650_s5 + $0x1e8] sm:$0xff]  }
 0x271   : > { %v2288_v19 = vadd.f32 %v7535_v54, %v2251_v60  ;;  %v2252_v18 = vmul.f32 %v6458_v47, %v2215_v58  ;;  %v2253_v24 = vmul.f32 %v6458_v47, %v2216_v33  ;;  %6051 = vmatmul.mubr.bf16.gmra.mrb[196].mxu1 %v7875_v62  ;;  %v2581_v5 = vrot.slane %v7875_v62, 4  ;;  %v6460_v22 = vld [vmem:[%s8650_s5 + $0x140] sm:$0xff]   ;;  %v6436_v47 = vld [vmem:[%s8650_s5 + $0x1d0] sm:$0xff]   ;;  %v6438_v58 = vld [vmem:[%s8650_s5 + $0x1d8] sm:$0xff]  }
 0x272   : > { %v6277_v54 = vunpack.i.l.bf16 %v6276_v8  ;;  %v6437_v60 = vld [vmem:[%s8650_s5 + $0x190] sm:$0xff]   ;;  %v6440_v33 = vld [vmem:[%s8650_s5 + $0x1e0] sm:$0xff]  }
 0x273   : > { %v2318_v17 = vmax.f32 %v2288_v19, 0.0  ;;  %v7881_v53 = vsel %vm2559_vm3, %v2579_v14, %v2581_v5  ;;  %v2289_v12 = vadd.f32 %v6459_v45, %v2252_v18  ;;  %v2290_v32 = vadd.f32 %v6459_v45, %v2253_v24  ;;  %v6444_v8 = vld [vmem:[%s8650_s5 + $0x1f0] sm:$0xff]   ;;  %v6446_v19 = vld [vmem:[%s8650_s5 + $0x1f8] sm:$0xff]  }
 0x274   : > { %2901 = vmatprep.mubr.bf16.mxu0 %v7881_v53  ;;  %v6447_v18 = vld [vmem:[%s8650_s5 + $0x1b8] sm:$0xff]  }
 0x275   : > { %2902 = vmatmul.mubr.bf16.gmra.mrb[220].mxu0 %v7828_v57  ;;  %v2528_v29 = vmul.f32 %v6273_v51, %v2318_v17  ;;  %v2319_v52 = vmax.f32 %v2289_v12, 0.0  ;;  %v2320_v37 = vmax.f32 %v2290_v32, 0.0 }
 0x277   : > { %v7888_v43 = vpack.c.bf16 %v2528_v29, %v2527_v23  ;;  %v2529_v14 = vmul.f32 %v6277_v54, %v2319_v52  ;;  %v2530_v0 = vmul.f32 %v6278_v31, %v2320_v37 }
 0x279   : > { %6054 = vmatprep.mubr.bf16.mxu1 %v7888_v43  ;;  %v7891_v16 = vpack.c.bf16 %v2530_v0, %v2529_v14  ;;  %v2583_v7 = vrot.slane %v7888_v43, 4 }
 0x27b   : > { %6055 = vmatmul.mubr.bf16.gmra.mrb[200].mxu1 %v7891_v16  ;;  %v7896_v46 = vsel %vm2559_vm3, %v2581_v5, %v2583_v7 }
 0x27c   : > { %2909 = vmatprep.mubr.bf16.mxu0 %v7896_v46  ;;  %3321 = vmatprep.mubr.bf16.mxu1 %v7586_v20 }
 0x27d   : > { %2910 = vmatmul.mubr.bf16.gmra.mrb[224].mxu0 %v7847_v36 }
 0x27e   : > { %6074 = vmatprep.mubr.bf16.mxu0 %v7602_v15 }
 0x283   : > { %3322 = vmatmul.mubr.bf16.vlgmr.msra.gmra.mrb[204].mxu1 %v7553_v44 }
 0x284   : > { %3329 = vmatprep.mubr.bf16.mxu1 %v7618_v13  ;;  %6146 = vmatpush3.bf16.msra.mxu1 %v6460_v22 }
 0x285   : > { %6075 = vmatmul.mubr.bf16.vlgmr.msra.gmra.mrb[228].mxu0 %v7638_v48  ;;  %6139 = vmatprep.subr.bf16.mxu1 %v7591_v28 }
 0x286   : > { %6078 = vmatprep.mubr.bf16.mxu0 %v7683_v26  ;;  %5683 = vmatpush3.bf16.msra.mxu0 %v6433_v21 }
 0x287   : > { %5684 = vmatprep.subr.bf16.mxu0 %v6434_v2 }
 0x288   : > { %6147 = vmatpush3.bf16.msra.mxu1 %v7591_v28  ;;  %v6439_v28 = vld [vmem:[%s8650_s5 + $0x198] sm:$0xff]  }
 0x289   : > { %6140 = vmatprep.subr.bf16.mxu1 %v7610_v63 }
 0x28a   : > { %5685 = vmatpush3.bf16.msra.mxu0 %v6435_v55 }
 0x28b   : > { %3330 = vmatmul.mubr.bf16.gmra.mrb[208].mxu1 %v7565_v6  ;;  %5686 = vmatprep.subr.bf16.mxu0 %v6436_v47 }
 0x28c   : > { %3337 = vmatprep.mubr.bf16.mxu1 %v7660_v11  ;;  %6148 = vmatpush3.bf16.msra.mxu1 %v7610_v63  ;;  %v6441_v63 = vld [vmem:[%s8650_s5 + $0x1a0] sm:$0xff]  }
 0x28d   : > { %6079 = vmatmul.mubr.bf16.gmra.mrb[232].mxu0 %v7728_v40  ;;  %6141 = vmatprep.subr.bf16.mxu1 %v7624_v10 }
 0x28e   : > { %6082 = vmatprep.mubr.bf16.mxu0 %v7764_v61  ;;  %5687 = vmatpush3.bf16.msra.mxu0 %v6437_v60 }
 0x28f   : > { %5688 = vmatprep.subr.bf16.mxu0 %v6438_v58 }
 0x290   : > { %6149 = vmatpush3.bf16.msra.mxu1 %v7624_v10  ;;  %v6443_v10 = vld [vmem:[%s8650_s5 + $0x1a8] sm:$0xff]  }
 0x291   : > { %6142 = vmatprep.subr.bf16.mxu1 %v7649_v27 }
 0x292   : > { %5689 = vmatpush3.bf16.msra.mxu0 %v6439_v28 }
 0x293   : > { %3338 = vmatmul.mubr.bf16.gmra.mrb[212].mxu1 %v7577_v4  ;;  %5690 = vmatprep.subr.bf16.mxu0 %v6440_v33 }
 0x294   : > { %3345 = vmatprep.mubr.bf16.mxu1 %v7705_v41  ;;  %6150 = vmatpush3.bf16.msra.mxu1 %v7649_v27  ;;  %v6445_v27 = vld [vmem:[%s8650_s5 + $0x1b0] sm:$0xff]  }
 0x295   : > { %6083 = vmatmul.mubr.bf16.gmra.mrb[236].mxu0 %v7789_v39  ;;  %6143 = vmatprep.subr.bf16.mxu1 %v7672_v25 }
 0x296   : > { %6086 = vmatprep.mubr.bf16.mxu0 %v7809_v34  ;;  %5691 = vmatpush3.bf16.msra.mxu0 %v6441_v63 }
 0x297   : > { %5692 = vmatprep.subr.bf16.mxu0 %v6442_v59 }
 0x298   : > { %6151 = vmatpush3.bf16.msra.mxu1 %v7672_v25  ;;  %v6448_v25 = vld [vmem:[%s8650_s5 + $0x200] sm:$0xff]  }
 0x299   : > { %6144 = vmatprep.subr.bf16.mxu1 %v7693_v49 }
 0x29a   : > { %5693 = vmatpush3.bf16.msra.mxu0 %v6443_v10 }
 0x29b   : > { %3346 = vmatmul.mubr.bf16.gmra.mrb[216].mxu1 %v7602_v15  ;;  %5694 = vmatprep.subr.bf16.mxu0 %v6444_v8 }
 0x29c   : > { %3353 = vmatprep.mubr.bf16.mxu1 %v7748_v9  ;;  %6152 = vmatpush3.bf16.msra.mxu1 %v7693_v49 }
 0x29d   : > { %6087 = vmatmul.mubr.bf16.gmra.mrb[240].mxu0 %v7828_v57  ;;  %6145 = vmatprep.subr.bf16.mxu1 %v7717_v38 }
 0x29e   : > { %5695 = vmatpush3.bf16.msra.mxu0 %v6445_v27  ;;  %3796 = vmatprep.mubr.bf16.mxu0 %v7586_v20  ;;  %v6452_v20 = vld [vmem:[%s8650_s5 + $0x220] sm:$0xff]  }
 0x29f   : > { %5696 = vmatprep.subr.bf16.mxu0 %v6446_v19 }
 0x2a0   : > { %6153 = vmatpush3.bf16.msra.mxu1 %v7717_v38 }
 0x2a1   : > { %6098 = vmatprep.subr.bf16.mxu1 %v6448_v25 }
 0x2a2   : > { %5697 = vmatpush3.bf16.msra.mxu0 %v6447_v18 }
 0x2a3   : > { %3354 = vmatmul.mubr.bf16.gmra.mrb[220].mxu1 %v7638_v48 }
 0x2a4   : > { %3361 = vmatprep.mubr.bf16.mxu1 %v7779_v1 }
 0x2a5   : > { %3797 = vmatmul.mubr.bf16.vlgmr.msra.gmra.mrb[244].mxu0 %v7553_v44  ;;  %v6449_v44 = vld [vmem:[%s8650_s5 + $0x208] sm:$0xff]  }
 0x2a6   : > { %3804 = vmatprep.mubr.bf16.mxu0 %v7618_v13  ;;  %v6453_v13 = vld [vmem:[%s8650_s5 + $0x228] sm:$0xff]  }
 0x2ab   : > { %3362 = vmatmul.mubr.bf16.gmra.mrb[224].mxu1 %v7683_v26 }
 0x2ac   : > { %3369 = vmatprep.mubr.bf16.mxu1 %v7799_v56 }
 0x2ad   : > { %3805 = vmatmul.mubr.bf16.gmra.mrb[248].mxu0 %v7565_v6  ;;  %v6450_v6 = vld [vmem:[%s8650_s5 + $0x210] sm:$0xff]  }
 0x2ae   : > { %3812 = vmatprep.mubr.bf16.mxu0 %v7660_v11 }
 0x2b3   : > { %3370 = vmatmul.mubr.bf16.gmra.mrb[228].mxu1 %v7728_v40 }
 0x2b4   : > { %3377 = vmatprep.mubr.bf16.mxu1 %v7818_v3 }
 0x2b5   : > { %3813 = vmatmul.mubr.bf16.gmra.mrb[252].mxu0 %v7577_v4  ;;  %v6451_v4 = vld [vmem:[%s8650_s5 + $0x218] sm:$0xff]  }
 0x2b6   : > { %3820 = vmatprep.mubr.bf16.mxu0 %v7705_v41  ;;  %v6455_v41 = vld [vmem:[%s8650_s5 + $0x238] sm:$0xff]  }
 0x2bb   : > { %3378 = vmatmul.mubr.bf16.gmra.mrb[232].mxu1 %v7764_v61 }
 0x2bc   : > { %3385 = vmatprep.mubr.bf16.mxu1 %v7837_v30 }
 0x2bd   : > { %3821 = vmatmul.mubr.bf16.gmra.mrb[0].mxu0 %v7602_v15 }
 0x2be   : > { %3828 = vmatprep.mubr.bf16.mxu0 %v7748_v9 }
 0x2c3   : > { %3386 = vmatmul.mubr.bf16.gmra.mrb[236].mxu1 %v7789_v39 }
 0x2c4   : > { %3393 = vmatprep.mubr.bf16.mxu1 %v7856_v42 }
 0x2c5   : > { %3829 = vmatmul.mubr.bf16.gmra.mrb[4].mxu0 %v7638_v48 }
 0x2c6   : > { %3836 = vmatprep.mubr.bf16.mxu0 %v7779_v1 }
 0x2cb   : > { %3394 = vmatmul.mubr.bf16.gmra.mrb[240].mxu1 %v7809_v34 }
 0x2cc   : > { %3401 = vmatprep.mubr.bf16.mxu1 %v7881_v53 }
 0x2cd   : > { %3837 = vmatmul.mubr.bf16.gmra.mrb[8].mxu0 %v7683_v26 }
 0x2ce   : > { %3844 = vmatprep.mubr.bf16.mxu0 %v7799_v56 }
 0x2d3   : > { %3402 = vmatmul.mubr.bf16.gmra.mrb[244].mxu1 %v7828_v57 }
 0x2d4   : > { %3409 = vmatprep.mubr.bf16.mxu1 %v7896_v46 }
 0x2d5   : > { %3845 = vmatmul.mubr.bf16.gmra.mrb[12].mxu0 %v7728_v40 }
 0x2d6   : > { %3852 = vmatprep.mubr.bf16.mxu0 %v7818_v3 }
 0x2db   : > { %3410 = vmatmul.mubr.bf16.gmra.mrb[248].mxu1 %v7847_v36 }
 0x2dc   : > { %6090 = vmatprep.mubr.bf16.mxu1 %v7847_v36 }
 0x2dd   : > { %3853 = vmatmul.mubr.bf16.gmra.mrb[16].mxu0 %v7764_v61 }
 0x2de   : > { %3860 = vmatprep.mubr.bf16.mxu0 %v7837_v30 }
 0x2e3   : > { %6091 = vmatmul.mubr.bf16.vlgmr.msra.gmra.mrb[252].mxu1 %v7875_v62 }
 0x2e4   : > { %6099 = vmatpush3.bf16.msra.mxu1 %v6448_v25  ;;  %6094 = vmatprep.mubr.bf16.mxu1 %v7888_v43 }
 0x2e5   : > { %3861 = vmatmul.mubr.bf16.gmra.mrb[20].mxu0 %v7789_v39  ;;  %6100 = vmatprep.subr.bf16.mxu1 %v6449_v44 }
 0x2e6   : > { %3868 = vmatprep.mubr.bf16.mxu0 %v7856_v42 }
 0x2e8   : > { %6101 = vmatpush3.bf16.msra.mxu1 %v6449_v44 }
 0x2e9   : > { %6102 = vmatprep.subr.bf16.mxu1 %v6450_v6 }
 0x2eb   : > { %6095 = vmatmul.mubr.bf16.gmra.mrb[0].mxu1 %v7891_v16 }
 0x2ec   : > { %6103 = vmatpush3.bf16.msra.mxu1 %v6450_v6  ;;  %6114 = vmatprep.mubr.bf16.mxu1 %v7602_v15  ;;  %v6454_v15 = vld [vmem:[%s8650_s5 + $0x230] sm:$0xff]  }
 0x2ed   : > { %3869 = vmatmul.mubr.bf16.gmra.mrb[24].mxu0 %v7809_v34  ;;  %6104 = vmatprep.subr.bf16.mxu1 %v6451_v4 }
 0x2ee   : > { %3876 = vmatprep.mubr.bf16.mxu0 %v7881_v53 }
 0x2f0   : > { %6105 = vmatpush3.bf16.msra.mxu1 %v6451_v4 }
 0x2f1   : > { %6106 = vmatprep.subr.bf16.mxu1 %v6452_v20 }
 0x2f4   : > { %6107 = vmatpush3.bf16.msra.mxu1 %v6452_v20 }
 0x2f5   : > { %3877 = vmatmul.mubr.bf16.gmra.mrb[28].mxu0 %v7828_v57  ;;  %6108 = vmatprep.subr.bf16.mxu1 %v6453_v13 }
 0x2f6   : > { %3884 = vmatprep.mubr.bf16.mxu0 %v7896_v46 }
 0x2f8   : > { %6109 = vmatpush3.bf16.msra.mxu1 %v6453_v13  ;;  %v5482_v11 = vpop.f32.mrb[180].mxu0 }
 0x2f9   : > { %v5483_v49 = vpop.f32.mrb[181].mxu0  ;;  %6110 = vmatprep.subr.bf16.mxu1 %v6454_v15 }
 0x2fa   : > { %v5484_v38 = vadd.f32 %v5483_v49, %v5482_v11  ;;  %v5485_v9 = vpop.f32.mrb[182].mxu0 }
 0x2fb   : > { %v5486_v1 = vpop.f32.mrb[183].mxu0 }
 0x2fc   : > { %v5487_v56 = vadd.f32 %v5486_v1, %v5485_v9  ;;  %6111 = vmatpush3.bf16.msra.mxu1 %v6454_v15 }
 0x2fd   : > { %3885 = vmatmul.mubr.bf16.gmra.mrb[32].mxu0 %v7847_v36  ;;  %6112 = vmatprep.subr.bf16.mxu1 %v6455_v41 }
 0x300   : > { %6113 = vmatpush3.bf16.msra.mxu1 %v6455_v41  ;;  %v5488_v3 = vpop.f32.mrb[184].mxu0 }
 0x301   : > { %v5489_v30 = vpop.f32.mrb[185].mxu0 }
 0x302   : > { %v5490_v42 = vadd.f32 %v5489_v30, %v5488_v3  ;;  %v5491_v24 = vpop.f32.mrb[186].mxu0 }
 0x303   : > { %6115 = vmatmul.mubr.bf16.vlgmr.msra.gmra.mrb[4].mxu1 %v7638_v48  ;;  %v5492_v5 = vpop.f32.mrb[187].mxu0 }
 0x304   : > { %v5493_v51 = vadd.f32 %v5492_v5, %v5491_v24  ;;  %6118 = vmatprep.mubr.bf16.mxu1 %v7683_v26  ;;  %v6036_v50 = vpop.f32.mrb[180].mxu1 }
 0x305   : > { %v2961_v17 = vadd.f32 %v6036_v50, %v5490_v42  ;;  %v2952_v53 = vpop.f32.mrb[181].mxu1 }
 0x306   : > { %v8049_v45 = vadd.f32 %v5484_v38, %v2952_v53  ;;  %v6037_v12 = vpop.f32.mrb[182].mxu1 }
 0x307   : > { %v2964_v32 = vadd.f32 %v6037_v12, %v5493_v51  ;;  %v2955_v31 = vpop.f32.mrb[183].mxu1  ;;  %v3049_v29 = vrot.slane %v2961_v17, 7 }
 0x308   : > { %v2956_v54 = vadd.f32 %v5487_v56, %v2955_v31  ;;  %v5494_v23 = vpop.f32.mrb[188].mxu0  ;;  %v3047_v48 = vrot.slane %v8049_v45, 7 }
 0x309   : > { %v3050_v52 = vrot.slane %v2964_v32, 7  ;;  %v5495_v37 = vpop.f32.mrb[189].mxu0 }
 0x30a   : > { %v3048_v14 = vrot.slane %v2956_v54, 7  ;;  %v5496_v0 = vadd.f32 %v5495_v37, %v5494_v23  ;;  %v5497_v26 = vpop.f32.mrb[190].mxu0 }
 0x30b   : > { %6119 = vmatmul.mubr.bf16.gmra.mrb[8].mxu1 %v7728_v40  ;;  %v5498_v7 = vpop.f32.mrb[191].mxu0  ;;  %v8056_v46 = vsel %vm3071_vm4, %v3049_v29, %v3050_v52 }
 0x30c   : > { %v5499_v21 = vadd.f32 %v5498_v7, %v5497_v26  ;;  %6122 = vmatprep.mubr.bf16.mxu1 %v7764_v61  ;;  %v8063_v2 = vsel %vm3071_vm4, %v3047_v48, %v3048_v14  ;;  %v8067_v22 = vsel %vm3071_vm4, %v3048_v14, %v3049_v29 }
 0x310   : > { %v5500_v55 = vpop.f32.mrb[192].mxu0 }
 0x311   : > { %v5501_v40 = vpop.f32.mrb[193].mxu0 }
 0x312   : > { %v5502_v47 = vadd.f32 %v5501_v40, %v5500_v55  ;;  %v5503_v60 = vpop.f32.mrb[194].mxu0 }
 0x313   : > { %6123 = vmatmul.mubr.bf16.gmra.mrb[12].mxu1 %v7789_v39  ;;  %v5504_v58 = vpop.f32.mrb[195].mxu0 }
 0x314   : > { %v5505_v28 = vadd.f32 %v5504_v58, %v5503_v60  ;;  %6126 = vmatprep.mubr.bf16.mxu1 %v7809_v34  ;;  %v6040_v61 = vpop.f32.mrb[184].mxu1 }
 0x315   : > { %v2977_v33 = vadd.f32 %v6040_v61, %v5502_v47  ;;  %v2968_v63 = vpop.f32.mrb[185].mxu1 }
 0x316   : > { %v2969_v59 = vadd.f32 %v5496_v0, %v2968_v63  ;;  %v6041_v10 = vpop.f32.mrb[186].mxu1 }
 0x317   : > { %v2980_v8 = vadd.f32 %v6041_v10, %v5505_v28  ;;  %v2971_v27 = vpop.f32.mrb[187].mxu1  ;;  %v3053_v44 = vrot.slane %v2977_v33, 7 }
 0x318   : > { %v3051_v19 = vrot.slane %v2969_v59, 7  ;;  %v2972_v25 = vadd.f32 %v5499_v21, %v2971_v27  ;;  %v5506_v18 = vpop.f32.mrb[196].mxu0 }
 0x319   : > { %v3054_v6 = vrot.slane %v2980_v8, 7  ;;  %v5507_v4 = vpop.f32.mrb[197].mxu0 }
 0x31a   : > { %v3052_v20 = vrot.slane %v2972_v25, 7  ;;  %v5508_v13 = vadd.f32 %v5507_v4, %v5506_v18  ;;  %v5509_v39 = vpop.f32.mrb[198].mxu0  ;;  %v8073_v15 = vsel %vm3071_vm4, %v3050_v52, %v3051_v19 }
 0x31b   : > { %6127 = vmatmul.mubr.bf16.gmra.mrb[16].mxu1 %v7828_v57  ;;  %v5510_v34 = vpop.f32.mrb[199].mxu0  ;;  %v8078_v11 = vsel %vm3071_vm4, %v3053_v44, %v3054_v6 }
 0x31c   : > { %v5511_v49 = vadd.f32 %v5510_v34, %v5509_v39  ;;  %6130 = vmatprep.mubr.bf16.mxu1 %v7847_v36  ;;  %v8083_v41 = vsel %vm3071_vm4, %v3051_v19, %v3052_v20  ;;  %v8087_v38 = vsel %vm3071_vm4, %v3052_v20, %v3053_v44 }
 0x320   : > { %v5512_v9 = vpop.f32.mrb[200].mxu0 }
 0x321   : > { %v5513_v1 = vpop.f32.mrb[201].mxu0 }
 0x322   : > { %v5514_v56 = vadd.f32 %v5513_v1, %v5512_v9  ;;  %v5515_v57 = vpop.f32.mrb[202].mxu0 }
 0x323   : > { %6131 = vmatmul.mubr.bf16.gmra.mrb[20].mxu1 %v7875_v62  ;;  %v5516_v3 = vpop.f32.mrb[203].mxu0 }
 0x324   : > { %v5517_v30 = vadd.f32 %v5516_v3, %v5515_v57  ;;  %6134 = vmatprep.mubr.bf16.mxu1 %v7888_v43  ;;  %v6044_v42 = vpop.f32.mrb[188].mxu1 }
 0x325   : > { %v2993_v36 = vadd.f32 %v6044_v42, %v5514_v56  ;;  %v2984_v24 = vpop.f32.mrb[189].mxu1 }
 0x326   : > { %v2985_v5 = vadd.f32 %v5508_v13, %v2984_v24  ;;  %v6045_v51 = vpop.f32.mrb[190].mxu1 }
 0x327   : > { %v2996_v50 = vadd.f32 %v6045_v51, %v5517_v30  ;;  %v2987_v17 = vpop.f32.mrb[191].mxu1  ;;  %v3057_v31 = vrot.slane %v2993_v36, 7 }
 0x328   : > { %v3055_v53 = vrot.slane %v2985_v5, 7  ;;  %v2988_v12 = vadd.f32 %v5511_v49, %v2987_v17  ;;  %v5518_v32 = vpop.f32.mrb[204].mxu0 }
 0x329   : > { %v3058_v54 = vrot.slane %v2996_v50, 7  ;;  %v5519_v23 = vpop.f32.mrb[205].mxu0 }
 0x32a   : > { %v3056_v29 = vrot.slane %v2988_v12, 7  ;;  %v5520_v52 = vadd.f32 %v5519_v23, %v5518_v32  ;;  %v5521_v62 = vpop.f32.mrb[206].mxu0  ;;  %v8093_v37 = vsel %vm3071_vm4, %v3054_v6, %v3055_v53 }
 0x32b   : > { %6135 = vmatmul.mubr.bf16.gmra.mrb[24].mxu1 %v7891_v16  ;;  %v5522_v43 = vpop.f32.mrb[207].mxu0  ;;  %v8098_v14 = vsel %vm3071_vm4, %v3057_v31, %v3058_v54 }
 0x32c   : > { %v5523_v0 = vadd.f32 %v5522_v43, %v5521_v62  ;;  %v8102_v26 = vsel %vm3071_vm4, %v3055_v53, %v3056_v29  ;;  %v8106_v7 = vsel %vm3071_vm4, %v3056_v29, %v3057_v31 }
 0x330   : > { %v5524_v21 = vpop.f32.mrb[208].mxu0 }
 0x331   : > { %v5525_v55 = vpop.f32.mrb[209].mxu0 }
 0x332   : > { %v5526_v40 = vadd.f32 %v5525_v55, %v5524_v21  ;;  %v5527_v47 = vpop.f32.mrb[210].mxu0 }
 0x333   : > { %v5528_v60 = vpop.f32.mrb[211].mxu0 }
 0x334   : > { %v5529_v16 = vadd.f32 %v5528_v60, %v5527_v47  ;;  %v6048_v58 = vpop.f32.mrb[192].mxu1 }
 0x335   : > { %v3009_v28 = vadd.f32 %v6048_v58, %v5526_v40  ;;  %v3000_v61 = vpop.f32.mrb[193].mxu1 }
 0x336   : > { %v3001_v33 = vadd.f32 %v5520_v52, %v3000_v61  ;;  %v6049_v63 = vpop.f32.mrb[194].mxu1 }
 0x337   : > { %v3012_v59 = vadd.f32 %v6049_v63, %v5529_v16  ;;  %v3003_v10 = vpop.f32.mrb[195].mxu1  ;;  %v3061_v25 = vrot.slane %v3009_v28, 7 }
 0x338   : > { %v3059_v8 = vrot.slane %v3001_v33, 7  ;;  %v3004_v27 = vadd.f32 %v5523_v0, %v3003_v10  ;;  %v5530_v19 = vpop.f32.mrb[212].mxu0 }
 0x339   : > { %v3062_v18 = vrot.slane %v3012_v59, 7  ;;  %v5531_v44 = vpop.f32.mrb[213].mxu0 }
 0x33a   : > { %v3060_v6 = vrot.slane %v3004_v27, 7  ;;  %v5532_v4 = vadd.f32 %v5531_v44, %v5530_v19  ;;  %v5533_v20 = vpop.f32.mrb[214].mxu0  ;;  %v8110_v13 = vsel %vm3071_vm4, %v3058_v54, %v3059_v8 }
 0x33b   : > { %v5534_v39 = vpop.f32.mrb[215].mxu0  ;;  %v8114_v34 = vsel %vm3071_vm4, %v3061_v25, %v3062_v18 }
 0x33c   : > { %v5535_v49 = vadd.f32 %v5534_v39, %v5533_v20  ;;  %v8118_v9 = vsel %vm3071_vm4, %v3059_v8, %v3060_v6  ;;  %v8122_v1 = vsel %vm3071_vm4, %v3060_v6, %v3061_v25 }
 0x340   : > { %v5536_v56 = vpop.f32.mrb[216].mxu0 }
 0x341   : > { %v5537_v57 = vpop.f32.mrb[217].mxu0 }
 0x342   : > { %v5538_v3 = vadd.f32 %v5537_v57, %v5536_v56  ;;  %v5539_v30 = vpop.f32.mrb[218].mxu0 }
 0x343   : > { %v5540_v42 = vpop.f32.mrb[219].mxu0 }
 0x344   : > { %v5541_v36 = vadd.f32 %v5540_v42, %v5539_v30  ;;  %v6052_v24 = vpop.f32.mrb[196].mxu1 }
 0x345   : > { %v3025_v5 = vadd.f32 %v6052_v24, %v5538_v3  ;;  %v3016_v51 = vpop.f32.mrb[197].mxu1 }
 0x346   : > { %v3017_v50 = vadd.f32 %v5532_v4, %v3016_v51  ;;  %v6053_v17 = vpop.f32.mrb[198].mxu1 }
 0x347   : > { %v3028_v53 = vadd.f32 %v6053_v17, %v5541_v36  ;;  %v3019_v12 = vpop.f32.mrb[199].mxu1  ;;  %v3065_v23 = vrot.slane %v3025_v5, 7 }
 0x348   : > { %v3063_v32 = vrot.slane %v3017_v50, 7  ;;  %v3020_v31 = vadd.f32 %v5535_v49, %v3019_v12  ;;  %v5542_v54 = vpop.f32.mrb[220].mxu0 }
 0x349   : > { %v3066_v29 = vrot.slane %v3028_v53, 7  ;;  %v5543_v52 = vpop.f32.mrb[221].mxu0 }
 0x34a   : > { %v3064_v62 = vrot.slane %v3020_v31, 7  ;;  %v5544_v43 = vadd.f32 %v5543_v52, %v5542_v54  ;;  %v5545_v0 = vpop.f32.mrb[222].mxu0  ;;  %v8126_v21 = vsel %vm3071_vm4, %v3062_v18, %v3063_v32 }
 0x34b   : > { %v5546_v55 = vpop.f32.mrb[223].mxu0  ;;  %v8130_v40 = vsel %vm3071_vm4, %v3065_v23, %v3066_v29 }
 0x34c   : > { %v5547_v47 = vadd.f32 %v5546_v55, %v5545_v0  ;;  %v8134_v60 = vsel %vm3071_vm4, %v3064_v62, %v3065_v23  ;;  %v8138_v16 = vsel %vm3071_vm4, %v3063_v32, %v3064_v62 }
 0x34e   : > { %v6056_v58 = vpop.f32.mrb[200].mxu1 }
 0x34f   : > { %v3032_v28 = vpop.f32.mrb[201].mxu1 }
 0x350   : > { %v3033_v61 = vadd.f32 %v5544_v43, %v3032_v28  ;;  %v5548_v33 = vpop.f32.mrb[224].mxu0  ;;  %v6057_v63 = vpop.f32.mrb[202].mxu1 }
 0x351   : > { %v5549_v59 = vpop.f32.mrb[225].mxu0  ;;  %v3035_v10 = vpop.f32.mrb[203].mxu1 }
 0x352   : > { %v3067_v8 = vrot.slane %v3033_v61, 7  ;;  %v5550_v27 = vadd.f32 %v5549_v59, %v5548_v33  ;;  %v3036_v19 = vadd.f32 %v5547_v47, %v3035_v10  ;;  %v5551_v25 = vpop.f32.mrb[226].mxu0 }
 0x353   : > { %v5552_v18 = vpop.f32.mrb[227].mxu0 }
 0x354   : > { %v3041_v44 = vadd.f32 %v6056_v58, %v5550_v27  ;;  %v3068_v6 = vrot.slane %v3036_v19, 7  ;;  %v5553_v4 = vadd.f32 %v5552_v18, %v5551_v25  ;;  %v8142_v20 = vsel %vm3071_vm4, %v3066_v29, %v3067_v8 }
 0x356   : > { %v3069_v39 = vrot.slane %v3041_v44, 7  ;;  %v3044_v49 = vadd.f32 %v6057_v63, %v5553_v4  ;;  %v5590_v56 = vpop.f32.mrb[204].mxu1  ;;  %v8146_v57 = vsel %vm3071_vm4, %v3067_v8, %v3068_v6 }
 0x357   : > { %v5591_v3 = vpop.f32.mrb[205].mxu1 }
 0x358   : > { %v3070_v30 = vrot.slane %v3044_v49, 7  ;;  %v5592_v42 = vadd.f32 %v5591_v3, %v5590_v56  ;;  %v5593_v36 = vpop.f32.mrb[206].mxu1  ;;  %v6076_v24 = vpop.f32.mrb[228].mxu0  ;;  %v8150_v5 = vsel %vm3071_vm4, %v3068_v6, %v3069_v39 }
 0x359   : > { %v5594_v51 = vpop.f32.mrb[207].mxu1  ;;  %v3452_v50 = vpop.f32.mrb[229].mxu0 }
 0x35a   : > { %v5595_v17 = vadd.f32 %v5594_v51, %v5593_v36  ;;  %v3095_v53 = vsel %vm3071_vm4, %v3070_v30, %v3047_v48  ;;  %v3453_v12 = vadd.f32 %v5592_v42, %v3452_v50  ;;  %v6077_v32 = vpop.f32.mrb[230].mxu0  ;;  %v8158_v31 = vsel %vm3071_vm4, %v3069_v39, %v3070_v30 }
 0x35b   : > { %v3455_v54 = vpop.f32.mrb[231].mxu0 }
 0x35c   : > { %v8160_v23 = vadd.f32 %v3453_v12, %v3095_v53  ;;  %v3456_v29 = vadd.f32 %v5595_v17, %v3455_v54 }
 0x35e   : > { %v8163_v52 = vadd.f32 %v3456_v29, %v8063_v2  ;;  %v5596_v62 = vpop.f32.mrb[208].mxu1 }
 0x35f   : > { %v5597_v43 = vpop.f32.mrb[209].mxu1 }
 0x360   : > { %v5598_v0 = vadd.f32 %v5597_v43, %v5596_v62  ;;  %v5599_v45 = vpop.f32.mrb[210].mxu1  ;;  %v6080_v55 = vpop.f32.mrb[232].mxu0 }
 0x361   : > { %v5600_v47 = vpop.f32.mrb[211].mxu1  ;;  %v3468_v48 = vpop.f32.mrb[233].mxu0 }
 0x362   : > { %v3461_v58 = vadd.f32 %v6076_v24, %v5598_v0  ;;  %v5601_v28 = vadd.f32 %v5600_v47, %v5599_v45  ;;  %v6081_v61 = vpop.f32.mrb[234].mxu0 }
 0x363   : > { %v3471_v33 = vpop.f32.mrb[235].mxu0 }
 0x364   : > { %v8166_v63 = vadd.f32 %v3461_v58, %v8067_v22  ;;  %v3464_v59 = vadd.f32 %v6077_v32, %v5601_v28 }
 0x366   : > { %v8169_v10 = vadd.f32 %v3464_v59, %v8056_v46  ;;  %v5602_v2 = vpop.f32.mrb[212].mxu1 }
 0x367   : > { %v5603_v8 = vpop.f32.mrb[213].mxu1 }
 0x368   : > { %v5604_v27 = vadd.f32 %v5603_v8, %v5602_v2  ;;  %v5605_v19 = vpop.f32.mrb[214].mxu1  ;;  %v6084_v25 = vpop.f32.mrb[236].mxu0 }
 0x369   : > { %v5606_v18 = vpop.f32.mrb[215].mxu1  ;;  %v3484_v44 = vpop.f32.mrb[237].mxu0 }
 0x36a   : > { %v3469_v6 = vadd.f32 %v5604_v27, %v3468_v48  ;;  %v5607_v4 = vadd.f32 %v5606_v18, %v5605_v19  ;;  %v6085_v39 = vpop.f32.mrb[238].mxu0 }
 0x36b   : > { %v3487_v49 = vpop.f32.mrb[239].mxu0 }
 0x36c   : > { %v8172_v56 = vadd.f32 %v3469_v6, %v8073_v15  ;;  %v3472_v22 = vadd.f32 %v5607_v4, %v3471_v33 }
 0x36e   : > { %v8175_v3 = vadd.f32 %v3472_v22, %v8083_v41  ;;  %v5608_v46 = vpop.f32.mrb[216].mxu1 }
 0x36f   : > { %v5609_v30 = vpop.f32.mrb[217].mxu1 }
 0x370   : > { %v5610_v42 = vadd.f32 %v5609_v30, %v5608_v46  ;;  %v5611_v36 = vpop.f32.mrb[218].mxu1  ;;  %v8177_v24 = vpop.f32.mrb[240].mxu0 }
 0x371   : > { %v5612_v51 = vpop.f32.mrb[219].mxu1  ;;  %v3500_v50 = vpop.f32.mrb[241].mxu0 }
 0x372   : > { %v3477_v17 = vadd.f32 %v6080_v55, %v5610_v42  ;;  %v5613_v53 = vadd.f32 %v5612_v51, %v5611_v36  ;;  %v8179_v12 = vpop.f32.mrb[242].mxu0 }
 0x373   : > { %v3503_v32 = vpop.f32.mrb[243].mxu0 }
 0x374   : > { %v8182_v15 = vadd.f32 %v3477_v17, %v8087_v38  ;;  %v3480_v54 = vadd.f32 %v6081_v61, %v5613_v53 }
 0x376   : > { %v8185_v41 = vadd.f32 %v3480_v54, %v8078_v11  ;;  %v5614_v29 = vpop.f32.mrb[220].mxu1 }
 0x377   : > { %v5615_v62 = vpop.f32.mrb[221].mxu1 }
 0x378   : > { %v5616_v43 = vadd.f32 %v5615_v62, %v5614_v29  ;;  %v5617_v0 = vpop.f32.mrb[222].mxu1  ;;  %v5698_v45 = vpop.f32.mrb[244].mxu0 }
 0x379   : > { %v5618_v47 = vpop.f32.mrb[223].mxu1  ;;  %v5699_v48 = vpop.f32.mrb[245].mxu0 }
 0x37a   : > { %v3485_v58 = vadd.f32 %v5616_v43, %v3484_v44  ;;  %v5619_v55 = vadd.f32 %v5618_v47, %v5617_v0  ;;  %v8187_v28 = vadd.f32 %v5699_v48, %v5698_v45  ;;  %v5701_v33 = vpop.f32.mrb[246].mxu0 }
 0x37b   : > { %v5702_v59 = vpop.f32.mrb[247].mxu0 }
 0x37c   : > { %v8190_v38 = vadd.f32 %v3485_v58, %v8093_v37  ;;  %v3488_v61 = vadd.f32 %v5619_v55, %v3487_v49  ;;  %v8192_v2 = vadd.f32 %v5702_v59, %v5701_v33 }
 0x37e   : > { %v8195_v11 = vadd.f32 %v3488_v61, %v8102_v26  ;;  %v5620_v8 = vpop.f32.mrb[224].mxu1 }
 0x37f   : > { %v5621_v27 = vpop.f32.mrb[225].mxu1 }
 0x380   : > { %v5622_v19 = vadd.f32 %v5621_v27, %v5620_v8  ;;  %v5623_v18 = vpop.f32.mrb[226].mxu1  ;;  %v5704_v6 = vpop.f32.mrb[248].mxu0 }
 0x381   : > { %v5624_v44 = vpop.f32.mrb[227].mxu1  ;;  %v5705_v4 = vpop.f32.mrb[249].mxu0 }
 0x382   : > { %v3493_v22 = vadd.f32 %v6084_v25, %v5622_v19  ;;  %v5625_v46 = vadd.f32 %v5624_v44, %v5623_v18  ;;  %v8197_v30 = vadd.f32 %v5705_v4, %v5704_v6  ;;  %v5707_v42 = vpop.f32.mrb[250].mxu0 }
 0x383   : > { %v5708_v37 = vpop.f32.mrb[251].mxu0 }
 0x384   : > { %v8200_v49 = vadd.f32 %v3493_v22, %v8106_v7  ;;  %v3496_v36 = vadd.f32 %v6085_v39, %v5625_v46  ;;  %v8202_v51 = vadd.f32 %v5708_v37, %v5707_v42 }
 0x386   : > { %v8205_v26 = vadd.f32 %v3496_v36, %v8098_v14  ;;  %v5626_v17 = vpop.f32.mrb[228].mxu1 }
 0x387   : > { %v5627_v53 = vpop.f32.mrb[229].mxu1 }
 0x388   : > { %v5628_v54 = vadd.f32 %v5627_v53, %v5626_v17  ;;  %v5629_v29 = vpop.f32.mrb[230].mxu1  ;;  %v5710_v62 = vpop.f32.mrb[252].mxu0 }
 0x389   : > { %v5630_v25 = vpop.f32.mrb[231].mxu1  ;;  %v5711_v43 = vpop.f32.mrb[253].mxu0 }
 0x38a   : > { %v3501_v0 = vadd.f32 %v5628_v54, %v3500_v50  ;;  %v5631_v45 = vadd.f32 %v5630_v25, %v5629_v29  ;;  %v8207_v47 = vadd.f32 %v5711_v43, %v5710_v62  ;;  %v5713_v48 = vpop.f32.mrb[254].mxu0 }
 0x38b   : > { %v5714_v7 = vpop.f32.mrb[255].mxu0 }
 0x38c   : > { %v8210_v39 = vadd.f32 %v3501_v0, %v8110_v13  ;;  %v3504_v58 = vadd.f32 %v5631_v45, %v3503_v32  ;;  %v8212_v55 = vadd.f32 %v5714_v7, %v5713_v48 }
 0x38e   : > { %8656 = vst [vmem:[#allocation2_spill] sm:$0xff] %v8210_v39  ;;  %v8215_v14 = vadd.f32 %v3504_v58, %v8118_v9  ;;  %v5632_v33 = vpop.f32.mrb[232].mxu1  ;;  %v6480_v39 = vld [vmem:[%s6688_s13 + $0x5c] sm:$0xf] }
 0x38f   : > { %v5633_v59 = vpop.f32.mrb[233].mxu1 }
 0x390   : > { %8657 = vst [vmem:[#allocation3_spill] sm:$0xff] %v8215_v14  ;;  %v5634_v61 = vadd.f32 %v5633_v59, %v5632_v33  ;;  %v5635_v8 = vpop.f32.mrb[234].mxu1  ;;  %v5716_v27 = vpop.f32.mrb[0].mxu0 }
 0x391   : > { %v5636_v50 = vpop.f32.mrb[235].mxu1  ;;  %v5717_v19 = vpop.f32.mrb[1].mxu0 }
 0x392   : > { %v3509_v18 = vadd.f32 %v8177_v24, %v5634_v61  ;;  %v5637_v6 = vadd.f32 %v5636_v50, %v5635_v8  ;;  %v8218_v44 = vadd.f32 %v5717_v19, %v5716_v27  ;;  %v5719_v13 = vpop.f32.mrb[2].mxu0 }
 0x393   : > { %v5720_v4 = vpop.f32.mrb[3].mxu0 }
 0x394   : > { %v8221_v32 = vadd.f32 %v3509_v18, %v8122_v1  ;;  %v3512_v9 = vadd.f32 %v8179_v12, %v5637_v6  ;;  %v8224_v22 = vadd.f32 %v5720_v4, %v5719_v13 }
 0x396   : > { %8658 = vst [vmem:[#allocation4_spill] sm:$0xff] %v8221_v32  ;;  %v8227_v46 = vadd.f32 %v3512_v9, %v8114_v34  ;;  %v5638_v42 = vpop.f32.mrb[236].mxu1 }
 0x397   : > { %v5639_v37 = vpop.f32.mrb[237].mxu1 }
 0x398   : > { %8659 = vst [vmem:[#allocation5_spill] sm:$0xff] %v8227_v46  ;;  %v5640_v36 = vadd.f32 %v5639_v37, %v5638_v42  ;;  %v5641_v17 = vpop.f32.mrb[238].mxu1  ;;  %v5722_v24 = vpop.f32.mrb[4].mxu0 }
 0x399   : > { %v5642_v53 = vpop.f32.mrb[239].mxu1  ;;  %v5723_v54 = vpop.f32.mrb[5].mxu0 }
 0x39a   : > { %v5643_v29 = vadd.f32 %v5642_v53, %v5641_v17  ;;  %v8229_v62 = vadd.f32 %v5723_v54, %v5722_v24  ;;  %v5725_v25 = vpop.f32.mrb[6].mxu0 }
 0x39b   : > { %v5726_v1 = vpop.f32.mrb[7].mxu0 }
 0x39c   : > { %v8231_v43 = vadd.f32 %v5726_v1, %v5725_v25 }
 0x39e   : > { %v5644_v12 = vpop.f32.mrb[240].mxu1 }
 0x39f   : > { %v5645_v0 = vpop.f32.mrb[241].mxu1 }
 0x3a0   : > { %v5646_v45 = vadd.f32 %v5645_v0, %v5644_v12  ;;  %v5647_v48 = vpop.f32.mrb[242].mxu1  ;;  %v5728_v34 = vpop.f32.mrb[8].mxu0 }
 0x3a1   : > { %v5648_v7 = vpop.f32.mrb[243].mxu1  ;;  %v5729_v58 = vpop.f32.mrb[9].mxu0 }
 0x3a2   : > { %v5649_v33 = vadd.f32 %v5648_v7, %v5647_v48  ;;  %v8233_v59 = vadd.f32 %v5729_v58, %v5728_v34  ;;  %v5731_v61 = vpop.f32.mrb[10].mxu0 }
 0x3a3   : > { %v5732_v8 = vpop.f32.mrb[11].mxu0 }
 0x3a4   : > { %v8235_v27 = vadd.f32 %v5732_v8, %v5731_v61 }
 0x3a6   : > { %v5650_v50 = vpop.f32.mrb[244].mxu1 }
 0x3a7   : > { %v5651_v19 = vpop.f32.mrb[245].mxu1 }
 0x3a8   : > { %v5652_v18 = vadd.f32 %v5651_v19, %v5650_v50  ;;  %v5653_v6 = vpop.f32.mrb[246].mxu1  ;;  %v5734_v13 = vpop.f32.mrb[12].mxu0 }
 0x3a9   : > { %v5654_v4 = vpop.f32.mrb[247].mxu1  ;;  %v5735_v9 = vpop.f32.mrb[13].mxu0 }
 0x3aa   : > { %v5655_v42 = vadd.f32 %v5654_v4, %v5653_v6  ;;  %v8237_v37 = vadd.f32 %v5735_v9, %v5734_v13  ;;  %v5737_v17 = vpop.f32.mrb[14].mxu0 }
 0x3ab   : > { %v5738_v24 = vpop.f32.mrb[15].mxu0 }
 0x3ac   : > { %v8239_v53 = vadd.f32 %v5738_v24, %v5737_v17 }
 0x3ae   : > { %v5656_v54 = vpop.f32.mrb[248].mxu1 }
 0x3af   : > { %v5657_v25 = vpop.f32.mrb[249].mxu1 }
 0x3b0   : > { %v5658_v1 = vadd.f32 %v5657_v25, %v5656_v54  ;;  %v5659_v12 = vpop.f32.mrb[250].mxu1  ;;  %v5740_v0 = vpop.f32.mrb[16].mxu0 }
 0x3b1   : > { %v5660_v48 = vpop.f32.mrb[251].mxu1  ;;  %v5741_v34 = vpop.f32.mrb[17].mxu0 }
 0x3b2   : > { %v5661_v7 = vadd.f32 %v5660_v48, %v5659_v12  ;;  %v8241_v58 = vadd.f32 %v5741_v34, %v5740_v0  ;;  %v5743_v61 = vpop.f32.mrb[18].mxu0 }
 0x3b3   : > { %v5744_v8 = vpop.f32.mrb[19].mxu0 }
 0x3b4   : > { %v8243_v50 = vadd.f32 %v5744_v8, %v5743_v61 }
 0x3b6   : > { %v6092_v19 = vpop.f32.mrb[252].mxu1 }
 0x3b7   : > { %v3525_v6 = vadd.f32 %v6092_v19, %v5646_v45  ;;  %v3516_v13 = vpop.f32.mrb[253].mxu1 }
 0x3b8   : > { %v3517_v4 = vadd.f32 %v5640_v36, %v3516_v13  ;;  %v6093_v9 = vpop.f32.mrb[254].mxu1  ;;  %v5746_v17 = vpop.f32.mrb[20].mxu0 }
 0x3b9   : > { %v8246_v24 = vadd.f32 %v3525_v6, %v8134_v60  ;;  %v3528_v54 = vadd.f32 %v6093_v9, %v5649_v33  ;;  %v3519_v25 = vpop.f32.mrb[255].mxu1  ;;  %v5747_v46 = vpop.f32.mrb[21].mxu0 }
 0x3ba   : > { %v8249_v12 = vadd.f32 %v3517_v4, %v8126_v21  ;;  %v3520_v0 = vadd.f32 %v5643_v29, %v3519_v25  ;;  %v8251_v48 = vadd.f32 %v5747_v46, %v5746_v17  ;;  %v5749_v34 = vpop.f32.mrb[22].mxu0 }
 0x3bb   : > { %8660 = vst [vmem:[#allocation6_spill] sm:$0xff] %v8246_v24  ;;  %v8254_v61 = vadd.f32 %v3528_v54, %v8130_v40  ;;  %v5750_v45 = vpop.f32.mrb[23].mxu0  ;;  %v6477_v24 = vld [vmem:[%s6688_s13 + $0x58] sm:$0xf] }
 0x3bc   : > { %8661 = vst [vmem:[#allocation7_spill] sm:$0xff] %v8249_v12  ;;  %8662 = vst [vmem:[#allocation8_spill] sm:$0xff] %v8251_v48  ;;  %v8257_v36 = vadd.f32 %v3520_v0, %v8138_v16  ;;  %v8259_v8 = vadd.f32 %v5750_v45, %v5749_v34  ;;  %v6461_v0 = vld [vmem:[%s6688_s13 + $0x20] sm:$0xf] }
 0x3bd   : > { %8663 = vst [vmem:[#allocation9_spill] sm:$0xff] %v8254_v61 }
 0x3be   : > { %8664 = vst [vmem:[#allocation10_spill] sm:$0xff] %v8257_v36  ;;  %8665 = vst [vmem:[#allocation11_spill] sm:$0xff] %v8259_v8  ;;  %v6096_v60 = vpop.f32.mrb[0].mxu1  ;;  %v6476_v36 = vld [vmem:[%s6688_s13 + $0x4c] sm:$0xf]  ;;  %v4110_v8 = vunpack.c.l.bf16 %v6477_v24 }
 0x3bf   : > { %v3541_v33 = vadd.f32 %v6096_v60, %v5658_v1  ;;  %v3532_v19 = vpop.f32.mrb[1].mxu1  ;;  %v6463_v60 = vld [vmem:[%s6688_s13 + $0x18] sm:$0xf]  ;;  %v4107_v12 = vunpack.c.l.bf16 %v6476_v36 }
 0x3c0   : > { %v3533_v6 = vadd.f32 %v5652_v18, %v3532_v19  ;;  %v6097_v21 = vpop.f32.mrb[2].mxu1  ;;  %v5752_v13 = vpop.f32.mrb[24].mxu0  ;;  %v6464_v19 = vld [vmem:[%s6688_s13 + $0x1c] sm:$0xf] }
 0x3c1   : > { %v8262_v46 = vadd.f32 %v3541_v33, %v8150_v5  ;;  %v3544_v29 = vadd.f32 %v6097_v21, %v5661_v7  ;;  %v3535_v40 = vpop.f32.mrb[3].mxu1  ;;  %v5753_v4 = vpop.f32.mrb[25].mxu0  ;;  %v4094_v33 = vunpack.c.l.bf16 %v6463_v60 }
 0x3c2   : > { %v8265_v16 = vadd.f32 %v3533_v6, %v8142_v20  ;;  %v3536_v9 = vadd.f32 %v5655_v42, %v3535_v40  ;;  %v8267_v17 = vadd.f32 %v5753_v4, %v5752_v13  ;;  %v5755_v1 = vpop.f32.mrb[26].mxu0  ;;  %v4096_v20 = vunpack.c.l.bf16 %v6461_v0  ;;  %v6462_v42 = vld [vmem:[%s6688_s13 + $0x24] sm:$0xf]  ;;  %v6465_v13 = vld [vmem:[%s6688_s13 + $0x28] sm:$0xf] }
 0x3c3   : > { %8666 = vst [vmem:[#allocation12_spill] sm:$0xff] %v8262_v46  ;;  %v8270_v18 = vadd.f32 %v3544_v29, %v8158_v31  ;;  %v5756_v54 = vpop.f32.mrb[27].mxu0  ;;  %v4097_v45 = vunpack.c.l.bf16 %v6462_v42  ;;  %v4095_v31 = vunpack.c.l.bf16 %v6464_v19  ;;  %v4098_v29 = vunpack.c.l.bf16 %v6465_v13  ;;  %v6466_v40 = vld [vmem:[%s6688_s13 + $0x30] sm:$0xf]  ;;  %v6468_v19 = vld [vmem:[%s6688_s13 + $0x2c] sm:$0xf] }
 0x3c4   : > { %8667 = vst [vmem:[#allocation13_spill] sm:$0xff] %v8265_v16  ;;  %8668 = vst [vmem:[#allocation14_spill] sm:$0xff] %v8267_v17  ;;  %v8273_v5 = vadd.f32 %v3536_v9, %v8146_v57  ;;  %v8275_v7 = vadd.f32 %v5756_v54, %v5755_v1  ;;  %v4100_v4 = vunpack.c.l.bf16 %v6466_v40  ;;  %v6467_v9 = vld [vmem:[%s6688_s13 + $0x34] sm:$0xf]  ;;  %v4120_v0 = vrot.slane %v4096_v20, 1 }
 0x3c5   : > { %8669 = vst [vmem:[#allocation15_spill] sm:$0xff] %v8270_v18  ;;  %v4101_v1 = vunpack.c.l.bf16 %v6467_v9  ;;  %v4121_v42 = vrot.slane %v4097_v45, 1  ;;  %v4119_v60 = vrot.slane %v4095_v31, 1  ;;  %v6469_v13 = vld [vmem:[%s6688_s13 + $0x38] sm:$0xf] }
 0x3c6   : > { %8670 = vst [vmem:[#allocation16_spill] sm:$0xff] %v8273_v5  ;;  %8671 = vst [vmem:[#allocation17_spill] sm:$0xff] %v8275_v7  ;;  %v8288_v5 = vrot.slane %v4094_v33, 1  ;;  %v4124_v16 = vrot.slane %v4100_v4, 1  ;;  %v4102_v46 = vunpack.c.l.bf16 %v6469_v13  ;;  %v6471_v9 = vld [vmem:[%s6688_s13 + $0x44] sm:$0xf] }
 0x3c7   : > { %v4125_v18 = vrot.slane %v4101_v1, 1  ;;  %v8298_v20 = vsel %vm1146_vm1, %v4119_v60, %v4120_v0  ;;  %v4105_v1 = vunpack.c.l.bf16 %v6471_v9  ;;  %v6474_v9 = vld [vmem:[%s6688_s13 + $0x50] sm:$0xf]  ;;  %v6478_v7 = vld [vmem:[%s6688_s13 + $0x60] sm:$0xf] }
 0x3c8   : > { %v5758_v25 = vpop.f32.mrb[28].mxu0  ;;  %v8303_v45 = vsel %vm1146_vm1, %v8288_v5, %v4119_v60  ;;  %v4112_v48 = vunpack.c.l.bf16 %v6478_v7  ;;  %v4111_v7 = vunpack.c.l.bf16 %v6480_v39 }
 0x3c9   : > { %v5759_v34 = vpop.f32.mrb[29].mxu0 }
 0x3ca   : > { %v8281_v6 = vadd.f32 %v5759_v34, %v5758_v25  ;;  %v5761_v21 = vpop.f32.mrb[30].mxu0  ;;  %v4099_v25 = vunpack.c.l.bf16 %v6468_v19  ;;  %v4122_v34 = vrot.slane %v4098_v29, 1  ;;  %v6470_v29 = vld [vmem:[%s6688_s13 + $0x40] sm:$0xf]  ;;  %v6472_v19 = vld [vmem:[%s6688_s13 + $0x3c] sm:$0xf] }
 0x3cb   : > { %v5762_v57 = vpop.f32.mrb[31].mxu0  ;;  %v4104_v4 = vunpack.c.l.bf16 %v6470_v29 }
 0x3cc   : > { %8672 = vst [vmem:[#allocation18_spill] sm:$0xff] %v8281_v6  ;;  %v8286_v54 = vadd.f32 %v5762_v57, %v5761_v21  ;;  %v8294_v21 = vsel %vm1146_vm1, %v4120_v0, %v4121_v42  ;;  %v4123_v33 = vrot.slane %v4099_v25, 1  ;;  %v4103_v0 = vunpack.c.l.bf16 %v6472_v19 }
 0x3cd   : > { %v8312_v60 = vsel %vm1146_vm1, %v4121_v42, %v4122_v34  ;;  %v4126_v25 = vrot.slane %v4102_v46, 1  ;;  %v4108_v6 = vunpack.c.l.bf16 %v6474_v9  ;;  %v6479_v46 = vld [vmem:[%s6688_s13 + $0x64] sm:$0xf] }
 0x3ce   : > { %8673 = vst [vmem:[#allocation19_spill] sm:$0xff] %v8286_v54  ;;  %v8326_v42 = vsel %vm1146_vm1, %v4123_v33, %v4124_v16  ;;  %v4113_v14 = vunpack.c.l.bf16 %v6479_v46  ;;  %v4127_v9 = vrot.slane %v4103_v0, 1  ;;  %v4134_v0 = vrot.slane %v4110_v8, 1 }
 0x3cf   : > { %v4132_v32 = vrot.slane %v4108_v6, 1 }
 0x3d0   : > { %v5764_v40 = vpop.f32.mrb[32].mxu0 }
 0x3d1   : > { %v5765_v61 = vpop.f32.mrb[33].mxu0 }
 0x3d2   : > { %v8305_v31 = vadd.f32 %v5765_v61, %v5764_v40  ;;  %v5767_v57 = vpop.f32.mrb[34].mxu0  ;;  %v8316_v61 = vsel %vm1146_vm1, %v4124_v16, %v4125_v18  ;;  %v6473_v40 = vld [vmem:[%s6688_s13 + $0x48] sm:$0xf]  ;;  %v8338_v16 = vsel %vm1146_vm1, %v4125_v18, %v4126_v25 }
 0x3d3   : > { %v5768_v13 = vpop.f32.mrb[35].mxu0  ;;  %v4106_v29 = vunpack.c.l.bf16 %v6473_v40 }
 0x3d4   : > { %8674 = vst [vmem:[#allocation20_spill] sm:$0xff] %v8305_v31  ;;  %v8319_v54 = vadd.f32 %v5768_v13, %v5767_v57  ;;  %v6475_v31 = vld [vmem:[%s6688_s13 + $0x54] sm:$0xf]  ;;  %v8333_v57 = vsel %vm1146_vm1, %v4122_v34, %v4123_v33  ;;  %v4128_v13 = vrot.slane %v4104_v4, 1  ;;  %v4131_v33 = vrot.slane %v4107_v12, 1 }
 0x3d5   : > { %v4109_v19 = vunpack.c.l.bf16 %v6475_v31  ;;  %v4129_v31 = vrot.slane %v4105_v1, 1  ;;  %v4130_v24 = vrot.slane %v4106_v29, 1  ;;  %v8358_v12 = vsel %vm1146_vm1, %v4126_v25, %v4127_v9  ;;  %v8378_v29 = vld [vmem:[%s8651_s6] ss:$0 sm:$0xff] }
 0x3d6   : > { %8675 = vst [vmem:[#allocation21_spill] sm:$0xff] %v8319_v54  ;;  %v6116_v40 = vpop.f32.mrb[4].mxu1 }
 0x3d7   : > { %v3936_v36 = vadd.f32 %v6116_v40, %v8197_v30  ;;  %v3927_v54 = vpop.f32.mrb[5].mxu1  ;;  %v4133_v34 = vrot.slane %v4109_v19, 1  ;;  %v4136_v30 = vrot.slane %v4112_v48, 1  ;;  %v8345_v40 = vrot.slane %v4113_v14, 1 }
 0x3d8   : > { %v8342_v46 = vadd.f32 %v8187_v28, %v3927_v54  ;;  %v6117_v17 = vpop.f32.mrb[6].mxu1  ;;  %v8350_v39 = vsel %vm1146_vm1, %v4128_v13, %v4129_v31  ;;  %v8354_v28 = vsel %vm1146_vm1, %v4127_v9, %v4128_v13  ;;  %v8362_v14 = vsel %vm1146_vm1, %v4129_v31, %v4130_v24 }
 0x3d9   : > { %v3939_v4 = vadd.f32 %v6117_v17, %v8202_v51  ;;  %v3930_v1 = vpop.f32.mrb[7].mxu1  ;;  %v4024_v51 = vrot.slane %v3936_v36, 1  ;;  %v8367_v6 = vsel %vm1146_vm1, %v4132_v32, %v4133_v34  ;;  %v8371_v54 = vsel %vm1146_vm1, %v4131_v33, %v4132_v32 }
 0x3da   : > { %8676 = vst [vmem:[#allocation22_spill] sm:$0xff] %v8342_v46  ;;  %v3931_v18 = vadd.f32 %v8192_v2, %v3930_v1  ;;  %v4135_v2 = vrot.slane %v4111_v7, 1  ;;  %v8654_v8 = vrot.slane %v8342_v46, 1  ;;  %v8383_v19 = vsel %vm1146_vm1, %v4130_v24, %v4131_v33  ;;  %v6481_v7 = vld [vmem:[%s6688_s13 + $0x68] sm:$0xf] }
 0x3db   : > { %v4025_v48 = vrot.slane %v3939_v4, 1  ;;  %v8387_v13 = vsel %vm1146_vm1, %v4133_v34, %v4134_v0  ;;  %v8392_v32 = vsel %vm1146_vm1, %v4136_v30, %v8345_v40  ;;  %v4114_v34 = vunpack.c.l.bf16 %v6481_v7  ;;  %v8406_v33 = vld [vmem:[%s8652_s7] ss:$0 sm:$0xff]  ;;  %v6483_v46 = vld [vmem:[%s6688_s13 + $0x74] sm:$0xf] }
 0x3dc   : > { %v4023_v17 = vrot.slane %v3931_v18, 1  ;;  %8677 = vst [vmem:[#allocation23_spill] sm:$0xff] %v8387_v13  ;;  %8678 = vst [vmem:[#allocation24_spill] sm:$0xff] %v8392_v32  ;;  %v4117_v13 = vunpack.c.l.bf16 %v6483_v46 }
 0x3dd   : > { %v4066_v25 = vsel %vm1146_vm1, %v4024_v51, %v4025_v48 }
 0x3de   : > { %v4072_v31 = vadd.f32 %v4066_v25, %v8166_v63  ;;  %v4067_v9 = vsel %vm1146_vm1, %v4023_v17, %v4024_v51  ;;  %v4068_v36 = vsel %vm1146_vm1, %v8654_v8, %v4023_v17  ;;  %v6120_v24 = vpop.f32.mrb[8].mxu1  ;;  %v8413_v51 = vsel %vm1146_vm1, %v4135_v2, %v4136_v30  ;;  %v6482_v8 = vld [vmem:[%s6688_s13 + $0x70] sm:$0xf] }
 0x3df   : > { %v4070_v63 = vadd.f32 %v4068_v36, %v8160_v23  ;;  %v4071_v4 = vadd.f32 %v4067_v9, %v8163_v52  ;;  %v3952_v1 = vadd.f32 %v6120_v24, %v8218_v44  ;;  %v3943_v18 = vpop.f32.mrb[9].mxu1  ;;  %v4116_v32 = vunpack.c.l.bf16 %v6482_v8 }
 0x3e0   : > { %v4175_v17 = vmul.f32 %v8378_v29, %v4072_v31  ;;  %v3944_v25 = vadd.f32 %v8207_v47, %v3943_v18  ;;  %v6121_v7 = vpop.f32.mrb[10].mxu1  ;;  %v8424_v30 = vsel %vm1146_vm1, %v4134_v0, %v4135_v2  ;;  %v8430_v36 = vrot.slane %v4114_v34, 1 }
 0x3e1   : > { %v4173_v23 = vmul.f32 %v8378_v29, %v4070_v63  ;;  %v4174_v52 = vmul.f32 %v8378_v29, %v4071_v4  ;;  %v3955_v44 = vadd.f32 %v6121_v7, %v8224_v22  ;;  %v3946_v9 = vpop.f32.mrb[11].mxu1  ;;  %v4028_v63 = vrot.slane %v3952_v1, 1 }
 0x3e2   : > { %v4206_v31 = vadd.f32 %v8406_v33, %v4175_v17  ;;  %v4026_v47 = vrot.slane %v3944_v25, 1  ;;  %v3947_v8 = vadd.f32 %v8212_v55, %v3946_v9  ;;  %v8436_v2 = vrot.slane %v4116_v32, 1 }
 0x3e3   : > { %v4204_v46 = vadd.f32 %v8406_v33, %v4173_v23  ;;  %v4205_v24 = vadd.f32 %v8406_v33, %v4174_v52  ;;  %v4029_v22 = vrot.slane %v3955_v44, 1  ;;  %v8438_v18 = vrot.slane %v4117_v13, 1 }
 0x3e4   : > { %v4065_v4 = vsel %vm1146_vm1, %v4025_v48, %v4026_v47  ;;  %v4027_v0 = vrot.slane %v3947_v8, 1  ;;  %v4230_v1 = vadd.f32 %v4206_v31, %v8294_v21 }
 0x3e5   : > { %v4228_v17 = vadd.f32 %v4204_v46, %v8303_v45  ;;  %v4229_v55 = vadd.f32 %v4205_v24, %v8298_v20  ;;  %v4073_v34 = vadd.f32 %v4065_v4, %v8169_v10  ;;  %v4062_v25 = vsel %vm1146_vm1, %v4028_v63, %v4029_v22 }
 0x3e6   : > { %v4076_v7 = vadd.f32 %v4062_v25, %v8182_v15  ;;  %v4063_v48 = vsel %vm1146_vm1, %v4027_v0, %v4028_v63  ;;  %v4064_v13 = vsel %vm1146_vm1, %v4026_v47, %v4027_v0  ;;  %v6124_v32 = vpop.f32.mrb[12].mxu1  ;;  %v4254_v25 = vmax.f32 %v4230_v1, 0.0 }
 0x3e7   : > { %v4252_v23 = vmax.f32 %v4228_v17, 0.0  ;;  %v4253_v45 = vmax.f32 %v4229_v55, 0.0  ;;  %v4176_v20 = vmul.f32 %v8378_v29, %v4073_v34  ;;  %v4074_v10 = vadd.f32 %v4064_v13, %v8172_v56  ;;  %v3959_v52 = vpop.f32.mrb[13].mxu1  ;;  %v8467_v17 = vld [vmem:[%s6688_s13 + $0x6c] sm:$0xf] }
 0x3e8   : > { %v4179_v15 = vmul.f32 %v8378_v29, %v4076_v7  ;;  %v4075_v21 = vadd.f32 %v4063_v48, %v8175_v3  ;;  %v3968_v44 = vadd.f32 %v6124_v32, %v8233_v59  ;;  %v3960_v9 = vadd.f32 %v8229_v62, %v3959_v52  ;;  %v6125_v31 = vpop.f32.mrb[14].mxu1 }
 0x3e9   : > { %v4997_v47 = vpack.c.bf16 %v4253_v45, %v4252_v23  ;;  %v4207_v56 = vadd.f32 %v8406_v33, %v4176_v20  ;;  %v4177_v8 = vmul.f32 %v8378_v29, %v4074_v10  ;;  %v3971_v46 = vadd.f32 %v6125_v31, %v8235_v27  ;;  %v3962_v24 = vpop.f32.mrb[15].mxu1 }
 0x3ea   : > { %v4178_v63 = vmul.f32 %v8378_v29, %v4075_v21  ;;  %v4032_v4 = vrot.slane %v3968_v44, 1  ;;  %v4030_v0 = vrot.slane %v3960_v9, 1  ;;  %v4115_v3 = vunpack.c.l.bf16 %v8467_v17 }
 0x3eb   : > { %4998 = vst [vmem:[%s8456_s18] sm:$0xff] %v4997_v47   ;;  %v4231_v62 = vadd.f32 %v4207_v56, %v8312_v60  ;;  %v4208_v59 = vadd.f32 %v8406_v33, %v4177_v8  ;;  %v4033_v55 = vrot.slane %v3971_v46, 1  ;;  %v3963_v34 = vadd.f32 %v8231_v43, %v3962_v24 }
 0x3ec   : > { %v4210_v27 = vadd.f32 %v8406_v33, %v4179_v15  ;;  %v4209_v7 = vadd.f32 %v8406_v33, %v4178_v63  ;;  %v4061_v48 = vsel %vm1146_vm1, %v4029_v22, %v4030_v0  ;;  %v8488_v22 = vsel %vm1146_vm1, %v8345_v40, %v8430_v36 }
 0x3ed   : > { %v4255_v13 = vmax.f32 %v4231_v62, 0.0  ;;  %v4232_v32 = vadd.f32 %v4208_v59, %v8333_v57  ;;  %v4077_v23 = vadd.f32 %v4061_v48, %v8185_v41  ;;  %v4058_v60 = vsel %vm1146_vm1, %v4032_v4, %v4033_v55 }
 0x3ee   : > { %v4233_v45 = vadd.f32 %v4209_v7, %v8326_v42  ;;  %v4080_v43 = vadd.f32 %v4058_v60, %v8200_v49  ;;  %v4031_v1 = vrot.slane %v3963_v34, 1  ;;  %v6128_v20 = vpop.f32.mrb[16].mxu1  ;;  %v4234_v21 = vadd.f32 %v4210_v27, %v8316_v61 }
 0x3ef   : > { %v5002_v10 = vpack.c.bf16 %v4255_v13, %v4254_v25  ;;  %v4256_v57 = vmax.f32 %v4232_v32, 0.0  ;;  %v4180_v41 = vmul.f32 %v8378_v29, %v4077_v23  ;;  %v3984_v52 = vadd.f32 %v6128_v20, %v8241_v58  ;;  %v3975_v15 = vpop.f32.mrb[17].mxu1 }
 0x3f0   : > { %v4257_v42 = vmax.f32 %v4233_v45, 0.0  ;;  %v4059_v49 = vsel %vm1146_vm1, %v4031_v1, %v4032_v4  ;;  %v4060_v44 = vsel %vm1146_vm1, %v4030_v0, %v4031_v1  ;;  %v6129_v9 = vpop.f32.mrb[18].mxu1  ;;  %v8505_v61 = vsel %vm1146_vm1, %v8436_v2, %v8438_v18  ;;  %v8679_v1 = vld [vmem:[#allocation4_spill] sm:$0xff] }
 0x3f1   : > { %5068 = vst [vmem:[%s8456_s18 + $0x8] sm:$0xff] %v5002_v10   ;;  %v4211_v40 = vadd.f32 %v8406_v33, %v4180_v41  ;;  %v4078_v31 = vadd.f32 %v4060_v44, %v8190_v38  ;;  %v4079_v47 = vadd.f32 %v4059_v49, %v8195_v11  ;;  %v3978_v58 = vpop.f32.mrb[19].mxu1  ;;  %v4183_v8 = vmul.f32 %v8378_v29, %v4080_v43  ;;  %v8682_v49 = vld [vmem:[#allocation3_spill] sm:$0xff] }
 0x3f2   : > { %v5007_v56 = vpack.c.bf16 %v4257_v42, %v4256_v57  ;;  %v3976_v46 = vadd.f32 %v8237_v37, %v3975_v15  ;;  %v3987_v24 = vadd.f32 %v6129_v9, %v8243_v50  ;;  %v3979_v4 = vadd.f32 %v8239_v53, %v3978_v58  ;;  %v8680_v57 = vld [vmem:[#allocation14_spill] sm:$0xff]  ;;  %v8683_v9 = vld [vmem:[#allocation8_spill] sm:$0xff] }
 0x3f3   : > { %v4235_v63 = vadd.f32 %v4211_v40, %v8338_v16  ;;  %v4181_v38 = vmul.f32 %v8378_v29, %v4078_v31  ;;  %v4182_v11 = vmul.f32 %v8378_v29, %v4079_v47  ;;  %v4258_v0 = vmax.f32 %v4234_v21, 0.0 }
 0x3f4   : > { %5069 = vst [vmem:[%s8456_s18 + $0x10] sm:$0xff] %v5007_v56   ;;  %v4036_v62 = vrot.slane %v3984_v52, 1  ;;  %v4034_v59 = vrot.slane %v3976_v46, 1  ;;  %v4037_v34 = vrot.slane %v3987_v24, 1  ;;  %v4035_v7 = vrot.slane %v3979_v4, 1  ;;  %v8684_v56 = vld [vmem:[#allocation17_spill] sm:$0xff] }
 0x3f5   : > { %v4259_v25 = vmax.f32 %v4235_v63, 0.0  ;;  %v4212_v27 = vadd.f32 %v8406_v33, %v4181_v38  ;;  %v4213_v37 = vadd.f32 %v8406_v33, %v4182_v11  ;;  %v4214_v50 = vadd.f32 %v8406_v33, %v4183_v8  ;;  %v8685_v38 = vld [vmem:[#allocation11_spill] sm:$0xff] }
 0x3f6   : > { %v4057_v16 = vsel %vm1146_vm1, %v4033_v55, %v4034_v59  ;;  %v4054_v53 = vsel %vm1146_vm1, %v4036_v62, %v4037_v34  ;;  %v6132_v48 = vpop.f32.mrb[20].mxu1  ;;  %v8526_v13 = vsel %vm1146_vm1, %v8438_v18, %v8288_v5  ;;  %v4055_v20 = vsel %vm1146_vm1, %v4035_v7, %v4036_v62 }
 0x3f7   : > { %v5012_v32 = vpack.c.bf16 %v4259_v25, %v4258_v0  ;;  %v4236_v23 = vadd.f32 %v4212_v27, %v8358_v12  ;;  %v4237_v60 = vadd.f32 %v4213_v37, %v8354_v28  ;;  %v4081_v45 = vadd.f32 %v4057_v16, %v8205_v26  ;;  %v3991_v43 = vpop.f32.mrb[21].mxu1  ;;  %v8681_v12 = vld [vmem:[#allocation2_spill] sm:$0xff] }
 0x3f8   : > { %v4084_v55 = vadd.f32 %v4054_v53, %v8679_v1  ;;  %v4056_v10 = vsel %vm1146_vm1, %v4034_v59, %v4035_v7  ;;  %v4000_v41 = vadd.f32 %v6132_v48, %v8680_v57  ;;  %v6133_v5 = vpop.f32.mrb[22].mxu1  ;;  %v4238_v21 = vadd.f32 %v4214_v50, %v8350_v39  ;;  %v8686_v53 = vld [vmem:[#allocation5_spill] sm:$0xff] }
 0x3f9   : > { %5070 = vst [vmem:[%s8456_s18 + $0x18] sm:$0xff] %v5012_v32   ;;  %v4260_v18 = vmax.f32 %v4236_v23, 0.0  ;;  %v4261_v52 = vmax.f32 %v4237_v60, 0.0  ;;  %v4184_v28 = vmul.f32 %v8378_v29, %v4081_v45  ;;  %v4082_v26 = vadd.f32 %v4056_v10, %v8681_v12  ;;  %v3994_v15 = vpop.f32.mrb[23].mxu1  ;;  %v8687_v45 = vld [vmem:[#allocation6_spill] sm:$0xff]  ;;  %v8690_v12 = vld [vmem:[#allocation20_spill] sm:$0xff] }
 0x3fa   : > { %v4187_v42 = vmul.f32 %v8378_v29, %v4084_v55  ;;  %v4083_v44 = vadd.f32 %v4055_v20, %v8682_v49  ;;  %v3992_v40 = vadd.f32 %v8683_v9, %v3991_v43  ;;  %v4003_v8 = vadd.f32 %v6133_v5, %v8684_v56 }
 0x3fb   : > { %v5017_v31 = vpack.c.bf16 %v4261_v52, %v4260_v18  ;;  %v4215_v47 = vadd.f32 %v8406_v33, %v4184_v28  ;;  %v4185_v58 = vmul.f32 %v8378_v29, %v4082_v26  ;;  %v3995_v39 = vadd.f32 %v8685_v38, %v3994_v15  ;;  %v8689_v18 = vld [vmem:[#allocation10_spill] sm:$0xff] }
 0x3fc   : > { %v4218_v46 = vadd.f32 %v8406_v33, %v4187_v42  ;;  %v4186_v24 = vmul.f32 %v8378_v29, %v4083_v44  ;;  %v4038_v63 = vrot.slane %v3992_v40, 1  ;;  %v4040_v0 = vrot.slane %v4000_v41, 1  ;;  %v8691_v15 = vld [vmem:[#allocation18_spill] sm:$0xff]  ;;  %v8692_v42 = vld [vmem:[#allocation21_spill] sm:$0xff] }
 0x3fd   : > { %5071 = vst [vmem:[%s8456_s18 + $0x20] sm:$0xff] %v5017_v31   ;;  %v4239_v11 = vadd.f32 %v4215_v47, %v8362_v14  ;;  %v4216_v4 = vadd.f32 %v8406_v33, %v4185_v58  ;;  %v4041_v62 = vrot.slane %v4003_v8, 1  ;;  %v4262_v59 = vmax.f32 %v4238_v21, 0.0  ;;  %v8693_v47 = vld [vmem:[#allocation23_spill] sm:$0xff] }
 0x3fe   : > { %v4217_v25 = vadd.f32 %v8406_v33, %v4186_v24  ;;  %v4053_v27 = vsel %vm1146_vm1, %v4037_v34, %v4038_v63  ;;  %v4039_v37 = vrot.slane %v3995_v39, 1  ;;  %v6136_v7 = vpop.f32.mrb[24].mxu1  ;;  %v4242_v23 = vadd.f32 %v4218_v46, %v8367_v6  ;;  %v8688_v6 = vld [vmem:[#allocation7_spill] sm:$0xff] }
 0x3ff   : > { %v4263_v50 = vmax.f32 %v4239_v11, 0.0  ;;  %v4240_v16 = vadd.f32 %v4216_v4, %v8383_v19  ;;  %v4085_v48 = vadd.f32 %v4053_v27, %v8686_v53  ;;  %v4050_v14 = vsel %vm1146_vm1, %v4040_v0, %v4041_v62  ;;  %v4007_v32 = vpop.f32.mrb[25].mxu1  ;;  %v8694_v39 = vld [vmem:[#allocation19_spill] sm:$0xff] }
 0x400   : > { %v4241_v60 = vadd.f32 %v4217_v25, %v8371_v54  ;;  %v4088_v43 = vadd.f32 %v4050_v14, %v8687_v45  ;;  %v4051_v34 = vsel %vm1146_vm1, %v4039_v37, %v4040_v0  ;;  %v6137_v1 = vpop.f32.mrb[26].mxu1  ;;  %v4052_v10 = vsel %vm1146_vm1, %v4038_v63, %v4039_v37  ;;  %v8695_v25 = vld [vmem:[#allocation22_spill] sm:$0xff] }
 0x401   : > { %v5022_v55 = vpack.c.bf16 %v4263_v50, %v4262_v59  ;;  %v4264_v20 = vmax.f32 %v4240_v16, 0.0  ;;  %v4188_v19 = vmul.f32 %v8378_v29, %v4085_v48  ;;  %v4010_v57 = vpop.f32.mrb[27].mxu1  ;;  %v4086_v54 = vadd.f32 %v4052_v10, %v8688_v6  ;;  %v8697_v16 = vld [vmem:[#allocation9_spill] sm:$0xff] }
 0x402   : > { %v4265_v41 = vmax.f32 %v4241_v60, 0.0  ;;  %v4191_v5 = vmul.f32 %v8378_v29, %v4088_v43  ;;  %v4087_v52 = vadd.f32 %v4051_v34, %v8689_v18  ;;  %v4016_v26 = vadd.f32 %v6136_v7, %v8690_v12  ;;  %v8700_v43 = vld [vmem:[#allocation24_spill] sm:$0xff] }
 0x403   : > { %5072 = vst [vmem:[%s8456_s18 + $0x28] sm:$0xff] %v5022_v55   ;;  %v4219_v28 = vadd.f32 %v8406_v33, %v4188_v19  ;;  %v4008_v21 = vadd.f32 %v8691_v15, %v4007_v32  ;;  %v4019_v49 = vadd.f32 %v6137_v1, %v8692_v42  ;;  %v4266_v44 = vmax.f32 %v4242_v23, 0.0  ;;  %v8698_v32 = vld [vmem:[#allocation12_spill] sm:$0xff]  ;;  %v8699_v23 = vld [vmem:[#allocation15_spill] sm:$0xff] }
 0x404   : > { %v5027_v9 = vpack.c.bf16 %v4265_v41, %v4264_v20  ;;  %v4189_v40 = vmul.f32 %v8378_v29, %v4086_v54  ;;  %v4190_v31 = vmul.f32 %v8378_v29, %v4087_v52  ;;  %v4044_v56 = vrot.slane %v4016_v26, 1 }
 0x405   : > { %v4243_v58 = vadd.f32 %v4219_v28, %v8693_v47  ;;  %v4042_v8 = vrot.slane %v4008_v21, 1  ;;  %v4045_v46 = vrot.slane %v4019_v49, 1  ;;  %v4222_v24 = vadd.f32 %v8406_v33, %v4191_v5  ;;  %v8702_v5 = vld [vmem:[#allocation16_spill] sm:$0xff] }
 0x406   : > { %5073 = vst [vmem:[%s8456_s18 + $0x30] sm:$0xff] %v5027_v9   ;;  %v4220_v63 = vadd.f32 %v8406_v33, %v4189_v40  ;;  %v4221_v38 = vadd.f32 %v8406_v33, %v4190_v31  ;;  %v4011_v11 = vadd.f32 %v8694_v39, %v4010_v57  ;;  %v8696_v27 = vrot.slane %v8695_v25, 1  ;;  %v8701_v57 = vld [vmem:[#allocation13_spill] sm:$0xff] }
 0x407   : > { %v4267_v4 = vmax.f32 %v4243_v58, 0.0  ;;  %v4049_v0 = vsel %vm1146_vm1, %v4041_v62, %v4042_v8  ;;  %v4046_v59 = vsel %vm1146_vm1, %v4044_v56, %v4045_v46  ;;  %v4139_v48 = vrot.slane %v4115_v3, 1 }
 0x408   : > { %v4069_v37 = vsel %vm1146_vm1, %v4045_v46, %v8696_v27  ;;  %v4244_v7 = vadd.f32 %v4220_v63, %v8424_v30  ;;  %v4245_v50 = vadd.f32 %v4221_v38, %v8413_v51  ;;  %v4089_v53 = vadd.f32 %v4049_v0, %v8697_v16 }
 0x409   : > { %v5032_v14 = vpack.c.bf16 %v4267_v4, %v4266_v44  ;;  %v4092_v62 = vadd.f32 %v4046_v59, %v8698_v32  ;;  %v4093_v60 = vadd.f32 %v4069_v37, %v8699_v23  ;;  %v4043_v45 = vrot.slane %v4011_v11, 1 }
 0x40a   : > { %v4246_v34 = vadd.f32 %v4222_v24, %v8700_v43  ;;  %v4268_v1 = vmax.f32 %v4244_v7, 0.0  ;;  %v4269_v55 = vmax.f32 %v4245_v50, 0.0  ;;  %v4192_v30 = vmul.f32 %v8378_v29, %v4089_v53 }
 0x40b   : > { %5074 = vst [vmem:[%s8456_s18 + $0x38] sm:$0xff] %v5032_v14   ;;  %v4195_v51 = vmul.f32 %v8378_v29, %v4092_v62  ;;  %v4196_v20 = vmul.f32 %v8378_v29, %v4093_v60  ;;  %v4047_v17 = vsel %vm1146_vm1, %v4043_v45, %v4044_v56  ;;  %v4048_v3 = vsel %vm1146_vm1, %v4042_v8, %v4043_v45 }
 0x40c   : > { %v5037_v19 = vpack.c.bf16 %v4269_v55, %v4268_v1  ;;  %v4223_v10 = vadd.f32 %v8406_v33, %v4192_v30  ;;  %v4090_v41 = vadd.f32 %v4048_v3, %v8701_v57  ;;  %v4091_v6 = vadd.f32 %v4047_v17, %v8702_v5 }
 0x40d   : > { %v4226_v54 = vadd.f32 %v8406_v33, %v4195_v51  ;;  %v4227_v18 = vadd.f32 %v8406_v33, %v4196_v20  ;;  %v4143_v21 = vsel %vm1146_vm1, %v4139_v48, %v8436_v2  ;;  %v4144_v42 = vsel %vm1146_vm1, %v8430_v36, %v4139_v48 }
 0x40e   : > { %5075 = vst [vmem:[%s8456_s18 + $0x40] sm:$0xff] %v5037_v19   ;;  %v4247_v52 = vadd.f32 %v4223_v10, %v8488_v22  ;;  %v4193_v28 = vmul.f32 %v8378_v29, %v4090_v41  ;;  %v4194_v12 = vmul.f32 %v8378_v29, %v4091_v6  ;;  %v4270_v22 = vmax.f32 %v4246_v34, 0.0 }
 0x40f   : > { %v4250_v26 = vadd.f32 %v4226_v54, %v8505_v61  ;;  %v4251_v15 = vadd.f32 %v4227_v18, %v8526_v13 }
 0x410   : > { %v4271_v49 = vmax.f32 %v4247_v52, 0.0  ;;  %v4224_v44 = vadd.f32 %v8406_v33, %v4193_v28  ;;  %v4225_v29 = vadd.f32 %v8406_v33, %v4194_v12 }
 0x411   : > { %v4274_v9 = vmax.f32 %v4250_v26, 0.0  ;;  %v4275_v61 = vmax.f32 %v4251_v15, 0.0 }
 0x412   : > { %v5042_v40 = vpack.c.bf16 %v4271_v49, %v4270_v22  ;;  %v4248_v13 = vadd.f32 %v4224_v44, %v4144_v42  ;;  %v4249_v31 = vadd.f32 %v4225_v29, %v4143_v21 }
 0x413   : > { %v5052_v47 = vpack.c.bf16 %v4275_v61, %v4274_v9 }
 0x414   : > { %5076 = vst [vmem:[%s8456_s18 + $0x48] sm:$0xff] %v5042_v40   ;;  %v4272_v58 = vmax.f32 %v4248_v13, 0.0  ;;  %v4273_v2 = vmax.f32 %v4249_v31, 0.0 }
 0x415   : > { %5078 = vst [vmem:[%s8456_s18 + $0x58] sm:$0xff] %v5052_v47  }
 0x416   : > { %v5047_v56 = vpack.c.bf16 %v4273_v2, %v4272_v58 }
 0x418   : > { %5077 = vst [vmem:[%s8456_s18 + $0x50] sm:$0xff] %v5047_v56  }
 0x419 PF: > { %s18_s9 = sadd.s32 1, %s6523_s9   ;;  %s8703_s27 = smov %s6515_s29 }
 0x41a   : > { %p15_p7 = scmp.ge.s32.totalorder %s18_s9, 6   ;;  %s8704_s28 = smov %s6519_s30 }
 0x41b   : > { %s8705_s29 = smov %s8708_s10  ;;  %s8706_s30 = smov %s8712_s11 }
 0x41c   :  { %17 = sbr.rel (!%p15_p7) target bundleno = 3 (0x3), region = 89 }

</bundles_post_ra>
